<compile_context>
chip_gen: v5e
topology: v5e:2x2
jax: 0.10.0
libtpu: 0.0.40
codegen_flags: <defaults>
</compile_context>

<pallas_src>
import functools

import jax
import jax.numpy as jnp
from jax import lax
from jax.experimental import pallas as pl
from jax.experimental.pallas import tpu as pltpu

D = 32     # hidden feature dim
NQ = 8     # query-graph nodes per pair
NT = 16    # target-graph nodes per pair (NT >= NQ: module indexes Xt_val_cross[u])
B = 32     # graph pairs in the batch
TB = 16    # graph pairs per grid step (sweepable)
LANE = 128


# ------------------------------ fused kernel --------------------------------
def _pack_rows(x, g):
    """(M, D) -> (M//g, g*D): g row-quarters side by side -> 128-lane stores."""
    if g == 1:
        return x
    m = x.shape[0] // g
    return jnp.concatenate([x[i * m:(i + 1) * m, :] for i in range(g)], axis=-1)


def _fused_gmn_kernel(xq_ref, xt_ref, maskT_ref, hc_ref, wp_ref, bp_ref,
                      wq_ref, bq_ref, wt_ref, bt_ref,
                      xq_out_ref, xt_out_ref, *, t2q, q2t):
    cdt = wp_ref.dtype                           # bf16 MXU operand dtype
    tb, nq, d = xq_ref.shape
    nt = xt_ref.shape[1]
    gq = xq_out_ref.shape[-1] // d               # lane-pack factor (4 when D=32)
    gt = xt_out_ref.shape[-1] // d

    def elu(v):
        # F.elu, alpha=1; exp arg clamped so the discarded branch never infs.
        # TODO(synk): switch to expm1 on the negative branch once Mosaic lowers it.
        return jnp.where(v > 0.0, v, jnp.exp(jnp.minimum(v, 0.0)) - 1.0)

    xq3 = xq_ref[...]                            # (TB, NQ, D) bf16
    xt3 = xt_ref[...]                            # (TB, NT, D) bf16
    xqf = xq3.reshape(tb * nq, d)                # leading-dim collapse (layout no-op)
    xtf = xt3.reshape(tb * nt, d)

    # ---- packed cross projections (one lane-dense MXU push per side) --------
    # cols [0:D]=att_cross_q [D:2D]=val_cross_q [2D:3D]=att_cross_t [3D:4D]=val_cross_t
    wp = wp_ref[...]                             # (D, 4D) bf16
    bp = bp_ref[...]                             # (1, 4D) f32
    yq = elu(jnp.dot(xqf, wp, preferred_element_type=jnp.float32) + bp)  # (TB*NQ, 4D)
    yt = elu(jnp.dot(xtf, wp, preferred_element_type=jnp.float32) + bp)  # (TB*NT, 4D)

    xq_att3 = yq[:, 0:d].reshape(tb, nq, d)                  # f32
    xq_val3 = yq[:, d:2 * d].reshape(tb, nq, d)
    xt_att3 = yt[:, 2 * d:3 * d].reshape(tb, nt, d)
    xt_val3 = yt[:, 3 * d:4 * d].reshape(tb, nt, d)

    # ---- t2q: collapsed Xt2q + merge_q (split per-block dots, no concat) -----
    if t2q:
        hc = hc_ref[...] > 0.0                                # (TB, NQ, 1)
        xt2q = jnp.where(hc, xt_val3[:, 0:nq, :], 0.0)        # (TB, NQ, D) f32
        wq = wq_ref[...]                                      # (2D, D) bf16
        xq_m = (jnp.dot(xqf, wq[0:d, :], preferred_element_type=jnp.float32)
                + jnp.dot(xt2q.reshape(tb * nq, d).astype(cdt), wq[d:2 * d, :],
                          preferred_element_type=jnp.float32)
                + bq_ref[...])                                # (TB*NQ, D) f32
    else:
        xq_m = xqf.astype(jnp.float32)

    xq_out_ref[...] = _pack_rows(xq_m, gq).astype(xq_out_ref.dtype)

    # ---- q2t: masked column softmax (computed transposed) + merge_t ----------
    if q2t:
        maskb = maskT_ref[...].astype(jnp.float32) > 0.0      # (TB, NT, NQ)
        # att_logits[v, u] = <Xt_att_cross[v], Xq_att_cross[u]> for candidate pairs
        s = jnp.einsum('btd,bqd->btq', xt_att3.astype(cdt), xq_att3.astype(cdt),
                       preferred_element_type=jnp.float32)    # (TB, NT, NQ)
        sm = jnp.where(maskb, s, jnp.float32(-1e30))
        mx = jnp.max(sm, axis=-1, keepdims=True)
        p = jnp.where(maskb, jnp.exp(sm - mx), 0.0)           # masked: no inf/exp blowup
        den = jnp.sum(p, axis=-1, keepdims=True)
        a = p / jnp.where(den > 0.0, den, 1.0)                # rows w/o candidates -> 0
        # scatter_add(att_v * Xq_val_cross[u], v) == a @ Xq_val_cross  (per pair)
        xq2t = jnp.einsum('btq,bqd->btd', a.astype(cdt), xq_val3.astype(cdt),
                          preferred_element_type=jnp.float32)  # (TB, NT, D)

        wt = wt_ref[...]                                       # (3D, D) bf16
        # mean(Xq) @ Wt3 == mean(Xq @ Wt3): fold the mean through the matmul so
        # no small-vector relayout is needed.
        qproj_rows = jnp.dot(xqf, wt[2 * d:3 * d, :],
                             preferred_element_type=jnp.float32)          # (TB*NQ, D)
        qproj = jnp.mean(qproj_rows.reshape(tb, nq, d), axis=1, keepdims=True)  # (TB,1,D)

        xt_m3 = (jnp.dot(xtf, wt[0:d, :], preferred_element_type=jnp.float32)
                 + jnp.dot(xq2t.reshape(tb * nt, d).astype(cdt), wt[d:2 * d, :],
                           preferred_element_type=jnp.float32)).reshape(tb, nt, d)
        xt_m3 = xt_m3 + qproj + bt_ref[...]
        xt_m = xt_m3.reshape(tb * nt, d)                       # (TB*NT, D) f32
    else:
        xt_m = xtf.astype(jnp.float32)

    xt_out_ref[...] = _pack_rows(xt_m, gt).astype(xt_out_ref.dtype)


# ------------------------------ wrapper --------------------------------------
def pack_params(params):
    """Pre-pack weights ONCE at init: lane-dense, bf16 MXU operands."""
    d = params["att_cross_q_w"].shape[0]
    wp = jnp.concatenate([params["att_cross_q_w"], params["val_cross_q_w"],
                          params["att_cross_t_w"], params["val_cross_t_w"]],
                         axis=1).astype(jnp.bfloat16)           # (D, 4D)
    bp = jnp.concatenate([params["att_cross_q_b"], params["val_cross_q_b"],
                          params["att_cross_t_b"], params["val_cross_t_b"]]
                         ).reshape(1, 4 * d).astype(jnp.float32)
    wq = params["merge_q_w"].astype(jnp.bfloat16)               # (2D, D)
    bq = params["merge_q_b"].reshape(1, d).astype(jnp.float32)
    wt = params["merge_t_w"].astype(jnp.bfloat16)               # (3D, D)
    bt = params["merge_t_b"].reshape(1, d).astype(jnp.float32)
    return dict(wp=wp, bp=bp, wq=wq, bq=bq, wt=wt, bt=bt)


def _unpack(packed2d, nb, tb, n, d):
    """(NB*TB*n/g, g*D) lane-packed slab -> (B, n, D).  Pure wrapper-side plumbing."""
    g = packed2d.shape[-1] // d
    tbg = tb // g
    t = packed2d.reshape(nb, tbg, n, g, d)
    t = jnp.transpose(t, (0, 3, 1, 2, 4))       # (NB, g, TB/g, n, D)
    return t.reshape(nb * tb, n, d)


def our_gmn_custom_forward(packed, Xq, Xt, cross_mask, *, t2q=True, q2t=True,
                           only_run_inter=True, tb=TB):
    """Batched fused forward.  Xq:(B,NQ,D) Xt:(B,NT,D) cross_mask:(B,NQ,NT)."""
    if not only_run_inter:
        # TODO(synk): intra-graph message passing branch (edge_index gather +
        # scatter_softmax/scatter_add with mlp_att_*/mlp_value_*) not implemented;
        # the module's default path uses only_run_inter=True.
        raise NotImplementedError
    b, nq, d = Xq.shape
    nt = Xt.shape[1]
    assert nq <= nt, "module indexes Xt_val_cross with query node ids"
    g = max(1, LANE // d)                        # pairs packed per 128-lane row
    assert b % tb == 0, "TODO(synk): pad the batch to a multiple of tb"
    assert tb % g == 0
    nb = b // tb
    m4q, m4t = tb * nq // g, tb * nt // g
    assert m4q % 8 == 0 and m4t % 8 == 0

    # Lane/DMA-friendly auxiliary inputs (computed once per forward, outside kernel).
    maskT = jnp.transpose(cross_mask, (0, 2, 1)).astype(jnp.bfloat16)      # (B, NT, NQ)
    has_cand = (jnp.sum(cross_mask, axis=-1, keepdims=True) > 0
                ).astype(jnp.float32)                                      # (B, NQ, 1)
    xq_bf = Xq.astype(jnp.bfloat16)
    xt_bf = Xt.astype(jnp.bfloat16)

    kernel = functools.partial(_fused_gmn_kernel, t2q=t2q, q2t=q2t)
    xq_pack, xt_pack = pl.pallas_call(
        kernel,
        grid=(nb,),
        out_shape=(jax.ShapeDtypeStruct((nb * m4q, g * d), jnp.float32),
                   jax.ShapeDtypeStruct((nb * m4t, g * d), jnp.float32)),
        in_specs=[
            pl.BlockSpec((tb, nq, d), lambda i: (i, 0, 0)),     # Xq   (bf16)
            pl.BlockSpec((tb, nt, d), lambda i: (i, 0, 0)),     # Xt   (bf16)
            pl.BlockSpec((tb, nt, nq), lambda i: (i, 0, 0)),    # mask^T (bf16)
            pl.BlockSpec((tb, nq, 1), lambda i: (i, 0, 0)),     # has_cand
            pl.BlockSpec((d, 4 * d), lambda i: (0, 0)),         # packed cross-proj W
            pl.BlockSpec((1, 4 * d), lambda i: (0, 0)),         # packed cross-proj b
            pl.BlockSpec((2 * d, d), lambda i: (0, 0)),         # merge_q W
            pl.BlockSpec((1, d), lambda i: (0, 0)),             # merge_q b
            pl.BlockSpec((3 * d, d), lambda i: (0, 0)),         # merge_t W
            pl.BlockSpec((1, d), lambda i: (0, 0)),             # merge_t b
        ],
        out_specs=(pl.BlockSpec((m4q, g * d), lambda i: (i, 0)),
                   pl.BlockSpec((m4t, g * d), lambda i: (i, 0))),
        compiler_params=pltpu.CompilerParams(
            dimension_semantics=("parallel",)),
    )(xq_bf, xt_bf, maskT, has_cand, packed["wp"], packed["bp"], packed["wq"],
      packed["bq"], packed["wt"], packed["bt"])

    return _unpack(xq_pack, nb, tb, nq, d), _unpack(xt_pack, nb, tb, nt, d)


# --------------------------- pure-JAX reference ------------------------------
def _reference_pair(params, Xq, Xt, mask):
    """Un-fused f32 reference for ONE graph pair, full (uncollapsed)
    scatter_softmax/scatter_add formulation for both directions."""
    def elu(y):
        return jnp.where(y > 0.0, y, jnp.exp(jnp.minimum(y, 0.0)) - 1.0)

    def lin(x, w, bias):
        return x @ w + bias

    nq, d = Xq.shape
    xq_att = elu(lin(Xq, params["att_cross_q_w"], params["att_cross_q_b"]))
    xt_att = elu(lin(Xt, params["att_cross_t_w"], params["att_cross_t_b"]))
    xt_val = elu(lin(Xt, params["val_cross_t_w"], params["val_cross_t_b"]))
    xq_val = elu(lin(Xq, params["val_cross_q_w"], params["val_cross_q_b"]))

    s = xq_att @ xt_att.T
    m = mask > 0.0
    sm = jnp.where(m, s, -1e30)

    # t2q (full row softmax; validates the in-kernel collapse)
    row_max = jnp.max(sm, axis=1, keepdims=True)
    p_row = jnp.where(m, jnp.exp(sm - row_max), 0.0)
    row_sum = p_row.sum(1, keepdims=True)
    a_row = p_row / jnp.where(row_sum > 0.0, row_sum, 1.0)
    xt2q = a_row.sum(1, keepdims=True) * xt_val[:nq]
    xq_m = jnp.concatenate([Xq, xt2q], 1) @ params["merge_q_w"] + params["merge_q_b"]

    # q2t (column softmax)
    col_max = jnp.max(sm, axis=0, keepdims=True)
    p_col = jnp.where(m, jnp.exp(sm - col_max), 0.0)
    col_sum = p_col.sum(0, keepdims=True)
    a_col = p_col / jnp.where(col_sum > 0.0, col_sum, 1.0)
    xq2t = a_col.T @ xq_val
    Q = jnp.broadcast_to(jnp.mean(Xq, axis=0, keepdims=True), (Xt.shape[0], d))
    xt_m = jnp.concatenate([Xt, xq2t, Q], 1) @ params["merge_t_w"] + params["merge_t_b"]
    return xq_m, xt_m


# --------------------------------- main --------------------------------------
if __name__ == "__main__":
    key = jax.random.PRNGKey(0)
    ks = jax.random.split(key, 16)

    def w(k, shape):
        return jax.random.normal(k, shape, jnp.float32) * 0.1

    params = {
        "att_cross_q_w": w(ks[0], (D, D)), "att_cross_q_b": w(ks[1], (D,)),
        "att_cross_t_w": w(ks[2], (D, D)), "att_cross_t_b": w(ks[3], (D,)),
        "val_cross_q_w": w(ks[4], (D, D)), "val_cross_q_b": w(ks[5], (D,)),
        "val_cross_t_w": w(ks[6], (D, D)), "val_cross_t_b": w(ks[7], (D,)),
        "merge_q_w": w(ks[8], (2 * D, D)), "merge_q_b": w(ks[9], (D,)),
        "merge_t_w": w(ks[10], (3 * D, D)), "merge_t_b": w(ks[11], (D,)),
    }

    Xq = jax.random.normal(ks[12], (B, NQ, D), jnp.float32)
    Xt = jax.random.normal(ks[13], (B, NT, D), jnp.float32)
    # dense encoding of u2v_li per pair: mask[b, u, v] = 1 iff v is a candidate of u
    cross_mask = (jax.random.uniform(ks[14], (B, NQ, NT)) < 0.5).astype(jnp.float32)

    packed = pack_params(params)   # once at init, not per forward

    Xq_out, Xt_out = our_gmn_custom_forward(packed, Xq, Xt, cross_mask,
                                            t2q=True, q2t=True,
                                            only_run_inter=True, tb=TB)
    jax.block_until_ready((Xq_out, Xt_out))

    Xq_ref, Xt_ref = jax.vmap(functools.partial(_reference_pair, params))(
        Xq, Xt, cross_mask)

    assert Xq_out.shape == (B, NQ, D) and Xt_out.shape == (B, NT, D)
    # bf16 MXU operands (deliberate, per perf review) vs the f32 reference:
    # observed error is O(1e-2) absolute at these magnitudes.
    assert jnp.allclose(Xq_out, Xq_ref, rtol=5e-2, atol=5e-2)
    assert jnp.allclose(Xt_out, Xt_ref, rtol=5e-2, atol=5e-2)

    print("KERNEL_OK")
</pallas_src>

<mosaic_0001>
module attributes {stable_mosaic.version = 11 : i64} {
  func.func @_fused_gmn_kernel(%arg0: i32, %arg1: memref<16x8x32xbf16, #tpu.memory_space<vmem>>, %arg2: memref<16x16x32xbf16, #tpu.memory_space<vmem>>, %arg3: memref<16x16x8xbf16, #tpu.memory_space<vmem>>, %arg4: memref<16x8x1xf32, #tpu.memory_space<vmem>>, %arg5: memref<32x128xbf16, #tpu.memory_space<vmem>>, %arg6: memref<1x128xf32, #tpu.memory_space<vmem>>, %arg7: memref<64x32xbf16, #tpu.memory_space<vmem>>, %arg8: memref<1x32xf32, #tpu.memory_space<vmem>>, %arg9: memref<96x32xbf16, #tpu.memory_space<vmem>>, %arg10: memref<1x32xf32, #tpu.memory_space<vmem>>, %arg11: memref<32x128xf32, #tpu.memory_space<vmem>>, %arg12: memref<64x128xf32, #tpu.memory_space<vmem>>) attributes {dimension_semantics = [#tpu.dimension_semantics<parallel>], iteration_bounds = array<i64: 2>, scalar_prefetch = 0 : i64, scratch_operands = 0 : i64, tpu.core_type = #tpu.core_type<tc>, window_params = [{transform_indices = @transform_0, window_bounds = array<i64: 16, 8, 32>}, {transform_indices = @transform_1, window_bounds = array<i64: 16, 16, 32>}, {transform_indices = @transform_2, window_bounds = array<i64: 16, 16, 8>}, {transform_indices = @transform_3, window_bounds = array<i64: 16, 8, 1>}, {pipeline_mode = #tpu.pipeline_mode<synchronous>, transform_indices = @transform_4, window_bounds = array<i64: 32, 128>}, {pipeline_mode = #tpu.pipeline_mode<synchronous>, transform_indices = @transform_5, window_bounds = array<i64: 1, 128>}, {pipeline_mode = #tpu.pipeline_mode<synchronous>, transform_indices = @transform_6, window_bounds = array<i64: 64, 32>}, {pipeline_mode = #tpu.pipeline_mode<synchronous>, transform_indices = @transform_7, window_bounds = array<i64: 1, 32>}, {pipeline_mode = #tpu.pipeline_mode<synchronous>, transform_indices = @transform_8, window_bounds = array<i64: 96, 32>}, {pipeline_mode = #tpu.pipeline_mode<synchronous>, transform_indices = @transform_9, window_bounds = array<i64: 1, 32>}, {transform_indices = @transform_10, window_bounds = array<i64: 32, 128>}, {transform_indices = @transform_11, window_bounds = array<i64: 64, 128>}]} {
    %c0 = arith.constant 0 : index
    %c0_0 = arith.constant 0 : index
    %c0_1 = arith.constant 0 : index
    %0 = vector.load %arg1[%c0, %c0_0, %c0_1] : memref<16x8x32xbf16, #tpu.memory_space<vmem>>, vector<16x8x32xbf16>
    %c0_2 = arith.constant 0 : index
    %c0_3 = arith.constant 0 : index
    %c0_4 = arith.constant 0 : index
    %1 = vector.load %arg2[%c0_2, %c0_3, %c0_4] : memref<16x16x32xbf16, #tpu.memory_space<vmem>>, vector<16x16x32xbf16>
    %2 = vector.shape_cast %0 : vector<16x8x32xbf16> to vector<128x32xbf16>
    %3 = vector.shape_cast %1 : vector<16x16x32xbf16> to vector<256x32xbf16>
    %c0_5 = arith.constant 0 : index
    %c0_6 = arith.constant 0 : index
    %4 = vector.load %arg5[%c0_5, %c0_6] : memref<32x128xbf16, #tpu.memory_space<vmem>>, vector<32x128xbf16>
    %c0_7 = arith.constant 0 : index
    %c0_8 = arith.constant 0 : index
    %5 = vector.load %arg6[%c0_7, %c0_8] : memref<1x128xf32, #tpu.memory_space<vmem>>, vector<1x128xf32>
    %cst = arith.constant dense<0.000000e+00> : vector<128x128xf32>
    %6 = tpu.matmul %2, %4, %cst {dimension_numbers = #tpu.dot_dimension_numbers<[1], [0], [0], [1], [0, 0, 1, 1], [], []>} : vector<128x32xbf16>, vector<32x128xbf16>, vector<128x128xf32> -> vector<128x128xf32>
    %7 = vector.broadcast %5 : vector<1x128xf32> to vector<128x128xf32>
    %8 = arith.addf %6, %7 : vector<128x128xf32>
    %cst_9 = arith.constant 0.000000e+00 : f32
    %9 = vector.broadcast %cst_9 : f32 to vector<128x128xf32>
    %10 = arith.cmpf ogt, %8, %9 : vector<128x128xf32>
    %cst_10 = arith.constant 0.000000e+00 : f32
    %11 = vector.broadcast %cst_10 : f32 to vector<128x128xf32>
    %12 = arith.minimumf %8, %11 : vector<128x128xf32>
    %13 = math.exp %12 : vector<128x128xf32>
    %cst_11 = arith.constant 1.000000e+00 : f32
    %14 = vector.broadcast %cst_11 : f32 to vector<128x128xf32>
    %15 = arith.subf %13, %14 : vector<128x128xf32>
    %16 = arith.select %10, %8, %15 : vector<128x128xi1>, vector<128x128xf32>
    %cst_12 = arith.constant dense<0.000000e+00> : vector<256x128xf32>
    %17 = tpu.matmul %3, %4, %cst_12 {dimension_numbers = #tpu.dot_dimension_numbers<[1], [0], [0], [1], [0, 0, 1, 1], [], []>} : vector<256x32xbf16>, vector<32x128xbf16>, vector<256x128xf32> -> vector<256x128xf32>
    %18 = vector.broadcast %5 : vector<1x128xf32> to vector<256x128xf32>
    %19 = arith.addf %17, %18 : vector<256x128xf32>
    %cst_13 = arith.constant 0.000000e+00 : f32
    %20 = vector.broadcast %cst_13 : f32 to vector<256x128xf32>
    %21 = arith.cmpf ogt, %19, %20 : vector<256x128xf32>
    %cst_14 = arith.constant 0.000000e+00 : f32
    %22 = vector.broadcast %cst_14 : f32 to vector<256x128xf32>
    %23 = arith.minimumf %19, %22 : vector<256x128xf32>
    %24 = math.exp %23 : vector<256x128xf32>
    %cst_15 = arith.constant 1.000000e+00 : f32
    %25 = vector.broadcast %cst_15 : f32 to vector<256x128xf32>
    %26 = arith.subf %24, %25 : vector<256x128xf32>
    %27 = arith.select %21, %19, %26 : vector<256x128xi1>, vector<256x128xf32>
    %28 = vector.extract_strided_slice %16 {offsets = [0, 0], sizes = [128, 32], strides = [1, 1]} : vector<128x128xf32> to vector<128x32xf32>
    %29 = vector.shape_cast %28 : vector<128x32xf32> to vector<16x8x32xf32>
    %30 = vector.extract_strided_slice %16 {offsets = [0, 32], sizes = [128, 32], strides = [1, 1]} : vector<128x128xf32> to vector<128x32xf32>
    %31 = vector.shape_cast %30 : vector<128x32xf32> to vector<16x8x32xf32>
    %32 = vector.extract_strided_slice %27 {offsets = [0, 64], sizes = [256, 32], strides = [1, 1]} : vector<256x128xf32> to vector<256x32xf32>
    %33 = vector.shape_cast %32 : vector<256x32xf32> to vector<16x16x32xf32>
    %34 = vector.extract_strided_slice %27 {offsets = [0, 96], sizes = [256, 32], strides = [1, 1]} : vector<256x128xf32> to vector<256x32xf32>
    %35 = vector.shape_cast %34 : vector<256x32xf32> to vector<16x16x32xf32>
    %c0_16 = arith.constant 0 : index
    %c0_17 = arith.constant 0 : index
    %c0_18 = arith.constant 0 : index
    %36 = vector.load %arg4[%c0_16, %c0_17, %c0_18] : memref<16x8x1xf32, #tpu.memory_space<vmem>>, vector<16x8x1xf32>
    %cst_19 = arith.constant 0.000000e+00 : f32
    %37 = vector.broadcast %cst_19 : f32 to vector<16x8x1xf32>
    %38 = arith.cmpf ogt, %36, %37 : vector<16x8x1xf32>
    %39 = vector.extract_strided_slice %35 {offsets = [0, 0, 0], sizes = [16, 8, 32], strides = [1, 1, 1]} : vector<16x16x32xf32> to vector<16x8x32xf32>
    %cst_20 = arith.constant 0.000000e+00 : f32
    %40 = vector.shape_cast %38 : vector<16x8x1xi1> to vector<16x8x1xi1>
    %41 = vector.broadcast %40 : vector<16x8x1xi1> to vector<16x8x32xi1>
    %42 = vector.broadcast %cst_20 : f32 to vector<16x8x32xf32>
    %43 = arith.select %41, %39, %42 : vector<16x8x32xi1>, vector<16x8x32xf32>
    %c0_21 = arith.constant 0 : index
    %c0_22 = arith.constant 0 : index
    %44 = vector.load %arg7[%c0_21, %c0_22] : memref<64x32xbf16, #tpu.memory_space<vmem>>, vector<64x32xbf16>
    %45 = vector.extract_strided_slice %44 {offsets = [0, 0], sizes = [32, 32], strides = [1, 1]} : vector<64x32xbf16> to vector<32x32xbf16>
    %cst_23 = arith.constant dense<0.000000e+00> : vector<128x32xf32>
    %46 = tpu.matmul %2, %45, %cst_23 {dimension_numbers = #tpu.dot_dimension_numbers<[1], [0], [0], [1], [0, 0, 1, 1], [], []>} : vector<128x32xbf16>, vector<32x32xbf16>, vector<128x32xf32> -> vector<128x32xf32>
    %47 = vector.shape_cast %43 : vector<16x8x32xf32> to vector<128x32xf32>
    %48 = arith.truncf %47 : vector<128x32xf32> to vector<128x32xbf16>
    %49 = vector.extract_strided_slice %44 {offsets = [32, 0], sizes = [32, 32], strides = [1, 1]} : vector<64x32xbf16> to vector<32x32xbf16>
    %cst_24 = arith.constant dense<0.000000e+00> : vector<128x32xf32>
    %50 = tpu.matmul %48, %49, %cst_24 {dimension_numbers = #tpu.dot_dimension_numbers<[1], [0], [0], [1], [0, 0, 1, 1], [], []>} : vector<128x32xbf16>, vector<32x32xbf16>, vector<128x32xf32> -> vector<128x32xf32>
    %51 = arith.addf %46, %50 : vector<128x32xf32>
    %c0_25 = arith.constant 0 : index
    %c0_26 = arith.constant 0 : index
    %52 = vector.load %arg8[%c0_25, %c0_26] : memref<1x32xf32, #tpu.memory_space<vmem>>, vector<1x32xf32>
    %53 = vector.broadcast %52 : vector<1x32xf32> to vector<128x32xf32>
    %54 = arith.addf %51, %53 : vector<128x32xf32>
    %55 = vector.extract_strided_slice %54 {offsets = [0, 0], sizes = [32, 32], strides = [1, 1]} : vector<128x32xf32> to vector<32x32xf32>
    %56 = vector.extract_strided_slice %54 {offsets = [32, 0], sizes = [32, 32], strides = [1, 1]} : vector<128x32xf32> to vector<32x32xf32>
    %57 = vector.extract_strided_slice %54 {offsets = [64, 0], sizes = [32, 32], strides = [1, 1]} : vector<128x32xf32> to vector<32x32xf32>
    %58 = vector.extract_strided_slice %54 {offsets = [96, 0], sizes = [32, 32], strides = [1, 1]} : vector<128x32xf32> to vector<32x32xf32>
    %59 = tpu.concatenate %55, %56, %57, %58 in 1 : vector<32x32xf32>, vector<32x32xf32>, vector<32x32xf32>, vector<32x32xf32> -> vector<32x128xf32>
    %c0_27 = arith.constant 0 : index
    %c0_28 = arith.constant 0 : index
    %60 = vector.load %arg11[%c0_27, %c0_28] : memref<32x128xf32, #tpu.memory_space<vmem>>, vector<32x128xf32>
    tpu.vector_store %arg11[%c0_27, %c0_28], %59 {strides = array<i32>} : memref<32x128xf32, #tpu.memory_space<vmem>>, vector<32x128xf32>,
    %c0_29 = arith.constant 0 : index
    %c0_30 = arith.constant 0 : index
    %c0_31 = arith.constant 0 : index
    %61 = vector.load %arg3[%c0_29, %c0_30, %c0_31] : memref<16x16x8xbf16, #tpu.memory_space<vmem>>, vector<16x16x8xbf16>
    %62 = arith.extf %61 : vector<16x16x8xbf16> to vector<16x16x8xf32>
    %cst_32 = arith.constant 0.000000e+00 : f32
    %63 = vector.broadcast %cst_32 : f32 to vector<16x16x8xf32>
    %64 = arith.cmpf ogt, %62, %63 : vector<16x16x8xf32>
    %65 = arith.truncf %33 : vector<16x16x32xf32> to vector<16x16x32xbf16>
    %66 = arith.truncf %29 : vector<16x8x32xf32> to vector<16x8x32xbf16>
    "tpu.trace_start"() <{level = 10 : i32, message = "btd,bqd->btq"}> : () -> ()
    %cst_33 = arith.constant dense<0.000000e+00> : vector<16x16x8xf32>
    %67 = tpu.matmul %65, %66, %cst_33 {dimension_numbers = #tpu.dot_dimension_numbers<[2], [2], [1], [1], [0, 0, 0, 1, 1, 1], [0], [0]>} : vector<16x16x32xbf16>, vector<16x8x32xbf16>, vector<16x16x8xf32> -> vector<16x16x8xf32>
    %cst_34 = arith.constant -1.000000e+30 : f32
    "tpu.trace_stop"() : () -> ()
    %68 = vector.broadcast %cst_34 : f32 to vector<16x16x8xf32>
    %69 = arith.select %64, %67, %68 : vector<16x16x8xi1>, vector<16x16x8xf32>
    %cst_35 = arith.constant dense<0xFF800000> : vector<16x16xf32>
    %70 = vector.multi_reduction <maximumf>, %69, %cst_35 [2] : vector<16x16x8xf32> to vector<16x16xf32>
    %71 = vector.shape_cast %70 : vector<16x16xf32> to vector<16x16x1xf32>
    %72 = vector.broadcast %71 : vector<16x16x1xf32> to vector<16x16x8xf32>
    %73 = arith.subf %69, %72 : vector<16x16x8xf32>
    %74 = math.exp %73 : vector<16x16x8xf32>
    %cst_36 = arith.constant 0.000000e+00 : f32
    %75 = vector.broadcast %cst_36 : f32 to vector<16x16x8xf32>
    %76 = arith.select %64, %74, %75 : vector<16x16x8xi1>, vector<16x16x8xf32>
    %cst_37 = arith.constant dense<0.000000e+00> : vector<16x16xf32>
    %77 = vector.multi_reduction <add>, %76, %cst_37 [2] : vector<16x16x8xf32> to vector<16x16xf32>
    %78 = vector.shape_cast %77 : vector<16x16xf32> to vector<16x16x1xf32>
    %cst_38 = arith.constant 0.000000e+00 : f32
    %79 = vector.broadcast %cst_38 : f32 to vector<16x16x1xf32>
    %80 = arith.cmpf ogt, %78, %79 : vector<16x16x1xf32>
    %cst_39 = arith.constant 1.000000e+00 : f32
    %81 = vector.broadcast %cst_39 : f32 to vector<16x16x1xf32>
    %82 = arith.select %80, %78, %81 : vector<16x16x1xi1>, vector<16x16x1xf32>
    %83 = vector.broadcast %82 : vector<16x16x1xf32> to vector<16x16x8xf32>
    %84 = arith.divf %76, %83 : vector<16x16x8xf32>
    %85 = arith.truncf %84 : vector<16x16x8xf32> to vector<16x16x8xbf16>
    %86 = arith.truncf %31 : vector<16x8x32xf32> to vector<16x8x32xbf16>
    "tpu.trace_start"() <{level = 10 : i32, message = "btq,bqd->btd"}> : () -> ()
    %cst_40 = arith.constant dense<0.000000e+00> : vector<16x16x32xf32>
    %87 = tpu.matmul %85, %86, %cst_40 {dimension_numbers = #tpu.dot_dimension_numbers<[2], [1], [1], [2], [0, 0, 0, 1, 1, 2], [0], [0]>} : vector<16x16x8xbf16>, vector<16x8x32xbf16>, vector<16x16x32xf32> -> vector<16x16x32xf32>
    "tpu.trace_stop"() : () -> ()
    %c0_41 = arith.constant 0 : index
    %c0_42 = arith.constant 0 : index
    %88 = vector.load %arg9[%c0_41, %c0_42] : memref<96x32xbf16, #tpu.memory_space<vmem>>, vector<96x32xbf16>
    %89 = vector.extract_strided_slice %88 {offsets = [64, 0], sizes = [32, 32], strides = [1, 1]} : vector<96x32xbf16> to vector<32x32xbf16>
    %cst_43 = arith.constant dense<0.000000e+00> : vector<128x32xf32>
    %90 = tpu.matmul %2, %89, %cst_43 {dimension_numbers = #tpu.dot_dimension_numbers<[1], [0], [0], [1], [0, 0, 1, 1], [], []>} : vector<128x32xbf16>, vector<32x32xbf16>, vector<128x32xf32> -> vector<128x32xf32>
    %91 = vector.shape_cast %90 : vector<128x32xf32> to vector<16x8x32xf32>
    %cst_44 = arith.constant dense<0.000000e+00> : vector<16x32xf32>
    %92 = vector.multi_reduction <add>, %91, %cst_44 [1] : vector<16x8x32xf32> to vector<16x32xf32>
    %93 = vector.shape_cast %92 : vector<16x32xf32> to vector<16x1x32xf32>
    %cst_45 = arith.constant 8.000000e+00 : f32
    %94 = vector.broadcast %cst_45 : f32 to vector<16x1x32xf32>
    %95 = arith.divf %93, %94 : vector<16x1x32xf32>
    %96 = vector.extract_strided_slice %88 {offsets = [0, 0], sizes = [32, 32], strides = [1, 1]} : vector<96x32xbf16> to vector<32x32xbf16>
    %cst_46 = arith.constant dense<0.000000e+00> : vector<256x32xf32>
    %97 = tpu.matmul %3, %96, %cst_46 {dimension_numbers = #tpu.dot_dimension_numbers<[1], [0], [0], [1], [0, 0, 1, 1], [], []>} : vector<256x32xbf16>, vector<32x32xbf16>, vector<256x32xf32> -> vector<256x32xf32>
    %98 = vector.shape_cast %87 : vector<16x16x32xf32> to vector<256x32xf32>
    %99 = arith.truncf %98 : vector<256x32xf32> to vector<256x32xbf16>
    %100 = vector.extract_strided_slice %88 {offsets = [32, 0], sizes = [32, 32], strides = [1, 1]} : vector<96x32xbf16> to vector<32x32xbf16>
    %cst_47 = arith.constant dense<0.000000e+00> : vector<256x32xf32>
    %101 = tpu.matmul %99, %100, %cst_47 {dimension_numbers = #tpu.dot_dimension_numbers<[1], [0], [0], [1], [0, 0, 1, 1], [], []>} : vector<256x32xbf16>, vector<32x32xbf16>, vector<256x32xf32> -> vector<256x32xf32>
    %102 = arith.addf %97, %101 : vector<256x32xf32>
    %103 = vector.shape_cast %102 : vector<256x32xf32> to vector<16x16x32xf32>
    %104 = vector.broadcast %95 : vector<16x1x32xf32> to vector<16x16x32xf32>
    %105 = arith.addf %103, %104 : vector<16x16x32xf32>
    %c0_48 = arith.constant 0 : index
    %c0_49 = arith.constant 0 : index
    %106 = vector.load %arg10[%c0_48, %c0_49] : memref<1x32xf32, #tpu.memory_space<vmem>>, vector<1x32xf32>
    %107 = vector.shape_cast %106 : vector<1x32xf32> to vector<1x1x32xf32>
    %108 = vector.broadcast %107 : vector<1x1x32xf32> to vector<16x16x32xf32>
    %109 = arith.addf %105, %108 : vector<16x16x32xf32>
    %110 = vector.shape_cast %109 : vector<16x16x32xf32> to vector<256x32xf32>
    %111 = vector.extract_strided_slice %110 {offsets = [0, 0], sizes = [64, 32], strides = [1, 1]} : vector<256x32xf32> to vector<64x32xf32>
    %112 = vector.extract_strided_slice %110 {offsets = [64, 0], sizes = [64, 32], strides = [1, 1]} : vector<256x32xf32> to vector<64x32xf32>
    %113 = vector.extract_strided_slice %110 {offsets = [128, 0], sizes = [64, 32], strides = [1, 1]} : vector<256x32xf32> to vector<64x32xf32>
    %114 = vector.extract_strided_slice %110 {offsets = [192, 0], sizes = [64, 32], strides = [1, 1]} : vector<256x32xf32> to vector<64x32xf32>
    %115 = tpu.concatenate %111, %112, %113, %114 in 1 : vector<64x32xf32>, vector<64x32xf32>, vector<64x32xf32>, vector<64x32xf32> -> vector<64x128xf32>
    %c0_50 = arith.constant 0 : index
    %c0_51 = arith.constant 0 : index
    %116 = vector.load %arg12[%c0_50, %c0_51] : memref<64x128xf32, #tpu.memory_space<vmem>>, vector<64x128xf32>
    tpu.vector_store %arg12[%c0_50, %c0_51], %115 {strides = array<i32>} : memref<64x128xf32, #tpu.memory_space<vmem>>, vector<64x128xf32>,
    return
  }
  func.func @transform_0(%arg0: i32) -> (i32, i32, i32) {
    %c0_i32 = arith.constant 0 : i32
    %c0_i32_0 = arith.constant 0 : i32
    %c0_i32_1 = arith.constant 0 : i32
    return %arg0, %c0_i32, %c0_i32_0 : i32, i32, i32
  }
  func.func @transform_1(%arg0: i32) -> (i32, i32, i32) {
    %c0_i32 = arith.constant 0 : i32
    %c0_i32_0 = arith.constant 0 : i32
    %c0_i32_1 = arith.constant 0 : i32
    return %arg0, %c0_i32, %c0_i32_0 : i32, i32, i32
  }
  func.func @transform_2(%arg0: i32) -> (i32, i32, i32) {
    %c0_i32 = arith.constant 0 : i32
    %c0_i32_0 = arith.constant 0 : i32
    %c0_i32_1 = arith.constant 0 : i32
    return %arg0, %c0_i32, %c0_i32_0 : i32, i32, i32
  }
  func.func @transform_3(%arg0: i32) -> (i32, i32, i32) {
    %c0_i32 = arith.constant 0 : i32
    %c0_i32_0 = arith.constant 0 : i32
    %c0_i32_1 = arith.constant 0 : i32
    return %arg0, %c0_i32, %c0_i32_0 : i32, i32, i32
  }
  func.func @transform_4(%arg0: i32) -> (i32, i32) {
    %c0_i32 = arith.constant 0 : i32
    %c0_i32_0 = arith.constant 0 : i32
    %c0_i32_1 = arith.constant 0 : i32
    return %c0_i32, %c0_i32_0 : i32, i32
  }
  func.func @transform_5(%arg0: i32) -> (i32, i32) {
    %c0_i32 = arith.constant 0 : i32
    %c0_i32_0 = arith.constant 0 : i32
    %c0_i32_1 = arith.constant 0 : i32
    return %c0_i32, %c0_i32_0 : i32, i32
  }
  func.func @transform_6(%arg0: i32) -> (i32, i32) {
    %c0_i32 = arith.constant 0 : i32
    %c0_i32_0 = arith.constant 0 : i32
    %c0_i32_1 = arith.constant 0 : i32
    return %c0_i32, %c0_i32_0 : i32, i32
  }
  func.func @transform_7(%arg0: i32) -> (i32, i32) {
    %c0_i32 = arith.constant 0 : i32
    %c0_i32_0 = arith.constant 0 : i32
    %c0_i32_1 = arith.constant 0 : i32
    return %c0_i32, %c0_i32_0 : i32, i32
  }
  func.func @transform_8(%arg0: i32) -> (i32, i32) {
    %c0_i32 = arith.constant 0 : i32
    %c0_i32_0 = arith.constant 0 : i32
    %c0_i32_1 = arith.constant 0 : i32
    return %c0_i32, %c0_i32_0 : i32, i32
  }
  func.func @transform_9(%arg0: i32) -> (i32, i32) {
    %c0_i32 = arith.constant 0 : i32
    %c0_i32_0 = arith.constant 0 : i32
    %c0_i32_1 = arith.constant 0 : i32
    return %c0_i32, %c0_i32_0 : i32, i32
  }
  func.func @transform_10(%arg0: i32) -> (i32, i32) {
    %c0_i32 = arith.constant 0 : i32
    %c0_i32_0 = arith.constant 0 : i32
    return %arg0, %c0_i32 : i32, i32
  }
  func.func @transform_11(%arg0: i32) -> (i32, i32) {
    %c0_i32 = arith.constant 0 : i32
    %c0_i32_0 = arith.constant 0 : i32
    return %arg0, %c0_i32 : i32, i32
  }
}

</mosaic_0001>

<bundles_post_ra>
// kernel: tpu_custom_call.1
= control target key start
LH: loop header
LB: loop body
LE: loop exit
PB: predicated region body
PF: predicated region fallthrough
CT: control target
= control target key end

     0   :  { %s7578_s0 = inlined_call_operand.vmem [shape: bf16[32,8,32], index: 0, kind: input, shape index: {}]   ;;  %s7579_s1 = inlined_call_operand.vmem [shape: bf16[32,16,32], index: 1, kind: input, shape index: {}]   ;;  %s7580_s2 = inlined_call_operand.vmem [shape: bf16[32,16,8], index: 2, kind: input, shape index: {}]   ;;  %s7581_s3 = inlined_call_operand.vmem [shape: f32[32,8,1], index: 3, kind: input, shape index: {}]   ;;  %s7582_s4 = inlined_call_operand.vmem [shape: bf16[32,128], index: 4, kind: input, shape index: {}]   ;;  %s7583_s5 = inlined_call_operand.vmem [shape: f32[1,128], index: 5, kind: input, shape index: {}]   ;;  %s7584_s6 = inlined_call_operand.vmem [shape: bf16[64,32], index: 6, kind: input, shape index: {}]   ;;  %s7585_s7 = inlined_call_operand.vmem [shape: f32[1,32], index: 7, kind: input, shape index: {}]   ;;  %s7586_s8 = inlined_call_operand.vmem [shape: bf16[96,32], index: 8, kind: input, shape index: {}]   ;;  %s7587_s9 = inlined_call_operand.vmem [shape: f32[1,32], index: 9, kind: input, shape index: {}]   ;;  %s7588_s10 = inlined_call_operand.hbm [shape: f32[64,128], index: 10, kind: output, shape index: {0}]   ;;  %s7589_s11 = inlined_call_operand.hbm [shape: f32[128,128], index: 11, kind: output, shape index: {1}]  }
   0x1   :  { %7609 = sst [smem:[#allocation53_spill]] %s7578_s0 }
   0x2   :  { %7610 = sst [smem:[#allocation54_spill]] %s7579_s1 }
   0x3   :  { %7611 = sst [smem:[#allocation55_spill]] %s7582_s4 }
   0x4   :  { %17 = vsyncpa [#allocation3], 0 }
   0x5   :  { %19 = vsyncpa [#allocation3 + $0x1], 0 }
   0x6   :  { %20 = vsyncpa [#allocation5], 0 }
   0x7   :  { %22 = vsyncpa [#allocation5 + $0x1], 0  ;;  %s5317_s17 = smov 0   ;;  %s5319_s18 = smov 0  }
   0x8   :  { %s5321_s19 = smov 0   ;;  %s5323_s20 = smov 0  }
   0x9 LB: > { %s5338_s21 = sadd.s32 4294967295, %s5248_s20   ;;  %s4385_s22 = sadd.s32 4294967294, %s5248_s20   ;;  %s5248_s20 = sphi %s5323_s20, %s7883_s20   ;;  %s5244_s19 = sphi %s5321_s19, %s7882_s19   ;;  %s5240_s18 = sphi %s5319_s18, %s7881_s18   ;;  %s5236_s17 = sphi %s5317_s17, %s7880_s17  }
   0xa   : > { %s5342_s23 = sadd.s32 1, %s5248_s20   ;;  %s265_s24 = sadd.s32 1, %s5244_s19 }
   0xb   : > { %s262_s25 = ssub.s32 %s5248_s20, %s5342_s23  ;;  %p275_p0 = scmp.ne.s32.totalorder %s5244_s19, %s5240_s18 }
   0xc   : > { %p263_p1 = scmp.eq.s32.totalorder %s262_s25, 0  ;;  %p276_p2 = scmp.eq.s32.totalorder %s5338_s21, 1 }
   0xd   : > { %p281_p3 = scmp.ne.s32.totalorder %s5240_s18, %s5236_s17  ;;  %p282_p4 = scmp.eq.s32.totalorder %s4385_s22, 1 }
   0xe   : > { %s5353_s26 = scalar_select %p263_p1, %s5244_s19, %s265_s24  }
   0xf   : > { %p5355_p5 = por %p276_p2, %p275_p0  ;;  %p5359_p6 = por %p282_p4, %p281_p3 }
  0x10   : > { %p4388_p7 = scmp.ge.s32.totalorder %s5248_s20, 1  ;;  %p382_p8 = scmp.lt.s32.totalorder %s5248_s20, 3 }
  0x12   : > { %p383_p9 = pnand %p4388_p7, %p382_p8 }
  0x14   : > { %386 = sbr.rel (%p383_p9) target bundleno = 1882 (0x75a), region = 60 }
  0x19   : > { %s7614_s4 = sld [smem:[#allocation55_spill]]  ;;  %s4391_s12 = sshll.u32 %s5338_s21, 4  ;;  %v5250_v1 = vmov 0   ;;  %vm7590_vm0 = vcmask 261120   ;;  %v5473_v54 = vld [vmem:[%s7583_s5] ss:$0 sm:$0xff] }
  0x1a   : > { %p445_p10 = scmp.lt.s32.totalorder %s4391_s12, 31  ;;  %4890 = vset.pattern.permute.xlu1 %v5250_v1  ;;  %4891 = vset.pattern.permute.xlu2 %v5250_v1  ;;  %s7615_s1 = sld [smem:[#allocation54_spill]] }
  0x1b   : > { %4889 = vset.pattern.permute.xlu0 %v5250_v1  ;;  %s7616_s0 = sld [smem:[#allocation53_spill]]  ;;  %s5251_s24 = smov 32  }
  0x1c   : > { %s7885_s12 = smov (!%p445_p10, %s4391_s12), 31  ;;  %s7164_s29 = sand.u32 1, %s5240_s18  }
  0x1d   : > { %s5375_s15 = sshll.u32 %s7885_s12, 3  ;;  %s4392_s16 = sshll.u32 %s7885_s12, 2 }
  0x1e   : > { %s7607_s12 = smov 96   ;;  %s5897_s30 = scalar_lea.vmem %s7580_s2, %s5375_s15 }
  0x1f   : > { %v4740_v0 = vld [vmem:[%s7614_s4 + $0x8] sm:$0xff]  ;;  %v4739_v2 = vld [vmem:[%s7614_s4] sm:$0xff]  ;;  %s5395_s4 = scalar_lea.vmem %s7581_s3, %s5375_s15  ;;  %s5174_s14 = scalar_lea.hbm %s7588_s10, 64 }
  0x20   : > { %4832 = vmatpush.bf16.msra.mxu1 %v4740_v0  ;;  %4833 = vmatpush.bf16.msra.mxu3 %v4740_v0  ;;  %s5381_s25 = scalar_lea.vmem %s7615_s1, %s5375_s15  ;;  %v1166_v6 = vld [vmem:[%s5395_s4 + $0x30] sm:$0xff]  ;;  %v1167_v8 = vld [vmem:[%s5395_s4 + $0x38] sm:$0xff]  ;;  %v1168_v9 = vld [vmem:[%s5395_s4 + $0x40] sm:$0xff] }
  0x21   : > { %612 = vmatpush.bf16.msra.mxu0 %v4740_v0  ;;  %s5386_s13 = scalar_lea.vmem %s7616_s0, %s4392_s16  ;;  %v4725_v3 = vld [vmem:[%s5381_s25 + $0x10] sm:$0xff]  ;;  %v4735_v4 = vld [vmem:[%s5381_s25 + $0x60] sm:$0xff]  ;;  %vm1182_vm1 = vcmp.gt.f32.partialorder %v1166_v6, 0.0  ;;  %vm1184_vm2 = vcmp.gt.f32.partialorder %v1168_v9, 0.0  ;;  %vm1183_vm3 = vcmp.gt.f32.partialorder %v1167_v8, 0.0  ;;  %v4726_v13 = vld [vmem:[%s5381_s25 + $0x18] sm:$0xff] }
  0x22   : > { %v4715_v5 = vld [vmem:[%s5386_s13] sm:$0xff]  ;;  %v1198_v7 = vsel %vm1182_vm1, 1, %v5250_v1  ;;  %v1200_v10 = vsel %vm1184_vm2, 1, %v5250_v1  ;;  %v1199_v11 = vsel %vm1183_vm3, 1, %v5250_v1  ;;  %v1170_v12 = vld [vmem:[%s5395_s4 + $0x50] sm:$0xff]  ;;  %v4736_v14 = vld [vmem:[%s5381_s25 + $0x68] sm:$0xff] }
  0x23   : > { %1227 = vperm.xlu1 %4890, %v1198_v7   ;;  %1233 = vperm.xlu2 %4891, %v1200_v10   ;;  %v4716_v15 = vld [vmem:[%s5386_s13 + $0x8] sm:$0xff]  ;;  %vm1186_vm4 = vcmp.gt.f32.partialorder %v1170_v12, 0.0  ;;  %v1164_v18 = vld [vmem:[%s5395_s4 + $0x20] sm:$0xff]  ;;  %v1171_v22 = vld [vmem:[%s5395_s4 + $0x58] sm:$0xff] }
  0x24   : > { %4834 = vmatpush.bf16.msra.mxu1 %v4739_v2  ;;  %4835 = vmatpush.bf16.msra.mxu3 %v4739_v2  ;;  %v1202_v16 = vsel %vm1186_vm4, 1, %v5250_v1  ;;  %v1169_v17 = vld [vmem:[%s5395_s4 + $0x48] sm:$0xff]  ;;  %v1172_v19 = vld [vmem:[%s5395_s4 + $0x60] sm:$0xff]  ;;  %vm1180_vm6 = vcmp.gt.f32.partialorder %v1164_v18, 0.0  ;;  %vm1187_vm8 = vcmp.gt.f32.partialorder %v1171_v22, 0.0  ;;  %v4737_v26 = vld [vmem:[%s5381_s25 + $0x70] sm:$0xff] }
  0x25   : > { %613 = vmatpush.bf16.msra.mxu0 %v4739_v2  ;;  %vm1185_vm5 = vcmp.gt.f32.partialorder %v1169_v17, 0.0  ;;  %v1196_v21 = vsel %vm1180_vm6, 1, %v5250_v1  ;;  %vm1188_vm7 = vcmp.gt.f32.partialorder %v1172_v19, 0.0  ;;  %v1203_v24 = vsel %vm1187_vm8, 1, %v5250_v1  ;;  %v4727_v25 = vld [vmem:[%s5381_s25 + $0x20] sm:$0xff]  ;;  %v4717_v27 = vld [vmem:[%s5386_s13 + $0x10] sm:$0xff] }
  0x26   : > { %v1201_v20 = vsel %vm1185_vm5, 1, %v5250_v1  ;;  %1221 = vperm.xlu0 %4889, %v1196_v21   ;;  %v1204_v23 = vsel %vm1188_vm7, 1, %v5250_v1  ;;  %v1173_v28 = vld [vmem:[%s5395_s4 + $0x68] sm:$0xff]  ;;  %v1174_v30 = vld [vmem:[%s5395_s4 + $0x70] sm:$0xff]  ;;  %v4738_v35 = vld [vmem:[%s5381_s25 + $0x78] sm:$0xff] }
  0x27   : > { %4531 = vmatmul.msk.bf16.vlgmr.msra.gmra.mxu1 %vm7590_vm0, %v4725_v3  ;;  %4541 = vmatmul.msk.bf16.vlgmr.msra.gmra.mxu3 %vm7590_vm0, %v4735_v4  ;;  %v1165_v29 = vld [vmem:[%s5395_s4 + $0x28] sm:$0xff]  ;;  %vm1189_vm9 = vcmp.gt.f32.partialorder %v1173_v28, 0.0  ;;  %vm1190_vm11 = vcmp.gt.f32.partialorder %v1174_v30, 0.0  ;;  %v4718_v36 = vld [vmem:[%s5386_s13 + $0x18] sm:$0xff]  ;;  %v4729_v37 = vld [vmem:[%s5381_s25 + $0x30] sm:$0xff] }
  0x28   : > { %4441 = vmatmul.msk.bf16.vlgmr.msra.gmra.mxu0 %vm7590_vm0, %v4715_v5  ;;  %vm1181_vm10 = vcmp.gt.f32.partialorder %v1165_v29, 0.0  ;;  %v1205_v31 = vsel %vm1189_vm9, 1, %v5250_v1  ;;  %v1206_v33 = vsel %vm1190_vm11, 1, %v5250_v1  ;;  %v4728_v34 = vld [vmem:[%s5381_s25 + $0x28] sm:$0xff]  ;;  %v4719_v38 = vld [vmem:[%s5386_s13 + $0x20] sm:$0xff]  ;;  %v1175_v39 = vld [vmem:[%s5395_s4 + $0x78] sm:$0xff] }
  0x29   : > { %885 = vmatpush.bf16.msrb.mxu0 %v4740_v0  ;;  %v1197_v32 = vsel %vm1181_vm10, 1, %v5250_v1  ;;  %vm1191_vm12 = vcmp.gt.f32.partialorder %v1175_v39, 0.0  ;;  %v4730_v41 = vld [vmem:[%s5381_s25 + $0x38] sm:$0xff]  ;;  %v4720_v42 = vld [vmem:[%s5386_s13 + $0x28] sm:$0xff]  ;;  %v4731_v43 = vld [vmem:[%s5381_s25 + $0x40] sm:$0xff] }
  0x2a   : > { %v1207_v40 = vsel %vm1191_vm12, 1, %v5250_v1  ;;  %v4721_v44 = vld [vmem:[%s5386_s13 + $0x30] sm:$0xff]  ;;  %v4732_v45 = vld [vmem:[%s5381_s25 + $0x48] sm:$0xff]  ;;  %v4722_v46 = vld [vmem:[%s5386_s13 + $0x38] sm:$0xff] }
  0x2b   : > { %1230 = vperm.xlu1 %4890, %v1199_v11   ;;  %1236 = vperm.xlu2 %4891, %v1201_v20   ;;  %v4733_v47 = vld [vmem:[%s5381_s25 + $0x50] sm:$0xff]  ;;  %v4723_v49 = vld [vmem:[%s5381_s25] sm:$0xff]  ;;  %v4734_v62 = vld [vmem:[%s5381_s25 + $0x58] sm:$0xff] }
  0x2c   : > { %v4724_v0 = vld [vmem:[%s5381_s25 + $0x8] sm:$0xff] }
  0x2d   : > { %886 = vmatpush.bf16.msrb.mxu0 %v4739_v2 }
  0x2e   : > { %1224 = vperm.xlu0 %4889, %v1197_v32   ;;  %v1161_v32 = vld [vmem:[%s5395_s4 + $0x8] sm:$0xff] }
  0x2f   : > { %vm1177_vm2 = vcmp.gt.f32.partialorder %v1161_v32, 0.0 }
  0x33   : > { %1239 = vperm.xlu1 %4890, %v1202_v16   ;;  %1242 = vperm.xlu2 %4891, %v1203_v24  }
  0x37   : > { %4532 = vmatmul.msk.bf16.gmra.mxu1 %vm7590_vm0, %v4726_v13  ;;  %4542 = vmatmul.msk.bf16.gmra.mxu3 %vm7590_vm0, %v4736_v14 }
  0x38   : > { %4442 = vmatmul.msk.bf16.gmra.mxu0 %vm7590_vm0, %v4716_v15 }
  0x3b   : > { %1245 = vperm.xlu1 %4890, %v1204_v23   ;;  %1248 = vperm.xlu2 %4891, %v1205_v31  }
  0x43   : > { %1251 = vperm.xlu1 %4890, %v1206_v33   ;;  %1254 = vperm.xlu2 %4891, %v1207_v40  }
  0x47   : > { %4533 = vmatmul.msk.bf16.gmra.mxu1 %vm7590_vm0, %v4727_v25  ;;  %4543 = vmatmul.msk.bf16.gmra.mxu3 %vm7590_vm0, %v4737_v26 }
  0x48   : > { %4443 = vmatmul.msk.bf16.gmra.mxu0 %vm7590_vm0, %v4717_v27 }
  0x57   : > { %4534 = vmatmul.msk.bf16.gmra.mxu1 %vm7590_vm0, %v4728_v34  ;;  %4544 = vmatmul.msk.bf16.gmra.mxu3 %vm7590_vm0, %v4738_v35 }
  0x58   : > { %4444 = vmatmul.msk.bf16.gmra.mxu0 %vm7590_vm0, %v4718_v36  ;;  %v1193_v36 = vsel %vm1177_vm2, 1, %v5250_v1 }
  0x67   : > { %4535 = vmatmul.msk.bf16.gmra.mxu1 %vm7590_vm0, %v4729_v37 }
  0x68   : > { %4445 = vmatmul.msk.bf16.gmra.mxu0 %vm7590_vm0, %v4719_v38 }
  0x77   : > { %4536 = vmatmul.msk.bf16.gmra.mxu1 %vm7590_vm0, %v4730_v41 }
  0x78   : > { %4446 = vmatmul.msk.bf16.gmra.mxu0 %vm7590_vm0, %v4720_v42 }
  0x7d   : > { %v5467_v52 = vpop.permute.xlu2 %1233 }
  0x85   : > { %v5482_v60 = vpop.permute.xlu2 %1236 }
  0x87   : > { %4537 = vmatmul.msk.bf16.gmra.mxu1 %vm7590_vm0, %v4731_v43 }
  0x88   : > { %4447 = vmatmul.msk.bf16.gmra.mxu0 %vm7590_vm0, %v4721_v44 }
  0x8d   : > { %v5497_v7 = vpop.permute.xlu2 %1242 }
  0x95   : > { %v5464_v51 = vpop.permute.xlu1 %1227  ;;  %v1249_v17 = vpop.permute.xlu2 %1248 }
  0x96   : > { %vm1269_vm1 = vcmp.eq.s32.totalorder %v1249_v17, 1 }
  0x97   : > { %4538 = vmatmul.msk.bf16.gmra.mxu1 %vm7590_vm0, %v4732_v45 }
  0x98   : > { %4448 = vmatmul.msk.bf16.gmra.mxu0 %vm7590_vm0, %v4722_v46  ;;  %v1222_v41 = vpop.permute.xlu0 %1221 }
  0x99   : > { %vm1260_vm4 = vcmp.eq.s32.totalorder %v1222_v41, 1 }
  0x9d   : > { %v5480_v58 = vpop.permute.xlu1 %1230  ;;  %v1255_v17 = vpop.permute.xlu2 %1254 }
  0x9e   : > { %vm1271_vm10 = vcmp.eq.s32.totalorder %v1255_v17, 1 }
  0xa4   : > { %v5459_v48 = vpop.f32.mrf.mxu1 }
  0xa5   : > { %v5462_v50 = vpop.f32.mrf.mxu0  ;;  %v5494_v4 = vpop.permute.xlu1 %1239 }
  0xa7   : > { %4539 = vmatmul.msk.bf16.gmra.mxu1 %vm7590_vm0, %v4733_v47 }
  0xa8   : > { %4529 = vmatmul.msk.bf16.vlgmr.msrb.gmra.mxu0 %vm7590_vm0, %v4723_v49 }
  0xaa   : > { %v948_v53 = vpop.f32.mrf.mxu3 }
  0xab   : > { %v949_v56 = vadd.f32 %v5473_v54, %v948_v53 }
  0xac   : > { %v5475_v55 = vpop.f32.mrf.mxu1 }
  0xad   : > { %v5478_v57 = vpop.f32.mrf.mxu0  ;;  %v1024_v59 = vmin.f32 %v949_v56, 0.0  ;;  %vm992_vm13 = vcmp.gt.f32.partialorder %v949_v56, 0.0  ;;  %v1246_v15 = vpop.permute.xlu1 %1245 }
  0xae   : > { %vm1268_vm14 = vcmp.eq.s32.totalorder %v1246_v15, 1 }
  0xaf   : > { %v1080_v2 = vmul.f32 1.442695, %v1024_v59 }
  0xb1   : > { %4895 = vpow2.f32 %v1080_v2 }
  0xb2   : > { %v5484_v61 = vpop.f32.mrf.mxu3 }
  0xb4   : > { %v5487_v63 = vpop.f32.mrf.mxu1 }
  0xb5   : > { %v5490_v3 = vpop.f32.mrf.mxu0 }
  0xb7   : > { %4540 = vmatmul.msk.bf16.gmra.mxu1 %vm7590_vm0, %v4734_v62  ;;  %v4896_v11 = vpop.eup %4895 }
  0xb8   : > { %4530 = vmatmul.msk.bf16.gmra.mxu0 %vm7590_vm0, %v4724_v0  ;;  %v4569_v13 = vadd.f32 -1.0, %v4896_v11  ;;  %v1225_v0 = vpop.permute.xlu0 %1224  ;;  %v1252_v11 = vpop.permute.xlu1 %1251 }
  0xb9   : > { %vm1261_vm5 = vcmp.eq.s32.totalorder %v1225_v0, 1  ;;  %vm1270_vm8 = vcmp.eq.s32.totalorder %v1252_v11, 1 }
  0xba   : > { %v953_v5 = vpop.f32.mrf.mxu3  ;;  %v5507_v19 = vsel %vm992_vm13, %v949_v56, %v4569_v13  ;;  %vm1262_vm13 = vcmp.eq.s32.totalorder %v5464_v51, 1 }
  0xbb   : > { %v954_v6 = vadd.f32 %v5473_v54, %v953_v5  ;;  %v1284_v23 = vsel %vm1268_vm14, %v5507_v19, 0.0 }
  0xbc   : > { %v5499_v8 = vpop.f32.mrf.mxu1 }
  0xbd   : > { %v1026_v9 = vmin.f32 %v954_v6, 0.0  ;;  %v5501_v10 = vpop.f32.mrf.mxu0  ;;  %vm994_vm15 = vcmp.gt.f32.partialorder %v954_v6, 0.0 }
  0xbf   : > { %v1084_v12 = vmul.f32 1.442695, %v1026_v9 }
  0xc1   : > { %4897 = vpow2.f32 %v1084_v12 }
  0xc2   : > { %v5503_v14 = vpop.f32.mrf.mxu3 }
  0xc4   : > { %v908_v16 = vpop.f32.mrf.mxu1 }
  0xc5   : > { %v5505_v18 = vpop.f32.mrf.mxu0  ;;  %v909_v22 = vadd.f32 %v5473_v54, %v908_v16 }
  0xc7   : > { %v4898_v20 = vpop.eup %4897  ;;  %v1008_v29 = vmin.f32 %v909_v22, 0.0  ;;  %vm976_vm3 = vcmp.gt.f32.partialorder %v909_v22, 0.0 }
  0xc8   : > { %v4571_v21 = vadd.f32 -1.0, %v4898_v20 }
  0xc9   : > { %v1048_v33 = vmul.f32 1.442695, %v1008_v29  ;;  %v616_v29 = vadd.f32 %v5473_v54, %v5462_v50  ;;  %v618_v50 = vadd.f32 %v5473_v54, %v5478_v57 }
  0xca   : > { %v5511_v24 = vsel %vm994_vm15, %v954_v6, %v4571_v21  ;;  %v958_v25 = vpop.f32.mrf.mxu3  ;;  %vm1263_vm15 = vcmp.eq.s32.totalorder %v5480_v58, 1 }
  0xcb   : > { %v1285_v26 = vsel %vm1269_vm1, %v5511_v24, 0.0  ;;  %v959_v30 = vadd.f32 %v5473_v54, %v958_v25  ;;  %4899 = vpow2.f32 %v1048_v33  ;;  %vm655_vm12 = vcmp.gt.f32.partialorder %v616_v29, 0.0 }
  0xcc   : > { %v1302_v27 = vpack.c.bf16 %v1285_v26, %v1284_v23  ;;  %v5514_v28 = vpop.f32.mrf.mxu1  ;;  %vm656_vm2 = vcmp.gt.f32.partialorder %v618_v50, 0.0 }
  0xcd   : > { %v5517_v31 = vpop.f32.mrf.mxu0  ;;  %v1028_v34 = vmin.f32 %v959_v30, 0.0  ;;  %vm996_vm7 = vcmp.gt.f32.partialorder %v959_v30, 0.0 }
  0xce   : > { %1324 = vrot.lane.b32.xlu1 %v1302_v27, %s5251_s24 }
  0xcf   : > { %v1088_v38 = vmul.f32 1.442695, %v1028_v34 }
  0xd1   : > { %4901 = vpow2.f32 %v1088_v38  ;;  %v4900_v45 = vpop.eup %4899  ;;  %v1162_v38 = vld [vmem:[%s5395_s4 + $0x10] sm:$0xff] }
  0xd2   : > { %v5521_v35 = vpop.f32.mrf.mxu3  ;;  %v4553_v56 = vadd.f32 -1.0, %v4900_v45  ;;  %vm1178_vm11 = vcmp.gt.f32.partialorder %v1162_v38, 0.0 }
  0xd4   : > { %v913_v37 = vpop.f32.mrf.mxu1  ;;  %v5532_v5 = vsel %vm976_vm3, %v909_v22, %v4553_v56 }
  0xd5   : > { %v914_v39 = vadd.f32 %v5473_v54, %v913_v37  ;;  %v5525_v40 = vpop.f32.mrf.mxu0  ;;  %v1276_v15 = vsel %vm1260_vm4, %v5532_v5, 0.0 }
  0xd6   : > { %1212 = vperm.xlu1 %4890, %v1193_v36  }
  0xd7   : > { %v1010_v42 = vmin.f32 %v914_v39, 0.0  ;;  %v4902_v59 = vpop.eup %4901  ;;  %vm978_vm6 = vcmp.gt.f32.partialorder %v914_v39, 0.0 }
  0xd8   : > { %v4573_v9 = vadd.f32 -1.0, %v4902_v59 }
  0xd9   : > { %v1052_v43 = vmul.f32 1.442695, %v1010_v42 }
  0xda   : > { %v963_v44 = vpop.f32.mrf.mxu3  ;;  %v5540_v23 = vsel %vm996_vm7, %v959_v30, %v4573_v9  ;;  %v623_v9 = vadd.f32 %v5473_v54, %v5501_v10  ;;  %v4744_v10 = vld [vmem:[%s7584_s6 + $0x18] sm:$0xff] }
  0xdb   : > { %4903 = vpow2.f32 %v1052_v43  ;;  %v964_v46 = vadd.f32 %v5473_v54, %v963_v44  ;;  %v1286_v27 = vsel %vm1270_vm8, %v5540_v23, 0.0  ;;  %v1194_v43 = vsel %vm1178_vm11, 1, %v5250_v1  ;;  %1370 = vmatpush.bf16.msra.mxu2 %v4744_v10  ;;  %4836 = vmatpush.bf16.msrb.mxu3 %v4744_v10 }
  0xdc   : > { %v5528_v47 = vpop.f32.mrf.mxu1  ;;  %vm658_vm3 = vcmp.gt.f32.partialorder %v623_v9, 0.0  ;;  %vm1266_vm11 = vcmp.eq.s32.totalorder %v5494_v4, 1 }
  0xdd   : > { %v1030_v49 = vmin.f32 %v964_v46, 0.0  ;;  %v5530_v53 = vpop.f32.mrf.mxu0  ;;  %vm998_vm9 = vcmp.gt.f32.partialorder %v964_v46, 0.0 }
  0xdf   : > { %v1092_v62 = vmul.f32 1.442695, %v1030_v49  ;;  %v672_v49 = vmin.f32 %v618_v50, 0.0 }
  0xe1   : > { %v4904_v2 = vpop.eup %4903  ;;  %4905 = vpow2.f32 %v1092_v62  ;;  %v689_v62 = vmul.f32 1.442695, %v672_v49 }
  0xe2   : > { %v4555_v6 = vadd.f32 -1.0, %v4904_v2 }
  0xe4   : > { %v5534_v12 = vsel %vm978_vm6, %v914_v39, %v4555_v6  ;;  %v918_v13 = vpop.f32.mrf.mxu1  ;;  %v671_v39 = vmin.f32 %v616_v29, 0.0  ;;  %vm1265_vm6 = vcmp.eq.s32.totalorder %v5482_v60, 1 }
  0xe5   : > { %v1277_v16 = vsel %vm1261_vm5, %v5534_v12, 0.0  ;;  %v5538_v20 = vpop.f32.mrf.mxu0  ;;  %v919_v26 = vadd.f32 %v5473_v54, %v918_v13  ;;  %vm1264_vm5 = vcmp.eq.s32.totalorder %v5467_v52, 1 }
  0xe6   : > { %v1298_v21 = vpack.c.bf16 %v1277_v16, %v1276_v15  ;;  %v687_v42 = vmul.f32 1.442695, %v671_v39  ;;  %v674_v16 = vmin.f32 %v623_v9, 0.0  ;;  %v4743_v39 = vld [vmem:[%s7584_s6 + $0x10] sm:$0xff] }
  0xe7   : > { %v4906_v22 = vpop.eup %4905  ;;  %v1012_v36 = vmin.f32 %v919_v26, 0.0  ;;  %vm980_vm14 = vcmp.gt.f32.partialorder %v919_v26, 0.0  ;;  %1371 = vmatpush.bf16.msra.mxu2 %v4743_v39  ;;  %4837 = vmatpush.bf16.msrb.mxu3 %v4743_v39 }
  0xe8   : > { %1316 = vrot.lane.b32.xlu0 %v1298_v21, %s5251_s24  ;;  %v4575_v25 = vadd.f32 -1.0, %v4906_v22 }
  0xe9   : > { %v1056_v41 = vmul.f32 1.442695, %v1012_v36 }
  0xea   : > { %v5547_v32 = vsel %vm998_vm9, %v964_v46, %v4575_v25  ;;  %vm1267_vm9 = vcmp.eq.s32.totalorder %v5497_v7, 1 }
  0xeb   : > { %v1287_v30 = vsel %vm1271_vm10, %v5547_v32, 0.0  ;;  %4907 = vpow2.f32 %v1056_v41 }
  0xec   : > { %v1303_v33 = vpack.c.bf16 %v1287_v30, %v1286_v27  ;;  %v5550_v34 = vpop.f32.mrf.mxu1  ;;  %4909 = vpow2.f32 %v687_v42 }
  0xed   : > { %v5552_v37 = vpop.f32.mrf.mxu0 }
  0xee   : > { %1326 = vrot.lane.b32.xlu2 %v1303_v33, %s5251_s24 }
  0xf1   : > { %v4908_v0 = vpop.eup %4907 }
  0xf2   : > { %v4910_v2 = vpop.eup %4909  ;;  %v4557_v11 = vadd.f32 -1.0, %v4908_v0 }
  0xf3   : > { %v4449_v13 = vadd.f32 -1.0, %v4910_v2 }
  0xf4   : > { %v923_v44 = vpop.f32.mrf.mxu1  ;;  %v5570_v17 = vsel %vm980_vm14, %v919_v26, %v4557_v11  ;;  %v693_v26 = vmul.f32 1.442695, %v674_v16 }
  0xf5   : > { %v924_v45 = vadd.f32 %v5473_v54, %v923_v44  ;;  %v5560_v46 = vpop.f32.mrf.mxu0  ;;  %v735_v22 = vsel %vm655_vm12, %v616_v29, %v4449_v13  ;;  %v1278_v33 = vsel %vm1262_vm13, %v5570_v17, 0.0 }
  0xf6   : > { %1215 = vperm.xlu2 %4891, %v1194_v43   ;;  %v5581_v58 = vpack.c.bf16 %v735_v22, %v735_v22 }
  0xf7   : > { %v1014_v56 = vmin.f32 %v924_v45, 0.0  ;;  %vm982_vm1 = vcmp.gt.f32.partialorder %v924_v45, 0.0 }
  0xf8   : > { %v1715_v43 = vsel %vm7590_vm0, %v5581_v58, 0 }
  0xf9   : > { %v1060_v59 = vmul.f32 1.442695, %v1014_v56  ;;  %1724 = vmatpush.bf16.xpose.msra.mxu0 %v1715_v43 }
  0xfb   : > { %4911 = vpow2.f32 %v1060_v59 }
  0xfc   : > { %v5562_v6 = vpop.f32.mrf.mxu1  ;;  %4913 = vpow2.f32 %v689_v62 }
  0xfd   : > { %v5564_v57 = vpop.f32.mrf.mxu0  ;;  %4915 = vpow2.f32 %v693_v26  ;;  %v926_v4 = vadd.f32 %v5473_v54, %v5562_v6 }
 0x101   : > { %v4912_v15 = vpop.eup %4911 }
 0x102   : > { %v4559_v21 = vadd.f32 -1.0, %v4912_v15  ;;  %v4914_v25 = vpop.eup %4913 }
 0x103   : > { %v4450_v29 = vadd.f32 -1.0, %v4914_v25  ;;  %v4916_v62 = vpop.eup %4915 }
 0x104   : > { %v5572_v27 = vsel %vm982_vm1, %v924_v45, %v4559_v21  ;;  %v928_v30 = vpop.f32.mrf.mxu1  ;;  %v4452_v0 = vadd.f32 -1.0, %v4916_v62 }
 0x105   : > { %v1279_v51 = vsel %vm1263_vm15, %v5572_v27, 0.0  ;;  %v5579_v36 = vpop.f32.mrf.mxu0  ;;  %v929_v41 = vadd.f32 %v5473_v54, %v928_v30  ;;  %v736_v42 = vsel %vm656_vm2, %v618_v50, %v4450_v29 }
 0x106   : > { %v1299_v38 = vpack.c.bf16 %v1279_v51, %v1278_v33  ;;  %v5590_v44 = vpack.c.bf16 %v736_v42, %v736_v42  ;;  %v738_v15 = vsel %vm658_vm3, %v623_v9, %v4452_v0 }
 0x107   : > { %v1016_v56 = vmin.f32 %v929_v41, 0.0  ;;  %v5599_v16 = vpack.c.bf16 %v738_v15, %v738_v15  ;;  %vm984_vm4 = vcmp.gt.f32.partialorder %v929_v41, 0.0 }
 0x108   : > { %1318 = vrot.lane.b32.xlu0 %v1299_v38, %s5251_s24  ;;  %v1742_v49 = vsel %vm7590_vm0, %v5590_v44, 0 }
 0x109   : > { %1751 = vmatpush.bf16.xpose.msrb.mxu2 %v1742_v49  ;;  %v1064_v50 = vmul.f32 1.442695, %v1016_v56  ;;  %v1796_v25 = vsel %vm7590_vm0, %v5599_v16, 0 }
 0x10a   : > { %1805 = vmatpush.bf16.xpose.msrb.mxu0 %v1796_v25  ;;  %v4741_v25 = vld [vmem:[%s7584_s6] sm:$0xff] }
 0x10b   : > { %4917 = vpow2.f32 %v1064_v50  ;;  %v4742_v50 = vld [vmem:[%s7584_s6 + $0x8] sm:$0xff] }
 0x10c   : > { %v5592_v45 = vpop.f32.mrf.mxu1  ;;  %1431 = vmatpush.bf16.msra.mxu3 %v4742_v50 }
 0x10d   : > { %v5596_v59 = vpop.f32.mrf.mxu0 }
 0x110   : > { %1432 = vmatpush.bf16.msra.mxu3 %v4741_v25 }
 0x111   : > { %v4918_v30 = vpop.eup %4917 }
 0x112   : > { %v4561_v33 = vadd.f32 -1.0, %v4918_v30 }
 0x114   : > { %v933_v2 = vpop.f32.mrf.mxu1  ;;  %v5609_v9 = vsel %vm984_vm4, %v929_v41, %v4561_v33  ;;  %vm983_vm4 = vcmp.gt.f32.partialorder %v926_v4, 0.0 }
 0x115   : > { %v934_v11 = vadd.f32 %v5473_v54, %v933_v2  ;;  %v5601_v22 = vpop.f32.mrf.mxu0  ;;  %v1280_v42 = vsel %vm1264_vm5, %v5609_v9, 0.0 }
 0x117   : > { %v1018_v13 = vmin.f32 %v934_v11, 0.0  ;;  %vm986_vm7 = vcmp.gt.f32.partialorder %v934_v11, 0.0 }
 0x119   : > { %v1068_v21 = vmul.f32 1.442695, %v1018_v13 }
 0x11b   : > { %4919 = vpow2.f32 %v1068_v21 }
 0x11c   : > { %v5605_v10 = vpop.f32.mrf.mxu1 }
 0x11d   : > { %v5611_v38 = vpop.f32.mrf.mxu0 }
 0x121   : > { %v4920_v51 = vpop.eup %4919 }
 0x122   : > { %v4563_v26 = vadd.f32 -1.0, %v4920_v51  ;;  %v621_v51 = vadd.f32 %v5473_v54, %v5490_v3  ;;  %v904_v3 = vadd.f32 %v5473_v54, %v5487_v63 }
 0x124   : > { %v5613_v29 = vsel %vm986_vm7, %v934_v11, %v4563_v26  ;;  %v938_v39 = vpop.f32.mrf.mxu1  ;;  %vm657_vm15 = vcmp.gt.f32.partialorder %v621_v51, 0.0  ;;  %vm974_vm3 = vcmp.gt.f32.partialorder %v904_v3, 0.0 }
 0x125   : > { %v1281_v43 = vsel %vm1265_vm6, %v5613_v29, 0.0  ;;  %v939_v52 = vadd.f32 %v5473_v54, %v938_v39  ;;  %v888_v41 = vpop.f32.mrf.mxu0 }
 0x126   : > { %v1300_v49 = vpack.c.bf16 %v1281_v43, %v1280_v42  ;;  %v889_v11 = vadd.f32 %v5473_v54, %v888_v41  ;;  %v673_v43 = vmin.f32 %v621_v51, 0.0 }
 0x127   : > { %v1020_v60 = vmin.f32 %v939_v52, 0.0  ;;  %vm988_vm8 = vcmp.gt.f32.partialorder %v939_v52, 0.0 }
 0x128   : > { %1320 = vrot.lane.b32.xlu0 %v1300_v49, %s5251_s24  ;;  %v1000_v26 = vmin.f32 %v889_v11, 0.0  ;;  %vm968_vm13 = vcmp.gt.f32.partialorder %v889_v11, 0.0 }
 0x129   : > { %v1072_v62 = vmul.f32 1.442695, %v1020_v60 }
 0x12a   : > { %v1032_v49 = vmul.f32 1.442695, %v1000_v26  ;;  %v1006_v26 = vmin.f32 %v904_v3, 0.0 }
 0x12b   : > { %4921 = vpow2.f32 %v1072_v62  ;;  %v906_v62 = vadd.f32 %v5473_v54, %v5499_v8 }
 0x12c   : > { %v5619_v56 = vpop.f32.mrf.mxu1 }
 0x12d   : > { %v890_v13 = vpop.f32.mrf.mxu0  ;;  %vm975_vm2 = vcmp.gt.f32.partialorder %v906_v62, 0.0 }
 0x12e   : > { %v891_v21 = vadd.f32 %v5473_v54, %v890_v13  ;;  %v691_v13 = vmul.f32 1.442695, %v673_v43 }
 0x130   : > { %v1001_v39 = vmin.f32 %v891_v21, 0.0  ;;  %vm969_vm14 = vcmp.gt.f32.partialorder %v891_v21, 0.0 }
 0x131   : > { %v4922_v33 = vpop.eup %4921 }
 0x132   : > { %v4565_v42 = vadd.f32 -1.0, %v4922_v33  ;;  %v1034_v60 = vmul.f32 1.442695, %v1001_v39  ;;  %v1160_v33 = vld [vmem:[%s5395_s4] sm:$0xff] }
 0x133   : > { %vm1176_vm12 = vcmp.gt.f32.partialorder %v1160_v33, 0.0 }
 0x134   : > { %v943_v0 = vpop.f32.mrf.mxu1  ;;  %v5634_v50 = vsel %vm988_vm8, %v939_v52, %v4565_v42  ;;  %v1007_v52 = vmin.f32 %v906_v62, 0.0 }
 0x135   : > { %v944_v2 = vadd.f32 %v5473_v54, %v943_v0  ;;  %v1282_v25 = vsel %vm1266_vm11, %v5634_v50, 0.0 }
 0x136   : > { %v1046_v63 = vmul.f32 1.442695, %v1007_v52  ;;  %v941_v52 = vadd.f32 %v5473_v54, %v5619_v56  ;;  %v961_v56 = vadd.f32 %v5473_v54, %v5521_v35 }
 0x137   : > { %v1022_v15 = vmin.f32 %v944_v2, 0.0  ;;  %vm990_vm10 = vcmp.gt.f32.partialorder %v944_v2, 0.0 }
 0x138   : > { %vm989_vm5 = vcmp.gt.f32.partialorder %v941_v52, 0.0  ;;  %vm997_vm6 = vcmp.gt.f32.partialorder %v961_v56, 0.0 }
 0x139   : > { %v1076_v30 = vmul.f32 1.442695, %v1022_v15 }
 0x13b   : > { %4923 = vpow2.f32 %v1076_v30 }
 0x13c   : > { %4925 = vpow2.f32 %v1032_v49 }
 0x13d   : > { %4927 = vpow2.f32 %v1034_v60  ;;  %v1192_v60 = vsel %vm1176_vm12, 1, %v5250_v1 }
 0x13e   : > { %4929 = vpow2.f32 %v691_v13 }
 0x13f   : > { %4931 = vpow2.f32 %v1046_v63 }
 0x141   : > { %v4924_v41 = vpop.eup %4923 }
 0x142   : > { %v4567_v0 = vadd.f32 -1.0, %v4924_v41  ;;  %v4926_v7 = vpop.eup %4925  ;;  %v1015_v41 = vmin.f32 %v926_v4, 0.0 }
 0x143   : > { %v4928_v39 = vpop.eup %4927  ;;  %v4545_v43 = vadd.f32 -1.0, %v4926_v7 }
 0x144   : > { %v5640_v15 = vsel %vm990_vm10, %v944_v2, %v4567_v0  ;;  %v1044_v2 = vmul.f32 1.442695, %v1006_v26  ;;  %v4930_v42 = vpop.eup %4929  ;;  %v4546_v49 = vadd.f32 -1.0, %v4928_v39  ;;  %v1163_v0 = vld [vmem:[%s5395_s4 + $0x18] sm:$0xff]  ;;  %v1062_v6 = vmul.f32 1.442695, %v1015_v41 }
 0x145   : > { %v1283_v8 = vsel %vm1267_vm9, %v5640_v15, 0.0  ;;  %v4451_v13 = vadd.f32 -1.0, %v4930_v42  ;;  %vm1179_vm1 = vcmp.gt.f32.partialorder %v1163_v0, 0.0  ;;  %s5252_s4 = smov 64  }
 0x146   : > { %v1301_v30 = vpack.c.bf16 %v1283_v8, %v1282_v25  ;;  %4933 = vpow2.f32 %v1044_v2  ;;  %v5650_v25 = vsel %vm968_vm13, %v889_v11, %v4545_v43  ;;  %v1129_v8 = vsel %vm969_vm14, %v891_v21, %v4546_v49 }
 0x147   : > { %v737_v33 = vsel %vm657_vm15, %v621_v51, %v4451_v13  ;;  %v1656_v26 = vpack.c.bf16 %v5650_v25, %v5650_v25  ;;  %v1657_v7 = vpack.c.bf16 %v1129_v8, %v1129_v8  ;;  %v1195_v39 = vsel %vm1179_vm1, 1, %v5250_v1 }
 0x148   : > { %1322 = vrot.lane.b32.xlu0 %v1301_v30, %s5251_s24  ;;  %v4932_v30 = vpop.eup %4931  ;;  %4935 = vpow2.f32 %v1062_v6  ;;  %v1021_v2 = vmin.f32 %v941_v52, 0.0  ;;  %v5657_v42 = vpack.c.bf16 %v737_v33, %v737_v33  ;;  %v1029_v6 = vmin.f32 %v961_v56, 0.0 }
 0x149   : > { %v4552_v11 = vadd.f32 -1.0, %v4932_v30  ;;  %v1706_v21 = vunpack.c.l.b16 %v1656_v26  ;;  %v1707_v43 = vunpack.c.l.b16 %v1657_v7 }
 0x14a   : > { %v1074_v51 = vmul.f32 1.442695, %v1021_v2  ;;  %v1769_v1 = vsel %vm7590_vm0, %v5657_v42, 0 }
 0x14b   : > { %v1135_v41 = vsel %vm975_vm2, %v906_v62, %v4552_v11  ;;  %v1708_v13 = vpack.c.b16 %v1707_v43, %v1706_v21  ;;  %v1090_v62 = vmul.f32 1.442695, %v1029_v6  ;;  %v1670_v21 = vpack.c.bf16 %v5572_v27, %v5572_v27 }
 0x14c   : > { %v4934_v63 = vpop.eup %4933  ;;  %4937 = vpow2.f32 %v1074_v51  ;;  %v1663_v30 = vpack.c.bf16 %v1135_v41, %v1135_v41  ;;  %v1684_v27 = vpack.c.bf16 %v5540_v23, %v5540_v23  ;;  %v893_v23 = vpop.f32.mrf.mxu0 }
 0x14d   : > { %v4551_v49 = vadd.f32 -1.0, %v4934_v63  ;;  %4939 = vpow2.f32 %v1090_v62 }
 0x14e   : > { %v4936_v0 = vpop.eup %4935  ;;  %v1788_v26 = vunpack.c.l.b16 %v1663_v30 }
 0x14f   : > { %v5664_v8 = vsel %vm974_vm3, %v904_v3, %v4551_v49  ;;  %v4560_v33 = vadd.f32 -1.0, %v4936_v0 }
 0x150   : > { %1209 = vperm.xlu0 %4889, %v1192_v60   ;;  %v1662_v35 = vpack.c.bf16 %v5664_v8, %v5664_v8 }
 0x151   : > { %v1143_v7 = vsel %vm983_vm4, %v926_v4, %v4560_v33  ;;  %v1676_v4 = vpack.c.bf16 %v5634_v50, %v5634_v50  ;;  %v3071_v50 = vunpack.c.l.b16 %v5581_v58  ;;  %v5691_v58 = vadd.f32 %v5473_v54, %v5514_v28 }
 0x152   : > { %v1787_v63 = vunpack.c.l.b16 %v1662_v35  ;;  %v1671_v3 = vpack.c.bf16 %v1143_v7, %v1143_v7 }
 0x153   : > { %v1976_v30 = vunpack.c.l.b16 %v1676_v4  ;;  %vm977_vm13 = vcmp.gt.f32.partialorder %v5691_v58, 0.0 }
 0x154   : > { %v1789_v2 = vpack.c.b16 %v1788_v26, %v1787_v63  ;;  %v1896_v43 = vunpack.c.l.b16 %v1671_v3  ;;  %v895_v63 = vpop.f32.mrf.mxu0 }
 0x155   : > { %v896_v3 = vadd.f32 %v5473_v54, %v895_v63 }
 0x157   : > { %vm971_vm8 = vcmp.gt.f32.partialorder %v896_v3, 0.0 }
 0x158   : > { %1218 = vperm.xlu0 %4889, %v1195_v39   ;;  %v4938_v39 = vpop.eup %4937 }
 0x159   : > { %v4566_v11 = vadd.f32 -1.0, %v4938_v39  ;;  %v4940_v51 = vpop.eup %4939  ;;  %v3072_v39 = vpack.c.b16 %v3071_v50, %v3071_v50  ;;  %v5722_v50 = vadd.f32 %v5473_v54, %v5503_v14 }
 0x15a   : > { %v1317_v60 = vpop.permute.xlu0 %1316  ;;  %v4574_v0 = vadd.f32 -1.0, %v4940_v51  ;;  %v5695_v51 = vadd.f32 %v5473_v54, %v5459_v48 }
 0x15b   : > { %4587 = vmatmul.msk.bf16.vlgmr.msrb.gmra.mxu3 %vm7590_vm0, %v1317_v60  ;;  %v1149_v49 = vsel %vm989_vm5, %v941_v52, %v4566_v11  ;;  %v1895_v60 = vunpack.c.l.b16 %v1670_v21  ;;  %v2084_v52 = vunpack.c.l.b16 %v1684_v27  ;;  %v5687_v21 = vadd.f32 %v5473_v54, %v5475_v55  ;;  %v5703_v55 = vpop.permute.xlu1 %1324 }
 0x15c   : > { %1778 = vmatpush.bf16.xpose.msrb.mxu3 %v1769_v1  ;;  %v1677_v1 = vpack.c.bf16 %v1149_v49, %v1149_v49  ;;  %v1157_v6 = vsel %vm997_vm6, %v961_v56, %v4574_v0  ;;  %v5701_v0 = vadd.f32 %v5473_v54, %v5525_v40  ;;  %v1004_v28 = vmin.f32 %v5695_v51, 0.0 }
 0x15d   : > { %v1897_v41 = vpack.c.b16 %v1896_v43, %v1895_v60  ;;  %v1685_v35 = vpack.c.bf16 %v1157_v6, %v1157_v6  ;;  %v1003_v43 = vmin.f32 %v896_v3, 0.0  ;;  %v1005_v60 = vmin.f32 %v5687_v21, 0.0 }
 0x15e   : > { %v677_v48 = vmin.f32 %v5701_v0, 0.0  ;;  %v5709_v6 = vadd.f32 %v5473_v54, %v5528_v47  ;;  %v5713_v40 = vadd.f32 %v5473_v54, %v5592_v45  ;;  %vm973_vm11 = vcmp.gt.f32.partialorder %v5687_v21, 0.0 }
 0x15f   : > { %v2085_v26 = vunpack.c.l.b16 %v1685_v35  ;;  %v1042_v4 = vmul.f32 1.442695, %v1005_v60  ;;  %v1027_v60 = vmin.f32 %v5722_v50, 0.0  ;;  %vm972_vm12 = vcmp.gt.f32.partialorder %v5695_v51, 0.0 }
 0x160   : > { %1709 = vrot.lane.b32.xlu0 %v1708_v13, %s5252_s4  ;;  %v1977_v13 = vunpack.c.l.b16 %v1677_v1  ;;  %v1009_v1 = vmin.f32 %v5691_v58, 0.0  ;;  %v1017_v47 = vmin.f32 %v5713_v40, 0.0  ;;  %vm661_vm14 = vcmp.gt.f32.partialorder %v5701_v0, 0.0 }
 0x161   : > { %v2086_v7 = vpack.c.b16 %v2085_v26, %v2084_v52  ;;  %v5717_v26 = vpop.permute.xlu2 %1326  ;;  %vm979_vm2 = vcmp.gt.f32.partialorder %v5709_v6, 0.0  ;;  %vm985_vm3 = vcmp.gt.f32.partialorder %v5713_v40, 0.0  ;;  %vm995_vm4 = vcmp.gt.f32.partialorder %v5722_v50, 0.0 }
 0x162   : > { %v1978_v33 = vpack.c.b16 %v1977_v13, %v1976_v30  ;;  %v1050_v13 = vmul.f32 1.442695, %v1009_v1  ;;  %v1040_v30 = vmul.f32 1.442695, %v1004_v28 }
 0x163   : > { %v1213_v45 = vpop.permute.xlu1 %1212 }
 0x164   : > { %vm1257_vm9 = vcmp.eq.s32.totalorder %v1213_v45, 1 }
 0x168   : > { %1790 = vrot.lane.b32.xlu0 %v1789_v2, %s5252_s4  ;;  %v894_v2 = vadd.f32 %v5473_v54, %v893_v23 }
 0x16a   : > { %v1002_v11 = vmin.f32 %v894_v2, 0.0  ;;  %vm970_vm7 = vcmp.gt.f32.partialorder %v894_v2, 0.0 }
 0x16c   : > { %v1036_v49 = vmul.f32 1.442695, %v1002_v11  ;;  %v5726_v11 = vadd.f32 %v5473_v54, %v5550_v34 }
 0x16e   : > { %4941 = vpow2.f32 %v1036_v49  ;;  %v1013_v34 = vmin.f32 %v5726_v11, 0.0  ;;  %vm981_vm5 = vcmp.gt.f32.partialorder %v5726_v11, 0.0 }
 0x170   : > { %1898 = vrot.lane.b32.xlu0 %v1897_v41, %s5252_s4  ;;  %v1038_v41 = vmul.f32 1.442695, %v1003_v43  ;;  %v1066_v43 = vmul.f32 1.442695, %v1017_v47 }
 0x172   : > { %4943 = vpow2.f32 %v1038_v41 }
 0x173   : > { %4945 = vpow2.f32 %v1042_v4 }
 0x174   : > { %v4942_v27 = vpop.eup %4941  ;;  %4947 = vpow2.f32 %v1050_v13  ;;  %v5731_v13 = vadd.f32 %v5473_v54, %v5552_v37 }
 0x175   : > { %4949 = vpow2.f32 %v1040_v30 }
 0x176   : > { %v680_v45 = vmin.f32 %v5731_v13, 0.0  ;;  %vm664_vm6 = vcmp.gt.f32.partialorder %v5731_v13, 0.0 }
 0x178   : > { %1979 = vrot.lane.b32.xlu0 %v1978_v33, %s5252_s4  ;;  %v699_v33 = vmul.f32 1.442695, %v677_v48  ;;  %v4944_v52 = vpop.eup %4943 }
 0x17a   : > { %v1319_v62 = vpop.permute.xlu0 %1318  ;;  %4951 = vpow2.f32 %v699_v33 }
 0x17b   : > { %4588 = vmatmul.msk.bf16.gmra.mxu3 %vm7590_vm0, %v1319_v62  ;;  %v1011_v62 = vmin.f32 %v5709_v6, 0.0 }
 0x17d   : > { %v1054_v63 = vmul.f32 1.442695, %v1011_v62  ;;  %v965_v62 = vpop.f32.mrf.mxu3 }
 0x17f   : > { %4953 = vpow2.f32 %v1054_v63 }
 0x180   : > { %2087 = vrot.lane.b32.xlu0 %v2086_v7, %s5252_s4  ;;  %v4547_v7 = vadd.f32 -1.0, %v4942_v27  ;;  %4955 = vpow2.f32 %v1066_v43 }
 0x182   : > { %v1130_v49 = vsel %vm970_vm7, %v894_v2, %v4547_v7 }
 0x183   : > { %v1273_v30 = vsel %vm1257_vm9, %v1130_v49, 0.0  ;;  %v1658_v27 = vpack.c.bf16 %v1130_v49, %v1130_v49  ;;  %v5752_v49 = vadd.f32 %v5473_v54, %v5517_v31 }
 0x188   : > { %3073 = vrot.lane.b32.xlu0 %v3072_v39, %s7607_s12  ;;  %v4548_v39 = vadd.f32 -1.0, %v4944_v52  ;;  %v1216_v52 = vpop.permute.xlu2 %1215 }
 0x189   : > { %vm1258_vm15 = vcmp.eq.s32.totalorder %v1216_v52, 1 }
 0x18a   : > { %v1131_v41 = vsel %vm971_vm8, %v896_v3, %v4548_v39  ;;  %v1058_v39 = vmul.f32 1.442695, %v1013_v34  ;;  %vm660_vm8 = vcmp.gt.f32.partialorder %v5752_v49, 0.0 }
 0x18b   : > { %v1659_v3 = vpack.c.bf16 %v1131_v41, %v1131_v41 }
 0x18d   : > { %v1734_v63 = vunpack.c.l.b16 %v1659_v3 }
 0x19a   : > { %v1321_v56 = vpop.permute.xlu0 %1320 }
 0x19b   : > { %4589 = vmatmul.msk.bf16.gmra.mxu3 %vm7590_vm0, %v1321_v56  ;;  %v4946_v56 = vpop.eup %4945 }
 0x19c   : > { %v4948_v23 = vpop.eup %4947  ;;  %v4550_v28 = vadd.f32 -1.0, %v4946_v56  ;;  %v5745_v56 = vadd.f32 %v5473_v54, %v5605_v10 }
 0x19d   : > { %v4950_v1 = vpop.eup %4949  ;;  %v4554_v4 = vadd.f32 -1.0, %v4948_v23  ;;  %v1733_v23 = vunpack.c.l.b16 %v1658_v27 }
 0x19e   : > { %v4952_v48 = vpop.eup %4951  ;;  %v4549_v37 = vadd.f32 -1.0, %v4950_v1  ;;  %v1133_v47 = vsel %vm973_vm11, %v5687_v21, %v4550_v28  ;;  %v5748_v21 = vadd.f32 %v5473_v54, %v965_v62  ;;  %v705_v1 = vmul.f32 1.442695, %v680_v45 }
 0x19f   : > { %v4455_v7 = vadd.f32 -1.0, %v4952_v48  ;;  %v4954_v43 = vpop.eup %4953  ;;  %v1661_v41 = vpack.c.bf16 %v1133_v47, %v1133_v47  ;;  %vm987_vm9 = vcmp.gt.f32.partialorder %v5745_v56, 0.0 }
 0x1a0   : > { %v4956_v10 = vpop.eup %4955  ;;  %v4556_v34 = vadd.f32 -1.0, %v4954_v43  ;;  %vm999_vm7 = vcmp.gt.f32.partialorder %v5748_v21, 0.0 }
 0x1a1   : > { %v4562_v27 = vadd.f32 -1.0, %v4956_v10 }
 0x1a2   : > { %v1139_v62 = vsel %vm979_vm2, %v5709_v6, %v4556_v34 }
 0x1a3   : > { %v1145_v45 = vsel %vm985_vm3, %v5713_v40, %v4562_v27 }
 0x1a4   : > { %v1673_v40 = vpack.c.bf16 %v1145_v45, %v1145_v45 }
 0x1ba   : > { %v1323_v35 = vpop.permute.xlu0 %1322 }
 0x1bb   : > { %4590 = vmatmul.msk.bf16.gmra.mxu3 %vm7590_vm0, %v1323_v35  ;;  %v1086_v35 = vmul.f32 1.442695, %v1027_v60 }
 0x1bd   : > { %4957 = vpow2.f32 %v1086_v35  ;;  %v5773_v35 = vadd.f32 %v5473_v54, %v5484_v61 }
 0x1be   : > { %4959 = vpow2.f32 %v1058_v39 }
 0x1bf   : > { %4961 = vpow2.f32 %v705_v1  ;;  %v1025_v43 = vmin.f32 %v5773_v35, 0.0  ;;  %v945_v1 = vpop.f32.mrf.mxu1 }
 0x1c2   : > { %v1210_v14 = vpop.permute.xlu0 %1209 }
 0x1c3   : > { %vm1256_vm10 = vcmp.eq.s32.totalorder %v1210_v14, 1  ;;  %v741_v14 = vsel %vm661_vm14, %v5701_v0, %v4455_v7 }
 0x1c4   : > { %v1272_v2 = vsel %vm1256_vm10, %v5650_v25, 0.0  ;;  %v1137_v25 = vsel %vm977_vm13, %v5691_v58, %v4554_v4  ;;  %v1132_v58 = vsel %vm972_vm12, %v5695_v51, %v4549_v37  ;;  %v1019_v4 = vmin.f32 %v5745_v56, 0.0 }
 0x1c5   : > { %v1296_v33 = vpack.c.bf16 %v1273_v30, %v1272_v2  ;;  %v1665_v28 = vpack.c.bf16 %v1137_v25, %v1137_v25  ;;  %v1274_v31 = vsel %vm1258_vm15, %v1132_v58, 0.0  ;;  %v1031_v51 = vmin.f32 %v5748_v21, 0.0 }
 0x1c6   : > { %v1735_v2 = vpack.c.b16 %v1734_v63, %v1733_v23  ;;  %v1660_v0 = vpack.c.bf16 %v1132_v58, %v1132_v58  ;;  %v5767_v3 = vpack.c.bf16 %v741_v14, %v741_v14  ;;  %v1070_v52 = vmul.f32 1.442695, %v1019_v4 }
 0x1c7   : > { %1312 = vrot.lane.b32.xlu1 %v1296_v33, %s5251_s24  ;;  %v676_v33 = vmin.f32 %v5752_v49, 0.0  ;;  %v1761_v37 = vunpack.c.l.b16 %v1661_v41  ;;  %v1815_v47 = vunpack.c.l.b16 %v1665_v28  ;;  %v1667_v58 = vpack.c.bf16 %v1139_v62, %v1139_v62 }
 0x1c8   : > { %v1760_v25 = vunpack.c.l.b16 %v1660_v0  ;;  %v1877_v61 = vsel %vm7590_vm0, %v5767_v3, 0  ;;  %4963 = vpow2.f32 %v1070_v52  ;;  %v1666_v28 = vpack.c.bf16 %v5534_v12, %v5534_v12 }
 0x1c9   : > { %v697_v23 = vmul.f32 1.442695, %v676_v33  ;;  %v1672_v4 = vpack.c.bf16 %v5609_v9, %v5609_v9  ;;  %v1842_v34 = vunpack.c.l.b16 %v1667_v58  ;;  %v1923_v12 = vunpack.c.l.b16 %v1673_v40 }
 0x1ca   : > { %v1219_v60 = vpop.permute.xlu0 %1218  ;;  %v1762_v6 = vpack.c.b16 %v1761_v37, %v1760_v25  ;;  %v1841_v0 = vunpack.c.l.b16 %v1666_v28  ;;  %v1686_v58 = vpack.c.bf16 %v5547_v32, %v5547_v32  ;;  %vm993_vm10 = vcmp.gt.f32.partialorder %v5773_v35, 0.0 }
 0x1cb   : > { %vm1259_vm1 = vcmp.eq.s32.totalorder %v1219_v60, 1  ;;  %4591 = vmatmul.msk.bf16.gmra.mxu3 %vm7590_vm0, %v5703_v55  ;;  %v1664_v55 = vpack.c.bf16 %v5532_v5, %v5532_v5  ;;  %v1094_v5 = vmul.f32 1.442695, %v1031_v51  ;;  %v1922_v33 = vunpack.c.l.b16 %v1672_v4 }
 0x1cc   : > { %v1275_v48 = vsel %vm1259_vm1, %v5664_v8, 0.0  ;;  %v4958_v8 = vpop.eup %4957  ;;  %v1843_v37 = vpack.c.b16 %v1842_v34, %v1841_v0  ;;  %vm2168_vm1 = vcmask 64512  }
 0x1cd   : > { %v1297_v30 = vpack.c.bf16 %v1275_v48, %v1274_v31  ;;  %v4960_v7 = vpop.eup %4959  ;;  %v1814_v63 = vunpack.c.l.b16 %v1664_v55  ;;  %4965 = vpow2.f32 %v1094_v5  ;;  %v4572_v14 = vadd.f32 -1.0, %v4958_v8 }
 0x1ce   : > { %v4962_v60 = vpop.eup %4961  ;;  %v4558_v41 = vadd.f32 -1.0, %v4960_v7  ;;  %4967 = vpow2.f32 %v697_v23  ;;  %v1082_v31 = vmul.f32 1.442695, %v1025_v43  ;;  %v1682_v55 = vpack.c.bf16 %v5511_v24, %v5511_v24 }
 0x1cf   : > { %1314 = vrot.lane.b32.xlu2 %v1297_v30, %s5251_s24  ;;  %1736 = vrot.lane.b32.xlu1 %v1735_v2, %s5252_s4  ;;  %v1816_v10 = vpack.c.b16 %v1815_v47, %v1814_v63  ;;  %v4458_v48 = vadd.f32 -1.0, %v4962_v60  ;;  %v5794_v30 = vadd.f32 %v5473_v54, %v945_v1  ;;  %v4964_v2 = vpop.eup %4963  ;;  %v1155_v9 = vsel %vm995_vm4, %v5722_v50, %v4572_v14 }
 0x1d0   : > { %v1141_v51 = vsel %vm981_vm5, %v5726_v11, %v4558_v41  ;;  %4969 = vpow2.f32 %v1082_v31  ;;  %v1924_v62 = vpack.c.b16 %v1923_v12, %v1922_v33  ;;  %v1683_v5 = vpack.c.bf16 %v1155_v9, %v1155_v9 }
 0x1d1   : > { %v744_v11 = vsel %vm664_vm6, %v5731_v13, %v4458_v48  ;;  %v1669_v8 = vpack.c.bf16 %v1141_v51, %v1141_v51  ;;  %v1023_v54 = vmin.f32 %v5794_v30, 0.0  ;;  %v1668_v50 = vpack.c.bf16 %v5570_v17, %v5570_v17  ;;  %v5121_v48 = vld [vmem:[%s5386_s13] sm:$0xff] }
 0x1d2   : > { %v1710_v39 = vpop.permute.xlu0 %1709  ;;  %v4564_v47 = vadd.f32 -1.0, %v4964_v2  ;;  %v5808_v24 = vpack.c.bf16 %v744_v11, %v744_v11  ;;  %v1674_v14 = vpack.c.bf16 %v5613_v29, %v5613_v29  ;;  %v2111_v1 = vunpack.c.l.b16 %v1686_v58 }
 0x1d3   : > { %4609 = vmatmul.msk.bf16.vlgmr.msra.gmra.mxu0 %vm7590_vm0, %v1710_v39  ;;  %v4966_v27 = vpop.eup %4965  ;;  %v1869_v45 = vunpack.c.l.b16 %v1669_v8  ;;  %v1078_v25 = vmul.f32 1.442695, %v1023_v54  ;;  %v2058_v39 = vunpack.c.l.b16 %v1683_v5  ;;  %v1868_v43 = vunpack.c.l.b16 %v1668_v50  ;;  %v5853_v50 = vld [vmem:[%s7583_s5] ss:$0 sm:$0xff] }
 0x1d4   : > { %1886 = vmatpush.bf16.xpose.msra.mxu0 %v1877_v61  ;;  %v4968_v52 = vpop.eup %4967  ;;  %v4576_v7 = vadd.f32 -1.0, %v4966_v27  ;;  %7617 = vst [vmem:[#allocation8_spill] sm:$0xff] %v5808_v24  ;;  %v1147_v23 = vsel %vm987_vm9, %v5745_v56, %v4564_v47  ;;  %v1949_v51 = vunpack.c.l.b16 %v1674_v14  ;;  %v1680_v29 = vpack.c.bf16 %v5507_v19, %v5507_v19  ;;  %v5125_v47 = vld [vmem:[%s5386_s13 + $0x18] sm:$0xff] }
 0x1d5   : > { %v4454_v13 = vadd.f32 -1.0, %v4968_v52  ;;  %v1870_v60 = vpack.c.b16 %v1869_v45, %v1868_v43  ;;  %4971 = vpow2.f32 %v1078_v25  ;;  %v1675_v56 = vpack.c.bf16 %v1147_v23, %v1147_v23 }
 0x1d6   : > { %v4970_v17 = vpop.eup %4969  ;;  %v1159_v63 = vsel %vm999_vm7, %v5748_v21, %v4576_v7  ;;  %vm991_vm11 = vcmp.gt.f32.partialorder %v5794_v30, 0.0  ;;  %v3102_v33 = vunpack.c.l.b16 %v5590_v44  ;;  %v1678_v52 = vpack.c.bf16 %v5640_v15, %v5640_v15  ;;  %v5123_v15 = vld [vmem:[%s5386_s13 + $0x10] sm:$0xff] }
 0x1d7   : > { %1763 = vrot.lane.b32.xlu2 %v1762_v6, %s5252_s4  ;;  %1817 = vrot.lane.b32.xlu1 %v1816_v10, %s5252_s4  ;;  %v1958_v6 = vsel %vm7590_vm0, %v5808_v24, 0  ;;  %v740_v41 = vsel %vm660_vm8, %v5752_v49, %v4454_v13  ;;  %v1687_v40 = vpack.c.bf16 %v1159_v63, %v1159_v63  ;;  %v4570_v21 = vadd.f32 -1.0, %v4970_v17  ;;  %v5126_v63 = vld [vmem:[%s5386_s13 + $0x20] sm:$0xff] }
 0x1d8   : > { %v5825_v32 = vpack.c.bf16 %v740_v41, %v740_v41  ;;  %v1950_v28 = vunpack.c.l.b16 %v1675_v56  ;;  %v3103_v19 = vpack.c.b16 %v3102_v33, %v3102_v33  ;;  %v3132_v54 = vunpack.c.l.b16 %v5657_v42 }
 0x1d9   : > { %v2112_v49 = vunpack.c.l.b16 %v1687_v40  ;;  %v1153_v4 = vsel %vm993_vm10, %v5773_v35, %v4570_v21  ;;  %v2030_v35 = vunpack.c.l.b16 %v1680_v29  ;;  %v2003_v44 = vunpack.c.l.b16 %v1678_v52 }
 0x1da   : > { %v1791_v61 = vpop.permute.xlu0 %1790  ;;  %v1850_v34 = vsel %vm7590_vm0, %v5825_v32, 0  ;;  %v1951_v12 = vpack.c.b16 %v1950_v28, %v1949_v51  ;;  %v1681_v9 = vpack.c.bf16 %v1153_v4, %v1153_v4  ;;  %v626_v42 = vadd.f32 %v5853_v50, %v5505_v18 }
 0x1db   : > { %4592 = vmatmul.msk.bf16.gmra.mxu3 %vm7590_vm0, %v5717_v26  ;;  %v2057_v26 = vunpack.c.l.b16 %v1682_v55  ;;  %v4972_v31 = vpop.eup %4971  ;;  %v2113_v2 = vpack.c.b16 %v2112_v49, %v2111_v1  ;;  %v646_v45 = vadd.f32 %v5853_v50, %v5579_v36  ;;  %v633_v14 = vadd.f32 %v5853_v50, %v5530_v53  ;;  %v5127_v49 = vld [vmem:[%s5386_s13 + $0x28] sm:$0xff] }
 0x1dc   : > { %v4568_v27 = vadd.f32 -1.0, %v4972_v31  ;;  %v2031_v0 = vunpack.c.l.b16 %v1681_v9  ;;  %v675_v7 = vmin.f32 %v626_v42, 0.0  ;;  %vm659_vm12 = vcmp.gt.f32.partialorder %v626_v42, 0.0  ;;  %v4754_v9 = vld [vmem:[%s5897_s30] sm:$0xff]  }
 0x1dd   : > { %v2059_v10 = vpack.c.b16 %v2058_v39, %v2057_v26  ;;  %v683_v25 = vmin.f32 %v646_v45, 0.0  ;;  %vm667_vm13 = vcmp.gt.f32.partialorder %v646_v45, 0.0  ;;  %v678_v31 = vmin.f32 %v633_v14, 0.0 }
 0x1de   : > { %v1151_v55 = vsel %vm991_vm11, %v5794_v30, %v4568_v27  ;;  %v2032_v11 = vpack.c.b16 %v2031_v0, %v2030_v35  ;;  %v3133_v30 = vpack.c.b16 %v3132_v54, %v3132_v54  ;;  %v5859_v26 = vpop.f32.mrf.mxu3  ;;  %v695_v13 = vmul.f32 1.442695, %v675_v7 }
 0x1df   : > { %1844 = vrot.lane.b32.xlu2 %v1843_v37, %s5252_s4  ;;  %1925 = vrot.lane.b32.xlu1 %v1924_v62, %s5252_s4  ;;  %v1679_v8 = vpack.c.bf16 %v1151_v55, %v1151_v55  ;;  %v5122_v62 = vld [vmem:[%s5386_s13 + $0x8] sm:$0xff]  ;;  %7618 = vst [vmem:[#allocation9_spill] sm:$0xff] %v5859_v26  ;;  %v711_v17 = vmul.f32 1.442695, %v683_v25  ;;  %v701_v53 = vmul.f32 1.442695, %v678_v31  ;;  %v5902_v35 = vadd.f32 %v5853_v50, %v5560_v46 }
 0x1e0   : > { %4973 = vpow2.f32 %v695_v13  ;;  %v4755_v0 = vunpack.c.l.bf16 %v4754_v9  ;;  %v5907_v33 = vadd.f32 %v5853_v50, %v5538_v20  ;;  %vm662_vm2 = vcmp.gt.f32.partialorder %v633_v14, 0.0 }
 0x1e1   : > { %v2004_v37 = vunpack.c.l.b16 %v1679_v8  ;;  %4975 = vpow2.f32 %v711_v17  ;;  %v681_v52 = vmin.f32 %v5902_v35, 0.0  ;;  %vm665_vm5 = vcmp.gt.f32.partialorder %v5902_v35, 0.0 }
 0x1e2   : > { %vm5914_vm15 = vcmp.gt.f32.partialorder %v4755_v0, 0.0  ;;  %v679_v20 = vmin.f32 %v5907_v33, 0.0  ;;  %vm663_vm6 = vcmp.gt.f32.partialorder %v5907_v33, 0.0  ;;  %vm7591_vm7 = vcmask 1043456  }
 0x1e3   : > { %4612 = vmatmul.msk.bf16.vlgmr.msrb.gmra.mxu0 %vm7590_vm0, %v1791_v61  ;;  %v2005_v5 = vpack.c.b16 %v2004_v37, %v2003_v44 }
 0x1e4   : > { %1967 = vmatpush.bf16.xpose.msrb.mxu0 %v1958_v6  ;;  %v653_v6 = vadd.f32 %v5853_v50, %v5611_v38  ;;  %v703_v7 = vmul.f32 1.442695, %v679_v20 }
 0x1e6   : > { %v5863_v23 = vpop.f32.mrf.mxu3  ;;  %v4974_v18 = vpop.eup %4973  ;;  %vm670_vm14 = vcmp.gt.f32.partialorder %v653_v6, 0.0 }
 0x1e7   : > { %1871 = vrot.lane.b32.xlu2 %v1870_v60, %s5252_s4  ;;  %2060 = vrot.lane.b32.xlu1 %v2059_v10, %s5252_s4  ;;  %7619 = vst [vmem:[#allocation10_spill] sm:$0xff] %v5863_v23  ;;  %v4453_v61 = vadd.f32 -1.0, %v4974_v18  ;;  %v4976_v60 = vpop.eup %4975  ;;  %v686_v10 = vmin.f32 %v653_v6, 0.0  ;;  %v4819_v18 = vld [vmem:[%s5897_s30 + $0x18] sm:$0xff]  }
 0x1e8   : > { %v4461_v56 = vadd.f32 -1.0, %v4976_v60 }
 0x1e9   : > { %v739_v58 = vsel %vm659_vm12, %v626_v42, %v4453_v61  ;;  %v717_v1 = vmul.f32 1.442695, %v686_v10 }
 0x1ea   : > { %v5873_v41 = vpack.c.bf16 %v739_v58, %v739_v58  ;;  %v747_v28 = vsel %vm667_vm13, %v646_v45, %v4461_v56  ;;  %v5945_v58 = vadd.f32 %v5853_v50, %v5596_v59  ;;  %v4767_v56 = vunpack.c.l.bf16 %v4819_v18 }
 0x1eb   : > { %4601 = vmatmul.msk.bf16.vlgmr.msra.gmra.mxu3 %vm7590_vm0, %v5121_v48  ;;  %v5886_v48 = vpack.c.bf16 %v747_v28, %v747_v28  ;;  %4977 = vpow2.f32 %v717_v1 }
 0x1ec   : > { %1859 = vmatpush.bf16.xpose.msra.mxu3 %v1850_v34  ;;  %v1823_v38 = vsel %vm7590_vm0, %v5873_v41, 0  ;;  %4979 = vpow2.f32 %v701_v53  ;;  %v684_v28 = vmin.f32 %v5945_v58, 0.0  ;;  %vm5961_vm4 = vcmp.gt.f32.partialorder %v4767_v56, 0.0 }
 0x1ed   : > { %7622 = vst [vmem:[#allocation13_spill] sm:$0xff] %v5886_v48  ;;  %v2039_v51 = vsel %vm7590_vm0, %v5886_v48, 0  ;;  %vm668_vm9 = vcmp.gt.f32.partialorder %v5945_v58, 0.0 }
 0x1ef   : > { %1952 = vrot.lane.b32.xlu2 %v1951_v12, %s5252_s4  ;;  %2114 = vrot.lane.b32.xlu1 %v2113_v2, %s5252_s4 }
 0x1f1   : > { %v4978_v29 = vpop.eup %4977 }
 0x1f2   : > { %v4464_v2 = vadd.f32 -1.0, %v4978_v29  ;;  %v4980_v8 = vpop.eup %4979 }
 0x1f7   : > { %2033 = vrot.lane.b32.xlu2 %v2032_v11, %s5252_s4  ;;  %3104 = vrot.lane.b32.xlu1 %v3103_v19, %s7607_s12  ;;  %v5128_v11 = vld [vmem:[%s5386_s13 + $0x30] sm:$0xff]  ;;  %v750_v19 = vsel %vm670_vm14, %v653_v6, %v4464_v2 }
 0x1f8   : > { %v5918_v37 = vpack.c.bf16 %v750_v19, %v750_v19 }
 0x1fa   : > { %7627 = vst [vmem:[#allocation16_spill] sm:$0xff] %v5918_v37 }
 0x1fb   : > { %4602 = vmatmul.msk.bf16.gmra.mxu3 %vm7590_vm0, %v5122_v62  ;;  %v4456_v62 = vadd.f32 -1.0, %v4980_v8 }
 0x1fd   : > { %v742_v45 = vsel %vm662_vm2, %v633_v14, %v4456_v62  ;;  %v5129_v14 = vld [vmem:[%s5386_s13 + $0x38] sm:$0xff] }
 0x1fe   : > { %v5871_v36 = vpop.f32.mrf.mxu3  ;;  %v5932_v17 = vpack.c.bf16 %v742_v45, %v742_v45 }
 0x1ff   : > { %3134 = vrot.lane.b32.xlu2 %v3133_v30, %s7607_s12  ;;  %2006 = vrot.lane.b32.xlu1 %v2005_v5, %s5252_s4  ;;  %7620 = vst [vmem:[#allocation11_spill] sm:$0xff] %v5871_v36  ;;  %v707_v5 = vmul.f32 1.442695, %v681_v52 }
 0x200   : > { %7629 = vst [vmem:[#allocation18_spill] sm:$0xff] %v5932_v17  ;;  %v1904_v60 = vsel %vm7590_vm0, %v5932_v17, 0 }
 0x201   : > { %4981 = vpow2.f32 %v707_v5 }
 0x202   : > { %4983 = vpow2.f32 %v703_v7  ;;  %v651_v7 = vadd.f32 %v5853_v50, %v5601_v22 }
 0x204   : > { %vm669_vm11 = vcmp.gt.f32.partialorder %v651_v7, 0.0 }
 0x206   : > { %v5884_v4 = vpop.f32.mrf.mxu3 }
 0x207   : > { %7621 = vst [vmem:[#allocation12_spill] sm:$0xff] %v5884_v4  ;;  %v4982_v1 = vpop.eup %4981 }
 0x208   : > { %v4984_v59 = vpop.eup %4983  ;;  %v4459_v31 = vadd.f32 -1.0, %v4982_v1 }
 0x209   : > { %v4457_v53 = vadd.f32 -1.0, %v4984_v59 }
 0x20b   : > { %4603 = vmatmul.msk.bf16.gmra.mxu3 %vm7590_vm0, %v5123_v15  ;;  %v2120_v15 = vsel %vm7590_vm0, %v5918_v37, 0  ;;  %v743_v8 = vsel %vm663_vm6, %v5907_v33, %v4457_v53 }
 0x20c   : > { %v5986_v20 = vpack.c.bf16 %v743_v8, %v743_v8 }
 0x20e   : > { %7637 = vst [vmem:[#allocation20_spill] sm:$0xff] %v5986_v20  ;;  %v1931_v45 = vsel %vm7590_vm0, %v5986_v20, 0 }
 0x21b   : > { %4604 = vmatmul.msk.bf16.gmra.mxu3 %vm7590_vm0, %v5125_v47  ;;  %v4756_v47 = vunpack.c.h.bf16 %v4754_v9  ;;  %v713_v9 = vmul.f32 1.442695, %v684_v28 }
 0x21d   : > { %vm5934_vm3 = vcmp.gt.f32.partialorder %v4756_v47, 0.0  ;;  %4985 = vpow2.f32 %v713_v9 }
 0x21e   : > { %v5891_v12 = vpop.f32.mrf.mxu3 }
 0x21f   : > { %7623 = vst [vmem:[#allocation14_spill] sm:$0xff] %v5891_v12 }
 0x226   : > { %v5912_v54 = vpop.f32.mrf.mxu3 }
 0x227   : > { %7624 = vst [vmem:[#allocation15_spill] sm:$0xff] %v5912_v54 }
 0x229   : > { %v1315_v39 = vpop.permute.xlu2 %1314 }
 0x22b   : > { %4605 = vmatmul.msk.bf16.gmra.mxu3 %vm7590_vm0, %v5126_v63  ;;  %v4823_v63 = vld [vmem:[%s5897_s30 + $0x38] sm:$0xff]  }
 0x231   : > { %v5867_v43 = vpop.permute.xlu2 %1763 }
 0x239   : > { %v5875_v40 = vpop.permute.xlu2 %1844  ;;  %v1313_v21 = vpop.permute.xlu1 %1312 }
 0x23a   : > { %4585 = vmatmul.msk.bf16.vlgmr.msra.gmra.mxu2 %vm7590_vm0, %v1313_v21  ;;  %v5954_v21 = vadd.f32 %v5853_v50, %v5564_v57 }
 0x23b   : > { %1832 = vmatpush.bf16.xpose.msra.mxu2 %v1823_v38  ;;  %4606 = vmatmul.msk.bf16.gmra.mxu3 %vm7590_vm0, %v5127_v49 }
 0x23c   : > { %vm666_vm10 = vcmp.gt.f32.partialorder %v5954_v21, 0.0 }
 0x241   : > { %v1872_v34 = vpop.permute.xlu2 %1871  ;;  %v1737_v27 = vpop.permute.xlu1 %1736 }
 0x242   : > { %4615 = vmatmul.msk.bf16.vlgmr.msra.gmra.mxu0 %vm7590_vm0, %v1872_v34  ;;  %v682_v34 = vmin.f32 %v5954_v21, 0.0 }
 0x243   : > { %2048 = vmatpush.bf16.xpose.msra.mxu0 %v2039_v51 }
 0x244   : > { %v709_v19 = vmul.f32 1.442695, %v682_v34 }
 0x246   : > { %4987 = vpow2.f32 %v709_v19 }
 0x249   : > { %v1953_v55 = vpop.permute.xlu2 %1952  ;;  %v1818_v13 = vpop.permute.xlu1 %1817 }
 0x24a   : > { %4586 = vmatmul.msk.bf16.gmra.mxu2 %vm7590_vm0, %v1315_v39  ;;  %v5930_v39 = vpop.f32.mrf.mxu3 }
 0x24b   : > { %4607 = vmatmul.msk.bf16.gmra.mxu3 %vm7590_vm0, %v5128_v11  ;;  %7628 = vst [vmem:[#allocation17_spill] sm:$0xff] %v5930_v39  ;;  %v745_v11 = vsel %vm665_vm5, %v5902_v35, %v4459_v31 }
 0x24c   : > { %v5980_v52 = vpack.c.bf16 %v745_v11, %v745_v11 }
 0x24e   : > { %v1985_v33 = vsel %vm7590_vm0, %v5980_v52, 0 }
 0x250   : > { %v1726_v44 = vpop.f32.mrf.mxu0 }
 0x251   : > { %v5923_v30 = vsel %vm5914_vm15, %v1726_v44, -1e+30  ;;  %v2034_v25 = vpop.permute.xlu2 %2033  ;;  %v5958_v38 = vpop.permute.xlu1 %1925 }
 0x252   : > { %4618 = vmatmul.msk.bf16.vlgmr.msrb.gmra.mxu0 %vm7590_vm0, %v1953_v55  ;;  %v2169_v42 = vsel %vm2168_vm1, %v5923_v30, -inf  ;;  %v5967_v51 = vpop.f32.mrf.mxu3  ;;  %v4768_v55 = vunpack.c.h.bf16 %v4819_v18 }
 0x253   : > { %2129 = vmatpush.bf16.xpose.msrb.mxu0 %v2120_v15  ;;  %2170 = vmax.xlane.f32.xlu2 %v2169_v42  ;;  %7634 = vst [vmem:[#allocation19_spill] sm:$0xff] %v5967_v51  ;;  %v1899_v15 = vpop.permute.xlu0 %1898 }
 0x254   : > { %vm5982_vm8 = vcmp.gt.f32.partialorder %v4768_v55, 0.0 }
 0x258   : > { %v1728_v61 = vpop.f32.mrf.mxu0 }
 0x259   : > { %v5941_v6 = vsel %vm5934_vm3, %v1728_v61, -1e+30  ;;  %v3135_v57 = vpop.permute.xlu2 %3134  ;;  %v2061_v44 = vpop.permute.xlu1 %2060  ;;  %v685_v61 = vmin.f32 %v651_v7, 0.0 }
 0x25a   : > { %4610 = vmatmul.msk.bf16.vlgmr.msrb.gmra.mxu2 %vm7590_vm0, %v1737_v27  ;;  %v2172_v10 = vsel %vm2168_vm1, %v5941_v6, -inf  ;;  %v3140_v27 = vsel %vm7591_vm7, %v3135_v57, 0  ;;  %v5992_v42 = vpop.f32.mrf.mxu3 }
 0x25b   : > { %1913 = vmatpush.bf16.xpose.msrb.mxu2 %v1904_v60  ;;  %4608 = vmatmul.msk.bf16.gmra.mxu3 %vm7590_vm0, %v5129_v14  ;;  %7638 = vst [vmem:[#allocation21_spill] sm:$0xff] %v5992_v42  ;;  %v715_v22 = vmul.f32 1.442695, %v685_v61  ;;  %v1980_v50 = vpop.permute.xlu0 %1979 }
 0x25c   : > { %2173 = vmax.xlane.f32.xlu0 %v2172_v10 }
 0x25d   : > { %4989 = vpow2.f32 %v715_v22 }
 0x260   : > { %v1807_v29 = vpop.f32.mrf.mxu0 }
 0x261   : > { %v5972_v2 = vsel %vm5961_vm4, %v1807_v29, -1e+30  ;;  %v2115_v10 = vpop.permute.xlu1 %2114 }
 0x262   : > { %4621 = vmatmul.msk.bf16.vlgmr.msra.gmra.mxu0 %vm7590_vm0, %v2034_v25  ;;  %v2187_v0 = vsel %vm2168_vm1, %v5972_v2, -inf  ;;  %v4986_v25 = vpop.eup %4985  ;;  %v6009_v56 = vpop.f32.mrf.mxu3 }
 0x263   : > { %3149 = vmatpush.bf16.msra.mxu0 %v3140_v27  ;;  %v4462_v18 = vadd.f32 -1.0, %v4986_v25  ;;  %7639 = vst [vmem:[#allocation22_spill] sm:$0xff] %v6009_v56  ;;  %v3162_v56 = vunpack.c.l.b16 %v5599_v16 }
 0x264   : > { %2188 = vmax.xlane.f32.xlu0 %v2187_v0 }
 0x268   : > { %v1809_v5 = vpop.f32.mrf.mxu0 }
 0x269   : > { %v5990_v35 = vsel %vm5982_vm8, %v1809_v5, -1e+30  ;;  %v3105_v55 = vpop.permute.xlu1 %3104 }
 0x26a   : > { %4613 = vmatmul.msk.bf16.vlgmr.msra.gmra.mxu2 %vm7590_vm0, %v1818_v13  ;;  %v2190_v47 = vsel %vm2168_vm1, %v5990_v35, -inf  ;;  %v4988_v13 = vpop.eup %4987  ;;  %v6023_v34 = vpop.f32.mrf.mxu3  ;;  %v3110_v8 = vsel %vm7591_vm7, %v3105_v55, 0 }
 0x26b   : > { %1994 = vmatpush.bf16.xpose.msra.mxu2 %v1985_v33  ;;  %4611 = vmatmul.msk.bf16.vlgmr.msrb.gmra.mxu3 %vm7590_vm0, %v5867_v43  ;;  %v4460_v60 = vadd.f32 -1.0, %v4988_v13  ;;  %v748_v43 = vsel %vm668_vm9, %v5945_v58, %v4462_v18  ;;  %v4990_v31 = vpop.eup %4989  ;;  %7642 = vst [vmem:[#allocation25_spill] sm:$0xff] %v6023_v34  ;;  %v4822_v33 = vld [vmem:[%s5897_s30 + $0x30] sm:$0xff]  }
 0x26c   : > { %1940 = vmatpush.bf16.xpose.msrb.mxu3 %v1931_v45  ;;  %2191 = vmax.xlane.f32.xlu1 %v2190_v47  ;;  %v6012_v1 = vpack.c.bf16 %v748_v43, %v748_v43  ;;  %v4463_v57 = vadd.f32 -1.0, %v4990_v31  ;;  %v4779_v47 = vunpack.c.l.bf16 %v4822_v33  ;;  %v4780_v61 = vunpack.c.h.bf16 %v4822_v33 }
 0x26d   : > { %v746_v14 = vsel %vm666_vm10, %v5954_v21, %v4460_v60  ;;  %v2088_v21 = vpop.permute.xlu0 %2087 }
 0x26e   : > { %7640 = vst [vmem:[#allocation23_spill] sm:$0xff] %v6012_v1  ;;  %v6014_v59 = vpack.c.bf16 %v746_v14, %v746_v14  ;;  %v2066_v28 = vsel %vm7590_vm0, %v6012_v1, 0  ;;  %v749_v53 = vsel %vm669_vm11, %v651_v7, %v4463_v57  ;;  %vm6052_vm12 = vcmp.gt.f32.partialorder %v4779_v47, 0.0 }
 0x26f   : > { %v6025_v29 = vpack.c.bf16 %v749_v53, %v749_v53  ;;  %vm6066_vm13 = vcmp.gt.f32.partialorder %v4780_v61, 0.0  ;;  %v4817_v53 = vld [vmem:[%s5897_s30 + $0x8] sm:$0xff]  }
 0x270   : > { %7641 = vst [vmem:[#allocation24_spill] sm:$0xff] %v6014_v59  ;;  %v2012_v58 = vsel %vm7590_vm0, %v6014_v59, 0  ;;  %v4759_v55 = vunpack.c.l.bf16 %v4817_v53 }
 0x271   : > { %7643 = vst [vmem:[#allocation26_spill] sm:$0xff] %v6025_v29  ;;  %v2007_v19 = vpop.permute.xlu1 %2006 }
 0x272   : > { %4624 = vmatmul.msk.bf16.vlgmr.msrb.gmra.mxu0 %vm7590_vm0, %v2115_v10  ;;  %v6027_v27 = vpop.f32.mrf.mxu3  ;;  %vm6097_vm2 = vcmp.gt.f32.partialorder %v4759_v55, 0.0 }
 0x273   : > { %7644 = vst [vmem:[#allocation27_spill] sm:$0xff] %v6027_v27 }
 0x275   : > { %v3074_v9 = vpop.permute.xlu0 %3073 }
 0x276   : > { %v3080_v0 = vsel %vm7591_vm7, %v3074_v9, 0 }
 0x27a   : > { %4616 = vmatmul.msk.bf16.vlgmr.msrb.gmra.mxu2 %vm7590_vm0, %v1899_v15  ;;  %v6035_v11 = vpop.f32.mrf.mxu3 }
 0x27b   : > { %2075 = vmatpush.bf16.xpose.msrb.mxu2 %v2066_v28  ;;  %4614 = vmatmul.msk.bf16.vlgmr.msra.gmra.mxu3 %vm7590_vm0, %v5875_v40  ;;  %v2093_v40 = vsel %vm7590_vm0, %v6025_v29, 0  ;;  %7645 = vst [vmem:[#allocation28_spill] sm:$0xff] %v6035_v11 }
 0x27c   : > { %2021 = vmatpush.bf16.xpose.msra.mxu3 %v2012_v58 }
 0x282   : > { %v6040_v5 = vpop.f32.mrf.mxu3 }
 0x283   : > { %7646 = vst [vmem:[#allocation29_spill] sm:$0xff] %v6040_v5  ;;  %v4783_v5 = vunpack.c.l.bf16 %v4823_v63 }
 0x28a   : > { %4619 = vmatmul.msk.bf16.vlgmr.msra.gmra.mxu2 %vm7590_vm0, %v1980_v50  ;;  %v6042_v15 = vpop.f32.mrf.mxu3 }
 0x28b   : > { %3089 = vmatpush.bf16.msra.mxu2 %v3080_v0  ;;  %4617 = vmatmul.msk.bf16.vlgmr.msrb.gmra.mxu3 %vm7590_vm0, %v5958_v38  ;;  %7647 = vst [vmem:[#allocation30_spill] sm:$0xff] %v6042_v15  ;;  %v3222_v0 = vunpack.c.l.b16 %v5825_v32 }
 0x28c   : > { %2102 = vmatpush.bf16.xpose.msrb.mxu3 %v2093_v40 }
 0x292   : > { %v6045_v38 = vpop.f32.mrf.mxu3 }
 0x293   : > { %7648 = vst [vmem:[#allocation31_spill] sm:$0xff] %v6045_v38  ;;  %v4760_v38 = vunpack.c.h.bf16 %v4817_v53 }
 0x295   : > { %vm6113_vm6 = vcmp.gt.f32.partialorder %v4760_v38, 0.0 }
 0x29a   : > { %4622 = vmatmul.msk.bf16.vlgmr.msrb.gmra.mxu2 %vm7590_vm0, %v2061_v44  ;;  %v6048_v7 = vpop.f32.mrf.mxu3 }
 0x29b   : > { %4620 = vmatmul.msk.bf16.vlgmr.msra.gmra.mxu3 %vm7590_vm0, %v2007_v19  ;;  %7649 = vst [vmem:[#allocation32_spill] sm:$0xff] %v6048_v7  ;;  %v3163_v7 = vpack.c.b16 %v3162_v56, %v3162_v56 }
 0x29c   : > { %3119 = vmatpush.bf16.msra.mxu3 %v3110_v8 }
 0x2a2   : > { %v6062_v60 = vpop.f32.mrf.mxu3 }
 0x2a3   : > { %7653 = vst [vmem:[#allocation34_spill] sm:$0xff] %v6062_v60 }
 0x2aa   : > { %v6078_v58 = vpop.f32.mrf.mxu3 }
 0x2ab   : > { %4623 = vmatmul.msk.bf16.vlgmr.msrb.gmra.mxu3 %vm7590_vm0, %v2088_v21  ;;  %7658 = vst [vmem:[#allocation37_spill] sm:$0xff] %v6078_v58  ;;  %v4825_v21 = vld [vmem:[%s5897_s30 + $0x48] sm:$0xff]  }
 0x2ac   : > { %v4792_v57 = vunpack.c.h.bf16 %v4825_v21  ;;  %v4791_v61 = vunpack.c.l.bf16 %v4825_v21 }
 0x2ae   : > { %vm6084_vm14 = vcmp.gt.f32.partialorder %v4792_v57, 0.0  ;;  %vm6107_vm5 = vcmp.gt.f32.partialorder %v4791_v61, 0.0 }
 0x2b2   : > { %v6088_v19 = vpop.f32.mrf.mxu3 }
 0x2b3   : > { %7662 = vst [vmem:[#allocation39_spill] sm:$0xff] %v6088_v19  ;;  %v6352_v19 = vld [vmem:[%s5897_s30 + $0x40] sm:$0xff]  }
 0x2bd   : > { %v6050_v45 = vpop.f32.mrf.mxu2 }
 0x2be   : > { %7650 = vst [vmem:[#allocation33_spill] sm:$0xff] %v6050_v45 }
 0x2bf   : > { %v1888_v25 = vpop.f32.mrf.mxu0 }
 0x2c0   : > { %v6058_v13 = vsel %vm6052_vm12, %v1888_v25, -1e+30 }
 0x2c1   : > { %v2205_v18 = vsel %vm2168_vm1, %v6058_v13, -inf }
 0x2c2   : > { %2206 = vmax.xlane.f32.xlu0 %v2205_v18 }
 0x2c5   : > { %v6064_v10 = vpop.f32.mrf.mxu2 }
 0x2c6   : > { %7654 = vst [vmem:[#allocation35_spill] sm:$0xff] %v6064_v10  ;;  %v4784_v10 = vunpack.c.h.bf16 %v4823_v63  ;;  %v2171_v27 = vpop.xlane.xlu2 %2170 }
 0x2c7   : > { %v1890_v50 = vpop.f32.mrf.mxu0  ;;  %v2265_v42 = vsub.f32 %v5923_v30, %v2171_v27 }
 0x2c8   : > { %v6072_v43 = vsel %vm6066_vm13, %v1890_v50, -1e+30  ;;  %vm6174_vm11 = vcmp.gt.f32.partialorder %v4784_v10, 0.0 }
 0x2c9   : > { %v2208_v14 = vsel %vm2168_vm1, %v6072_v43, -inf  ;;  %v2297_v34 = vmul.f32 1.442695, %v2265_v42 }
 0x2ca   : > { %2209 = vmax.xlane.f32.xlu2 %v2208_v14 }
 0x2cd   : > { %v6076_v28 = vpop.f32.mrf.mxu2 }
 0x2ce   : > { %7657 = vst [vmem:[#allocation36_spill] sm:$0xff] %v6076_v28 }
 0x2cf   : > { %v1969_v31 = vpop.f32.mrf.mxu0  ;;  %v2174_v8 = vpop.xlane.xlu0 %2173 }
 0x2d0   : > { %v2266_v25 = vsub.f32 %v5941_v6, %v2174_v8  ;;  %v6111_v6 = vpop.f32.mrf.mxu3  ;;  %v6119_v55 = vsel %vm6107_vm5, %v1969_v31, -1e+30  ;;  %v4820_v8 = vld [vmem:[%s5897_s30 + $0x20] sm:$0xff]   ;;  %v3372_v31 = vunpack.c.l.b16 %v5980_v52  ;;  %v4788_v52 = vunpack.c.h.bf16 %v6352_v19 }
 0x2d1   : > { %7667 = vst [vmem:[#allocation40_spill] sm:$0xff] %v6111_v6  ;;  %v4771_v38 = vunpack.c.l.bf16 %v4820_v8 }
 0x2d2   : > { %v2299_v57 = vmul.f32 1.442695, %v2266_v25 }
 0x2d3   : > { %vm6130_vm9 = vcmp.gt.f32.partialorder %v4771_v38, 0.0  ;;  %v4772_v38 = vunpack.c.h.bf16 %v4820_v8  ;;  %v7676_v8 = vmov 0 }
 0x2d4   : > { %4991 = vpow2.f32 %v2299_v57 }
 0x2d5   : > { %v6082_v9 = vpop.f32.mrf.mxu2  ;;  %vm6148_vm10 = vcmp.gt.f32.partialorder %v4772_v38, 0.0  ;;  %4993 = vpow2.f32 %v2297_v34 }
 0x2d6   : > { %7659 = vst [vmem:[#allocation38_spill] sm:$0xff] %v6082_v9 }
 0x2d7   : > { %v1971_v40 = vpop.f32.mrf.mxu0 }
 0x2d8   : > { %v6092_v33 = vsel %vm6084_vm14, %v1971_v40, -1e+30 }
 0x2d9   : > { %v2226_v47 = vsel %vm2168_vm1, %v6092_v33, -inf }
 0x2da   : > { %2227 = vmax.xlane.f32.xlu0 %v2226_v47  ;;  %v4992_v57 = vpop.eup %4991 }
 0x2db   : > { %v4994_v34 = vpop.eup %4993 }
 0x2dd   : > { %v1753_v50 = vpop.f32.mrf.mxu2 }
 0x2de   : > { %v6103_v14 = vsel %vm6097_vm2, %v1753_v50, -1e+30  ;;  %v2223_v50 = vsel %vm2168_vm1, %v6119_v55, -inf }
 0x2df   : > { %v2175_v40 = vsel %vm2168_vm1, %v6103_v14, -inf }
 0x2e0   : > { %2176 = vmax.xlane.f32.xlu1 %v2175_v40  ;;  %v6134_v40 = vpop.f32.mrf.mxu3 }
 0x2e1   : > { %7672 = vst [vmem:[#allocation41_spill] sm:$0xff] %v6134_v40 }
 0x2e5   : > { %v1755_v25 = vpop.f32.mrf.mxu2 }
 0x2e6   : > { %v6124_v53 = vsel %vm6113_vm6, %v1755_v25, -1e+30  ;;  %v6138_v25 = vsel %vm5934_vm3, %v4992_v57, 0.0  ;;  %vm6161_vm3 = vcmp.gt.f32.partialorder %v4783_v5, 0.0 }
 0x2e7   : > { %v2178_v61 = vsel %vm2168_vm1, %v6124_v53, -inf  ;;  %v7677_v8 = vsel %vm6161_vm3, 4294967295, %v7676_v8 }
 0x2e8   : > { %2179 = vmax.xlane.f32.xlu2 %v2178_v61  ;;  %2224 = vmax.xlane.f32.xlu1 %v2223_v50  ;;  %v2396_v50 = vsel %vm2168_vm1, %v6138_v25, 0.0  ;;  %v6153_v15 = vpop.f32.mrf.mxu3 }
 0x2e9   : > { %7675 = vst [vmem:[#allocation42_spill] sm:$0xff] %v6153_v15  ;;  %v2192_v15 = vpop.xlane.xlu1 %2191 }
 0x2ed   : > { %v1834_v9 = vpop.f32.mrf.mxu2 }
 0x2ee   : > { %v6142_v11 = vsel %vm6130_vm9, %v1834_v9, -1e+30 }
 0x2ef   : > { %v2193_v61 = vsel %vm2168_vm1, %v6142_v11, -inf }
 0x2f0   : > { %2194 = vmax.xlane.f32.xlu2 %v2193_v61  ;;  %2397 = vadd.xlane.f32.xlu1 %v2396_v50 }
 0x2f5   : > { %v1836_v57 = vpop.f32.mrf.mxu2 }
 0x2f6   : > { %v6157_v9 = vsel %vm6148_vm10, %v1836_v57, -1e+30  ;;  %v6171_v57 = vpop.f32.mrf.mxu3 }
 0x2f7   : > { %v2196_v28 = vsel %vm2168_vm1, %v6157_v9, -inf  ;;  %7678 = vst [vmem:[#allocation43_spill] sm:$0xff] %v6171_v57  ;;  %v2189_v57 = vpop.xlane.xlu0 %2188 }
 0x2f8   : > { %2197 = vmax.xlane.f32.xlu0 %v2196_v28  ;;  %v4826_v28 = vld [vmem:[%s5897_s30 + $0x50] sm:$0xff]   ;;  %v2271_v30 = vsub.f32 %v5972_v2, %v2189_v57  ;;  %v2272_v2 = vsub.f32 %v5990_v35, %v2192_v15 }
 0x2f9   : > { %v4795_v6 = vunpack.c.l.bf16 %v4826_v28 }
 0x2fa   : > { %v2309_v42 = vmul.f32 1.442695, %v2271_v30  ;;  %v4829_v30 = vld [vmem:[%s5897_s30 + $0x68] sm:$0xff]  }
 0x2fb   : > { %vm6188_vm0 = vcmp.gt.f32.partialorder %v4795_v6, 0.0 }
 0x2fc   : > { %4995 = vpow2.f32 %v2309_v42  ;;  %v4807_v42 = vunpack.c.l.bf16 %v4829_v30 }
 0x2fd   : > { %v1915_v61 = vpop.f32.mrf.mxu2 }
 0x2fe   : > { %v6167_v50 = vsel %vm6161_vm3, %v1915_v61, -1e+30 }
 0x2ff   : > { %v2211_v38 = vsel %vm2168_vm1, %v6167_v50, -inf }
 0x300   : > { %2212 = vmax.xlane.f32.xlu2 %v2211_v38  ;;  %v6185_v38 = vpop.f32.mrf.mxu3 }
 0x301   : > { %7681 = vst [vmem:[#allocation44_spill] sm:$0xff] %v6185_v38 }
 0x305   : > { %v1917_v51 = vpop.f32.mrf.mxu2 }
 0x306   : > { %v6181_v61 = vsel %vm6174_vm11, %v1917_v51, -1e+30 }
 0x307   : > { %v2214_v63 = vsel %vm2168_vm1, %v6181_v61, -inf }
 0x308   : > { %2215 = vmax.xlane.f32.xlu0 %v2214_v63  ;;  %v4796_v63 = vunpack.c.h.bf16 %v4826_v28  ;;  %v6203_v57 = vpop.f32.mrf.mxu3 }
 0x309   : > { %7686 = vst [vmem:[#allocation45_spill] sm:$0xff] %v6203_v57 }
 0x30a   : > { %vm6199_vm7 = vcmp.gt.f32.partialorder %v4796_v63, 0.0  ;;  %v4996_v63 = vpop.eup %4995 }
 0x30d   : > { %v1996_v10 = vpop.f32.mrf.mxu2 }
 0x30e   : > { %v6194_v51 = vsel %vm6188_vm0, %v1996_v10, -1e+30  ;;  %v6207_v10 = vsel %vm5914_vm15, %v4994_v34, 0.0  ;;  %vm6218_vm15 = vcmp.gt.f32.partialorder %v4807_v42, 0.0 }
 0x30f   : > { %v2229_v12 = vsel %vm2168_vm1, %v6194_v51, -inf  ;;  %v2393_v15 = vsel %vm2168_vm1, %v6207_v10, 0.0 }
 0x310   : > { %2230 = vmax.xlane.f32.xlu0 %v2229_v12  ;;  %v2311_v12 = vmul.f32 1.442695, %v2272_v2  ;;  %v6226_v2 = vpop.f32.mrf.mxu3 }
 0x311   : > { %7689 = vst [vmem:[#allocation46_spill] sm:$0xff] %v6226_v2 }
 0x312   : > { %4997 = vpow2.f32 %v2311_v12 }
 0x315   : > { %v1998_v38 = vpop.f32.mrf.mxu2 }
 0x316   : > { %v6212_v28 = vsel %vm6199_vm7, %v1998_v38, -1e+30  ;;  %v6224_v38 = vsel %vm5961_vm4, %v4996_v63, 0.0 }
 0x317   : > { %v2232_v35 = vsel %vm2168_vm1, %v6212_v28, -inf }
 0x318   : > { %2233 = vmax.xlane.f32.xlu2 %v2232_v35  ;;  %2394 = vadd.xlane.f32.xlu0 %v2393_v15  ;;  %v2411_v35 = vsel %vm2168_vm1, %v6224_v38, 0.0  ;;  %v4808_v15 = vunpack.c.h.bf16 %v4829_v30  ;;  %v4998_v42 = vpop.eup %4997 }
 0x319   : > { %v6242_v63 = vsel %vm5982_vm8, %v4998_v42, 0.0 }
 0x31a   : > { %vm6236_vm3 = vcmp.gt.f32.partialorder %v4808_v15, 0.0  ;;  %v2414_v58 = vsel %vm2168_vm1, %v6242_v63, 0.0 }
 0x31d   : > { %v2077_v34 = vpop.f32.mrf.mxu2 }
 0x31e   : > { %v6230_v39 = vsel %vm6218_vm15, %v2077_v34, -1e+30 }
 0x31f   : > { %v2247_v12 = vsel %vm2168_vm1, %v6230_v39, -inf }
 0x320   : > { %2412 = vadd.xlane.f32.xlu2 %v2411_v35  ;;  %2248 = vmax.xlane.f32.xlu1 %v2247_v12  ;;  %v6252_v35 = vpop.f32.mrf.mxu3 }
 0x321   : > { %7692 = vst [vmem:[#allocation47_spill] sm:$0xff] %v6252_v35 }
 0x325   : > { %v2079_v34 = vpop.f32.mrf.mxu2 }
 0x326   : > { %v6246_v2 = vsel %vm6236_vm3, %v2079_v34, -1e+30 }
 0x327   : > { %v2250_v30 = vsel %vm2168_vm1, %v6246_v2, -inf }
 0x328   : > { %2415 = vadd.xlane.f32.xlu2 %v2414_v58  ;;  %2251 = vmax.xlane.f32.xlu1 %v2250_v30  ;;  %v6254_v12 = vpop.f32.mrf.mxu3 }
 0x330   : > { %v1782_v36 = vpop.f32.mrf.mxu3 }
 0x335   : > { %v2207_v62 = vpop.xlane.xlu0 %2206 }
 0x336   : > { %v2277_v15 = vsub.f32 %v6058_v13, %v2207_v62 }
 0x338   : > { %v2321_v42 = vmul.f32 1.442695, %v2277_v15  ;;  %v1861_v30 = vpop.f32.mrf.mxu3 }
 0x33a   : > { %4999 = vpow2.f32 %v2321_v42 }
 0x33d   : > { %v2210_v34 = vpop.xlane.xlu2 %2209 }
 0x33e   : > { %v2278_v60 = vsub.f32 %v6072_v43, %v2210_v34  ;;  %v3192_v34 = vunpack.c.l.b16 %v5873_v41 }
 0x340   : > { %v5000_v23 = vpop.eup %4999  ;;  %v2323_v37 = vmul.f32 1.442695, %v2278_v60  ;;  %v6271_v44 = vpop.f32.mrf.mxu3  ;;  %v3193_v57 = vpack.c.b16 %v3192_v34, %v3192_v34 }
 0x341   : > { %v6260_v48 = vsel %vm6052_vm12, %v5000_v23, 0.0 }
 0x342   : > { %5001 = vpow2.f32 %v2323_v37  ;;  %v2429_v58 = vsel %vm2168_vm1, %v6260_v48, 0.0 }
 0x343   : > { %2430 = vadd.xlane.f32.xlu2 %v2429_v58  ;;  %v4818_v58 = vld [vmem:[%s5897_s30 + $0x10] sm:$0xff]  }
 0x344   : > { %v4764_v35 = vunpack.c.h.bf16 %v4818_v58 }
 0x346   : > { %vm6285_vm4 = vcmp.gt.f32.partialorder %v4764_v35, 0.0 }
 0x347   : > { %v6294_v34 = vsel %vm6285_vm4, %v1782_v36, -1e+30 }
 0x348   : > { %v5002_v13 = vpop.eup %5001  ;;  %v2184_v32 = vsel %vm2168_vm1, %v6294_v34, -inf }
 0x349   : > { %v6266_v62 = vsel %vm6066_vm13, %v5002_v13, 0.0 }
 0x34a   : > { %v2432_v43 = vsel %vm2168_vm1, %v6266_v62, 0.0 }
 0x34b   : > { %2433 = vadd.xlane.f32.xlu1 %v2432_v43 }
 0x34d   : > { %v2228_v60 = vpop.xlane.xlu0 %2227 }
 0x34e   : > { %v2284_v23 = vsub.f32 %v6092_v33, %v2228_v60  ;;  %v6280_v33 = vpop.f32.mrf.mxu3 }
 0x350   : > { %v2335_v37 = vmul.f32 1.442695, %v2284_v23 }
 0x352   : > { %5003 = vpow2.f32 %v2335_v37  ;;  %v4821_v37 = vld [vmem:[%s5897_s30 + $0x28] sm:$0xff]  }
 0x353   : > { %v2177_v15 = vpop.xlane.xlu1 %2176 }
 0x354   : > { %v2267_v42 = vsub.f32 %v6103_v14, %v2177_v15 }
 0x356   : > { %v2301_v22 = vmul.f32 1.442695, %v2267_v42  ;;  %v6309_v18 = vpop.f32.mrf.mxu3 }
 0x358   : > { %v5004_v13 = vpop.eup %5003  ;;  %5005 = vpow2.f32 %v2301_v22  ;;  %v4775_v22 = vunpack.c.l.bf16 %v4821_v37 }
 0x359   : > { %v6278_v43 = vsel %vm6084_vm14, %v5004_v13, 0.0 }
 0x35a   : > { %7693 = vst [vmem:[#allocation48_spill] sm:$0xff] %v6278_v43  ;;  %v2450_v60 = vsel %vm2168_vm1, %v6278_v43, 0.0  ;;  %vm6305_vm8 = vcmp.gt.f32.partialorder %v4775_v22, 0.0 }
 0x35b   : > { %3194 = vrot.lane.b32.xlu2 %v3193_v57, %s7607_s12  ;;  %v2180_v14 = vpop.xlane.xlu2 %2179  ;;  %2451 = vadd.xlane.f32.xlu1 %v2450_v60  ;;  %v4763_v60 = vunpack.c.l.bf16 %v4818_v58 }
 0x35c   : > { %v2268_v23 = vsub.f32 %v6124_v53, %v2180_v14  ;;  %v3223_v53 = vpack.c.b16 %v3222_v0, %v3222_v0  ;;  %v6313_v14 = vsel %vm6305_vm8, %v1861_v30, -1e+30 }
 0x35d   : > { %vm6323_vm12 = vcmp.gt.f32.partialorder %v4763_v60, 0.0  ;;  %v2199_v58 = vsel %vm2168_vm1, %v6313_v14, -inf }
 0x35e   : > { %v5006_v15 = vpop.eup %5005  ;;  %v2303_v42 = vmul.f32 1.442695, %v2268_v23  ;;  %v6332_v21 = vsel %vm6323_vm12, %v6254_v12, -1e+30  ;;  %v6334_v30 = vpop.f32.mrf.mxu3 }
 0x35f   : > { %v6298_v57 = vsel %vm6097_vm2, %v5006_v15, 0.0  ;;  %v6321_v15 = vpop.xlane.xlu1 %2224  ;;  %7700 = vst [vmem:[#allocation49_spill] sm:$0xff] %v6334_v30  ;;  %v2181_v22 = vsel %vm2168_vm1, %v6332_v21, -inf }
 0x360   : > { %5007 = vpow2.f32 %v2303_v42  ;;  %v2399_v35 = vsel %vm2168_vm1, %v6298_v57, 0.0 }
 0x361   : > { %2400 = vadd.xlane.f32.xlu0 %v2399_v35 }
 0x363   : > { %3224 = vrot.lane.b32.xlu2 %v3223_v53, %s7607_s12  ;;  %2185 = vmax.xlane.f32.xlu1 %v2184_v32  ;;  %v6344_v60 = vpop.xlane.xlu2 %2194 }
 0x366   : > { %v5008_v13 = vpop.eup %5007  ;;  %v6340_v32 = vpop.f32.mrf.mxu3 }
 0x367   : > { %v6317_v23 = vsel %vm6113_vm6, %v5008_v13, 0.0  ;;  %v2398_v35 = vpop.xlane.xlu1 %2397 }
 0x368   : > { %v2402_v0 = vsel %vm2168_vm1, %v6317_v23, 0.0  ;;  %vm2490_vm13 = vcmp.gt.f32.partialorder %v2398_v35, 0.0 }
 0x369   : > { %2403 = vadd.xlane.f32.xlu0 %v2402_v0  ;;  %v6342_v13 = vsel %vm2490_vm13, %v2398_v35, 1.0 }
 0x36a   : > { %5009 = vrcp.f32 %v6342_v13 }
 0x36b   : > { %2200 = vmax.xlane.f32.xlu1 %v2199_v58  ;;  %v6338_v53 = vpop.xlane.xlu0 %2197 }
 0x36e   : > { %v6349_v54 = vpop.f32.mrf.mxu3 }
 0x370   : > { %v5010_v40 = vpop.eup %5009 }
 0x371   : > { %2182 = vmax.xlane.f32.xlu0 %v2181_v22  ;;  %v4776_v22 = vunpack.c.h.bf16 %v4821_v37  ;;  %v2569_v16 = vmul.f32 %v5010_v40, %v6342_v13  ;;  %v4787_v37 = vunpack.c.l.bf16 %v6352_v19  ;;  %vm2574_vm13 = vweird.f32 %v5010_v40 }
 0x373   : > { %v6354_v35 = vpop.xlane.xlu2 %2212  ;;  %vm6357_vm14 = vcmp.gt.f32.partialorder %v4776_v22, 0.0  ;;  %vm6379_vm2 = vcmp.gt.f32.partialorder %v4787_v37, 0.0  ;;  %v7704_v22 = vmov 0 }
 0x374   : > { %v6371_v56 = vsel %vm6357_vm14, %v6271_v44, -1e+30  ;;  %v7705_v22 = vsel %vm6379_vm2, 4294967295, %v7704_v22 }
 0x375   : > { %7706 = vst [vmem:[#allocation51_spill] sm:$0xff] %v7705_v22  ;;  %v2202_v44 = vsel %vm2168_vm1, %v6371_v56, -inf }
 0x376   : > { %v2106_v37 = vpop.f32.mrf.mxu3 }
 0x37b   : > { %v2216_v0 = vpop.xlane.xlu0 %2215 }
 0x37c   : > { %v2280_v12 = vsub.f32 %v6181_v61, %v2216_v0 }
 0x37e   : > { %v2327_v58 = vmul.f32 1.442695, %v2280_v12 }
 0x380   : > { %5011 = vpow2.f32 %v2327_v58  ;;  %v2570_v58 = vsub.f32 1.0, %v2569_v16  ;;  %v7707_v16 = vmov 0 }
 0x383   : > { %v2231_v4 = vpop.xlane.xlu0 %2230 }
 0x384   : > { %v2285_v26 = vsub.f32 %v6194_v51, %v2231_v4  ;;  %v6374_v4 = vld [vmem:[%s5897_s30 + $0x70] sm:$0xff]  }
 0x385   : > { %3164 = vrot.lane.b32.xlu0 %v3163_v7, %s7607_s12  ;;  %v4812_v7 = vunpack.c.h.bf16 %v6374_v4 }
 0x386   : > { %v5012_v61 = vpop.eup %5011  ;;  %v2337_v51 = vmul.f32 1.442695, %v2285_v26  ;;  %v6389_v26 = vsel %vm6379_vm2, %v6280_v33, -1e+30  ;;  %vm2573_vm2 = vweird.f32 %v6342_v13 }
 0x387   : > { %v6366_v0 = vsel %vm6174_vm11, %v5012_v61, 0.0  ;;  %vm6391_vm11 = vcmp.gt.f32.partialorder %v4812_v7, 0.0  ;;  %v2579_v7 = vand.u32 2147483648, %v6342_v13 }
 0x388   : > { %7703 = vst [vmem:[#allocation50_spill] sm:$0xff] %v6366_v0  ;;  %v2438_v12 = vsel %vm2168_vm1, %v6366_v0, 0.0  ;;  %5013 = vpow2.f32 %v2337_v51  ;;  %v7708_v16 = vsel %vm6391_vm11, 4294967295, %v7707_v16  ;;  %v6397_v51 = vsel %vm6391_vm11, %v2106_v37, -1e+30 }
 0x389   : > { %2439 = vadd.xlane.f32.xlu1 %v2438_v12  ;;  %7709 = vst [vmem:[#allocation52_spill] sm:$0xff] %v7708_v16  ;;  %v2571_v12 = vmul.f32 %v5010_v40, %v2570_v58  ;;  %v2577_v58 = vand.u32 2147483647, %v6342_v13  ;;  %v2256_v1 = vsel %vm2168_vm1, %v6397_v51, -inf  ;;  %v2580_v0 = vor.u32 1.1754944e-38, %v2579_v7 }
 0x38b   : > { %v2234_v5 = vpop.xlane.xlu2 %2233  ;;  %v2395_v61 = vpop.xlane.xlu0 %2394  ;;  %vm2578_vm11 = vcmp.eq.f32.partialorder %v2577_v58, 8.507059e+37 }
 0x38c   : > { %v2286_v24 = vsub.f32 %v6212_v28, %v2234_v5  ;;  %vm2489_vm6 = vcmp.gt.f32.partialorder %v2395_v61, 0.0  ;;  %2203 = vmax.xlane.f32.xlu2 %v2202_v44  ;;  %v2217_v5 = vsel %vm2168_vm1, %v6389_v26, -inf  ;;  %v2572_v44 = vadd.f32 %v5010_v40, %v2571_v12 }
 0x38d   : > { %v2521_v20 = vsel %vm2489_vm6, %v2395_v61, 1.0  ;;  %vm2575_vm6 = vmor %vm2573_vm2, %vm2574_vm13 }
 0x38e   : > { %5015 = vrcp.f32 %v2521_v20  ;;  %v2339_v28 = vmul.f32 1.442695, %v2286_v24  ;;  %v5014_v33 = vpop.eup %5013  ;;  %v2576_v12 = vsel %vm2575_vm6, %v5010_v40, %v2572_v44  ;;  %v2564_v43 = vand.u32 2147483648, %v2521_v20 }
 0x38f   : > { %v2581_v13 = vsel %vm2578_vm11, %v2580_v0, %v2576_v12 }
 0x390   : > { %5017 = vpow2.f32 %v2339_v28  ;;  %v2562_v28 = vand.u32 2147483647, %v2521_v20  ;;  %v2582_v40 = vmul.f32 %v2581_v13, %v6138_v25 }
 0x391   : > { %2218 = vmax.xlane.f32.xlu1 %v2217_v5  ;;  %v6409_v5 = vsel %vm6188_vm0, %v5014_v33, 0.0  ;;  %vm2558_vm0 = vweird.f32 %v2521_v20 }
 0x392   : > { %v2453_v16 = vsel %vm2168_vm1, %v6409_v5, 0.0  ;;  %vm2563_vm11 = vcmp.eq.f32.partialorder %v2562_v28, 8.507059e+37  ;;  %v2279_v28 = vsub.f32 %v6167_v50, %v6354_v35 }
 0x393   : > { %v2249_v61 = vpop.xlane.xlu1 %2248  ;;  %v6425_v6 = vpop.xlane.xlu2 %2412 }
 0x394   : > { %v5016_v37 = vpop.eup %5015  ;;  %v2291_v24 = vsub.f32 %v6230_v39, %v2249_v61  ;;  %2257 = vmax.xlane.f32.xlu2 %v2256_v1  ;;  %v2283_v1 = vsub.f32 %v6119_v55, %v6321_v15 }
 0x395   : > { %v2554_v29 = vmul.f32 %v5016_v37, %v2521_v20  ;;  %vm2559_vm2 = vweird.f32 %v5016_v37 }
 0x396   : > { %v2349_v17 = vmul.f32 1.442695, %v2291_v24  ;;  %v5018_v39 = vpop.eup %5017  ;;  %vm2560_vm13 = vmor %vm2558_vm0, %vm2559_vm2  ;;  %vm6468_vm2 = vcmp.gt.f32.partialorder %v4788_v52, 0.0 }
 0x397   : > { %v2555_v30 = vsub.f32 1.0, %v2554_v29  ;;  %v2565_v29 = vor.u32 1.1754944e-38, %v2564_v43  ;;  %v6418_v44 = vsel %vm6199_vm7, %v5018_v39, 0.0 }
 0x398   : > { %5019 = vpow2.f32 %v2349_v17  ;;  %v2456_v55 = vsel %vm2168_vm1, %v6418_v44, 0.0  ;;  %v2273_v17 = vsub.f32 %v6142_v11, %v6344_v60  ;;  %v2274_v11 = vsub.f32 %v6157_v9, %v6338_v53 }
 0x399   : > { %v2556_v22 = vmul.f32 %v5016_v37, %v2555_v30  ;;  %2454 = vadd.xlane.f32.xlu1 %v2453_v16  ;;  %v2333_v30 = vmul.f32 1.442695, %v2283_v1  ;;  %v3034_v16 = vpack.c.bf16 %v2582_v40, %v2582_v40  ;;  %v2325_v9 = vmul.f32 1.442695, %v2279_v28 }
 0x39a   : > { %v2315_v24 = vmul.f32 1.442695, %v2274_v11 }
 0x39b   : > { %v2557_v27 = vadd.f32 %v5016_v37, %v2556_v22  ;;  %5021 = vpow2.f32 %v2333_v30  ;;  %v3068_v43 = vunpack.c.l.b16 %v3034_v16  ;;  %v2416_v46 = vpop.xlane.xlu2 %2415  ;;  %v6448_v53 = vpop.xlane.xlu1 %2251 }
 0x39d   : > { %v2561_v0 = vsel %vm2560_vm13, %v5016_v37, %v2557_v27 }
 0x39e   : > { %v2566_v33 = vsel %vm2563_vm11, %v2565_v29, %v2561_v0  ;;  %v5020_v20 = vpop.eup %5019  ;;  %vm2496_vm11 = vcmp.gt.f32.partialorder %v2416_v46, 0.0 }
 0x39f   : > { %v2567_v7 = vmul.f32 %v2566_v33, %v6207_v10  ;;  %v6429_v58 = vsel %vm6218_vm15, %v5020_v20, 0.0  ;;  %v2313_v10 = vmul.f32 1.442695, %v2273_v17 }
 0x3a0   : > { %v2471_v37 = vsel %vm2168_vm1, %v6429_v58, 0.0 }
 0x3a1   : > { %v3033_v25 = vpack.c.bf16 %v2567_v7, %v2567_v7  ;;  %2457 = vadd.xlane.f32.xlu1 %v2456_v55  ;;  %v5022_v61 = vpop.eup %5021  ;;  %5023 = vpow2.f32 %v2313_v10 }
 0x3a2   : > { %v6438_v60 = vsel %vm6107_vm5, %v5022_v61, 0.0  ;;  %5025 = vpow2.f32 %v2315_v24  ;;  %vm7710_vm5 = vcmask 1043456  }
 0x3a3   : > { %v3067_v15 = vunpack.c.l.b16 %v3033_v25  ;;  %v2447_v12 = vsel %vm2168_vm1, %v6438_v60, 0.0  ;;  %v3373_v25 = vpack.c.b16 %v3372_v31, %v3372_v31  ;;  %vm7714_vm13 = vmmov %vm7710_vm5 }
 0x3a5   : > { %v3069_v22 = vpack.c.b16 %v3068_v43, %v3067_v15 }
 0x3a7   : > { %4625 = vmatmul.msk.bf16.vlgmr.msra.gmra.mxu2 %vm2168_vm1, %v3069_v22  ;;  %v5024_v13 = vpop.eup %5023 }
 0x3a8   : > { %v6446_v39 = vsel %vm6130_vm9, %v5024_v13, 0.0  ;;  %v5026_v40 = vpop.eup %5025  ;;  %v6476_v13 = vsel %vm6468_vm2, %v6309_v18, -1e+30 }
 0x3a9   : > { %2472 = vadd.xlane.f32.xlu1 %v2471_v37  ;;  %v2417_v1 = vsel %vm2168_vm1, %v6446_v39, 0.0  ;;  %v6454_v50 = vsel %vm6148_vm10, %v5026_v40, 0.0  ;;  %vm7711_vm10 = vnez %v7677_v8  ;;  %v2220_v18 = vsel %vm2168_vm1, %v6476_v13, -inf }
 0x3aa   : > { %v2420_v0 = vsel %vm2168_vm1, %v6454_v50, 0.0 }
 0x3af   : > { %2448 = vadd.xlane.f32.xlu0 %v2447_v12 }
 0x3b6   : > { %v2431_v47 = vpop.xlane.xlu2 %2430 }
 0x3b7   : > { %vm2501_vm7 = vcmp.gt.f32.partialorder %v2431_v47, 0.0  ;;  %2418 = vadd.xlane.f32.xlu0 %v2417_v1 }
 0x3b8   : > { %v2533_v27 = vsel %vm2501_vm7, %v2431_v47, 1.0  ;;  %vm2495_vm7 = vcmp.gt.f32.partialorder %v6425_v6, 0.0  ;;  %v6480_v47 = vsel %vm2496_vm11, %v2416_v46, 1.0  ;;  %v6741_v46 = vld [vmem:[%s5897_s30 + $0x78] sm:$0xff]  }
 0x3b9   : > { %5027 = vrcp.f32 %v2533_v27  ;;  %v2744_v43 = vand.u32 2147483648, %v2533_v27  ;;  %vm2738_vm6 = vweird.f32 %v2533_v27  ;;  %v2742_v22 = vand.u32 2147483647, %v2533_v27 }
 0x3ba   : > { %5029 = vpow2.f32 %v2325_v9  ;;  %v4811_v9 = vunpack.c.l.bf16 %v6374_v4 }
 0x3bb   : > { %v2745_v12 = vor.u32 1.1754944e-38, %v2744_v43 }
 0x3be   : > { %v3195_v35 = vpop.permute.xlu2 %3194  ;;  %v2434_v29 = vpop.xlane.xlu1 %2433 }
 0x3bf   : > { %v5028_v30 = vpop.eup %5027  ;;  %v3200_v33 = vsel %vm7710_vm5, %v3195_v35, 0  ;;  %vm2502_vm9 = vcmp.gt.f32.partialorder %v2434_v29, 0.0  ;;  %2421 = vadd.xlane.f32.xlu0 %v2420_v0  ;;  %vm2743_vm5 = vcmp.eq.f32.partialorder %v2742_v22, 8.507059e+37  ;;  %v6483_v35 = vsel %vm2495_vm7, %v6425_v6, 1.0 }
 0x3c0   : > { %v5030_v16 = vpop.eup %5029  ;;  %v2734_v7 = vmul.f32 %v5028_v30, %v2533_v27  ;;  %v2534_v55 = vsel %vm2502_vm9, %v2434_v29, 1.0  ;;  %3209 = vmatpush.bf16.msrb.mxu3 %v3200_v33  ;;  %vm2739_vm15 = vweird.f32 %v5028_v30 }
 0x3c1   : > { %5031 = vrcp.f32 %v2534_v55  ;;  %v6464_v20 = vsel %vm7711_vm10, %v5030_v16, 0.0  ;;  %vm2740_vm0 = vmor %vm2738_vm6, %vm2739_vm15  ;;  %v2759_v40 = vand.u32 2147483648, %v2534_v55  ;;  %v2757_v31 = vand.u32 2147483647, %v2534_v55 }
 0x3c2   : > { %v2735_v45 = vsub.f32 1.0, %v2734_v7  ;;  %3374 = vrot.lane.b32.xlu1 %v3373_v25, %s7607_s12  ;;  %v2435_v61 = vsel %vm2168_vm1, %v6464_v20, 0.0  ;;  %5033 = vrcp.f32 %v6480_v47  ;;  %vm2753_vm10 = vweird.f32 %v2534_v55  ;;  %v6505_v25 = vld [vmem:[%s5897_s30 + $0x58] sm:$0xff]  }
 0x3c3   : > { %vm6491_vm15 = vcmp.gt.f32.partialorder %v4811_v9, 0.0  ;;  %5035 = vrcp.f32 %v6483_v35  ;;  %v2292_v16 = vsub.f32 %v6246_v2, %v6448_v53  ;;  %v4800_v52 = vunpack.c.h.bf16 %v6505_v25 }
 0x3c4   : > { %v2736_v17 = vmul.f32 %v5028_v30, %v2735_v45 }
 0x3c5   : > { %vm6522_vm11 = vcmp.gt.f32.partialorder %v4800_v52, 0.0 }
 0x3c6   : > { %v2737_v15 = vadd.f32 %v5028_v30, %v2736_v17  ;;  %v3225_v10 = vpop.permute.xlu2 %3224 }
 0x3c7   : > { %v5032_v37 = vpop.eup %5031  ;;  %v3230_v19 = vsel %vm7714_vm13, %v3225_v10, 0  ;;  %2436 = vadd.xlane.f32.xlu0 %v2435_v61 }
 0x3c8   : > { %v2741_v8 = vsel %vm2740_vm0, %v5028_v30, %v2737_v15  ;;  %v2749_v24 = vmul.f32 %v5032_v37, %v2534_v55  ;;  %3239 = vmatpush.bf16.msrb.mxu0 %v3230_v19  ;;  %vm2754_vm9 = vweird.f32 %v5032_v37  ;;  %v2760_v30 = vor.u32 1.1754944e-38, %v2759_v40  ;;  %v6507_v45 = vpop.eup %5033 }
 0x3c9   : > { %v2746_v1 = vsel %vm2743_vm5, %v2745_v12, %v2741_v8  ;;  %vm2755_vm6 = vmor %vm2753_vm10, %vm2754_vm9  ;;  %vm2758_vm0 = vcmp.eq.f32.partialorder %v2757_v31, 8.507059e+37  ;;  %v2659_v61 = vmul.f32 %v6507_v45, %v6480_v47  ;;  %vm2648_vm5 = vweird.f32 %v6483_v35 }
 0x3ca   : > { %v2750_v28 = vsub.f32 1.0, %v2749_v24  ;;  %v2747_v29 = vmul.f32 %v2746_v1, %v6260_v48  ;;  %v6499_v48 = vsel %vm6491_vm15, %v6349_v54, -1e+30  ;;  %v2351_v54 = vmul.f32 1.442695, %v2292_v16 }
 0x3cb   : > { %v2253_v15 = vsel %vm2168_vm1, %v6499_v48, -inf  ;;  %v6533_v24 = vsel %vm6522_vm11, %v6340_v32, -1e+30  ;;  %v2660_v12 = vsub.f32 1.0, %v2659_v61  ;;  %v2669_v16 = vand.u32 2147483648, %v6480_v47 }
 0x3cc   : > { %v2751_v27 = vmul.f32 %v5032_v37, %v2750_v28  ;;  %v3045_v7 = vpack.c.bf16 %v2747_v29, %v2747_v29  ;;  %vm2664_vm10 = vweird.f32 %v6507_v45 }
 0x3cd   : > { %v2661_v29 = vmul.f32 %v6507_v45, %v2660_v12 }
 0x3ce   : > { %v2752_v0 = vadd.f32 %v5032_v37, %v2751_v27  ;;  %v6489_v4 = vpop.xlane.xlu1 %2451  ;;  %v6512_v22 = vunpack.c.l.b16 %v3045_v7 }
 0x3cf   : > { %2221 = vmax.xlane.f32.xlu0 %v2220_v18  ;;  %v2238_v18 = vsel %vm2168_vm1, %v6533_v24, -inf }
 0x3d0   : > { %v2756_v6 = vsel %vm2755_vm6, %v5032_v37, %v2752_v0 }
 0x3d1   : > { %v2761_v33 = vsel %vm2758_vm0, %v2760_v30, %v2756_v6  ;;  %v2652_v6 = vand.u32 2147483647, %v6483_v35 }
 0x3d2   : > { %v2762_v55 = vmul.f32 %v2761_v33, %v6266_v62  ;;  %v6518_v62 = vpop.eup %5035  ;;  %v2667_v33 = vand.u32 2147483647, %v6480_v47 }
 0x3d3   : > { %v2644_v8 = vmul.f32 %v6518_v62, %v6483_v35  ;;  %vm2649_vm0 = vweird.f32 %v6518_v62 }
 0x3d4   : > { %v3046_v17 = vpack.c.bf16 %v2762_v55, %v2762_v55  ;;  %v2401_v43 = vpop.xlane.xlu0 %2400 }
 0x3d5   : > { %vm2491_vm13 = vcmp.gt.f32.partialorder %v2401_v43, 0.0  ;;  %v2645_v1 = vsub.f32 1.0, %v2644_v8 }
 0x3d6   : > { %v6514_v10 = vunpack.c.l.b16 %v3046_v17  ;;  %v2523_v2 = vsel %vm2491_vm13, %v2401_v43, 1.0  ;;  %v6516_v53 = vpop.xlane.xlu1 %2185  ;;  %v2662_v17 = vadd.f32 %v6507_v45, %v2661_v29  ;;  %vm2663_vm13 = vweird.f32 %v6480_v47 }
 0x3d7   : > { %5037 = vrcp.f32 %v2523_v2  ;;  %2254 = vmax.xlane.f32.xlu0 %v2253_v15  ;;  %v2646_v7 = vmul.f32 %v6518_v62, %v2645_v1  ;;  %v2594_v43 = vand.u32 2147483648, %v2523_v2  ;;  %vm2588_vm6 = vweird.f32 %v2523_v2 }
 0x3d8   : > { %v3250_v19 = vpack.c.b16 %v6514_v10, %v6512_v22  ;;  %5039 = vpow2.f32 %v2351_v54  ;;  %v2592_v54 = vand.u32 2147483647, %v2523_v2  ;;  %v2654_v47 = vand.u32 2147483648, %v6483_v35 }
 0x3d9   : > { %v2647_v1 = vadd.f32 %v6518_v62, %v2646_v7  ;;  %v2670_v29 = vor.u32 1.1754944e-38, %v2669_v16 }
 0x3da   : > { %v2655_v35 = vor.u32 1.1754944e-38, %v2654_v47 }
 0x3dc   : > { %v2404_v28 = vpop.xlane.xlu0 %2403 }
 0x3dd   : > { %v5038_v9 = vpop.eup %5037  ;;  %vm2492_vm7 = vcmp.gt.f32.partialorder %v2404_v28, 0.0 }
 0x3de   : > { %v2584_v40 = vmul.f32 %v5038_v9, %v2523_v2  ;;  %v6535_v27 = vsel %vm2492_vm7, %v2404_v28, 1.0  ;;  %v2201_v31 = vpop.xlane.xlu1 %2200  ;;  %v5040_v0 = vpop.eup %5039  ;;  %vm2589_vm9 = vweird.f32 %v5038_v9  ;;  %v2270_v28 = vsub.f32 %v6294_v34, %v6516_v53 }
 0x3df   : > { %5041 = vrcp.f32 %v6535_v27  ;;  %2239 = vmax.xlane.f32.xlu0 %v2238_v18  ;;  %v2275_v30 = vsub.f32 %v6313_v14, %v2201_v31  ;;  %v6551_v14 = vsel %vm6236_vm3, %v5040_v0, 0.0  ;;  %vm6555_vm7 = vmor %vm2588_vm6, %vm2589_vm9  ;;  %vm6575_vm9 = vcmp.eq.f32.partialorder %v2667_v33, 8.507059e+37 }
 0x3e0   : > { %v2585_v32 = vsub.f32 1.0, %v2584_v40  ;;  %v2474_v31 = vsel %vm2168_vm1, %v6551_v14, 0.0  ;;  %vm6571_vm3 = vmor %vm2663_vm13, %vm2664_vm10  ;;  %vm2593_vm6 = vcmp.eq.f32.partialorder %v2592_v54, 8.507059e+37  ;;  %v2307_v33 = vmul.f32 1.442695, %v2270_v28 }
 0x3e1   : > { %v2317_v52 = vmul.f32 1.442695, %v2275_v30  ;;  %vm6586_vm10 = vmor %vm2648_vm5, %vm2649_vm0  ;;  %v2609_v7 = vand.u32 2147483648, %v6535_v27  ;;  %vm2603_vm5 = vweird.f32 %v6535_v27 }
 0x3e2   : > { %v2586_v55 = vmul.f32 %v5038_v9, %v2585_v32 }
 0x3e3   : > { %5043 = vpow2.f32 %v2317_v52  ;;  %v2607_v52 = vand.u32 2147483647, %v6535_v27 }
 0x3e4   : > { %v2587_v15 = vadd.f32 %v5038_v9, %v2586_v55  ;;  %v2183_v61 = vpop.xlane.xlu0 %2182 }
 0x3e5   : > { %v5042_v8 = vpop.eup %5041  ;;  %v2269_v49 = vsub.f32 %v6332_v21, %v2183_v61  ;;  %v2595_v21 = vor.u32 1.1754944e-38, %v2594_v43 }
 0x3e6   : > { %v2591_v2 = vsel %vm6555_vm7, %v5038_v9, %v2587_v15  ;;  %v2599_v40 = vmul.f32 %v5042_v8, %v6535_v27  ;;  %v2666_v9 = vsel %vm6571_vm3, %v6507_v45, %v2662_v17  ;;  %v2651_v45 = vsel %vm6586_vm10, %v6518_v62, %v2647_v1 }
 0x3e7   : > { %v2305_v53 = vmul.f32 1.442695, %v2269_v49  ;;  %2475 = vadd.xlane.f32.xlu0 %v2474_v31  ;;  %v2596_v30 = vsel %vm2593_vm6, %v2595_v21, %v2591_v2  ;;  %vm2604_vm13 = vweird.f32 %v5042_v8  ;;  %vm2653_vm7 = vcmp.eq.f32.partialorder %v2652_v6, 8.507059e+37 }
 0x3e8   : > { %v2600_v0 = vsub.f32 1.0, %v2599_v40  ;;  %v2671_v17 = vsel %vm6575_vm9, %v2670_v29, %v2666_v9  ;;  %v2597_v15 = vmul.f32 %v2596_v30, %v6298_v57  ;;  %v2656_v61 = vsel %vm2653_vm7, %v2655_v35, %v2651_v45  ;;  %vm2605_vm0 = vmor %vm2603_vm5, %vm2604_vm13 }
 0x3e9   : > { %5045 = vpow2.f32 %v2305_v53  ;;  %v5044_v55 = vpop.eup %5043  ;;  %v2610_v6 = vor.u32 1.1754944e-38, %v2609_v7  ;;  %v2672_v12 = vmul.f32 %v2671_v17, %v6242_v63  ;;  %vm2608_vm3 = vcmp.eq.f32.partialorder %v2607_v52, 8.507059e+37 }
 0x3ea   : > { %v2601_v16 = vmul.f32 %v5042_v8, %v2600_v0  ;;  %v6599_v43 = vsel %vm6305_vm8, %v5044_v55, 0.0  ;;  %5047 = vpow2.f32 %v2307_v33  ;;  %v2657_v1 = vmul.f32 %v2656_v61, %v6224_v38 }
 0x3eb   : > { %v2423_v62 = vsel %vm2168_vm1, %v6599_v43, 0.0  ;;  %v3035_v57 = vpack.c.bf16 %v2597_v15, %v2597_v15  ;;  %v3040_v31 = vpack.c.bf16 %v2672_v12, %v2672_v12  ;;  %vm7727_vm8 = vcmask 1043456  }
 0x3ec   : > { %v2602_v54 = vadd.f32 %v5042_v8, %v2601_v16  ;;  %2424 = vadd.xlane.f32.xlu1 %v2423_v62 }
 0x3ed   : > { %v3098_v18 = vunpack.c.l.b16 %v3035_v57  ;;  %v3159_v21 = vunpack.c.l.b16 %v3040_v31 }
 0x3ee   : > { %v2606_v28 = vsel %vm2605_vm0, %v5042_v8, %v2602_v54  ;;  %v3039_v8 = vpack.c.bf16 %v2657_v1, %v2657_v1  ;;  %v3252_v54 = vunpack.c.l.b16 %v5767_v3 }
 0x3ef   : > { %v5046_v36 = vpop.eup %5045  ;;  %v2611_v49 = vsel %vm2608_vm3, %v2610_v6, %v2606_v28  ;;  %v7730_v28 = vld [vmem:[#allocation52_spill] sm:$0xff] }
 0x3f0   : > { %v2612_v2 = vmul.f32 %v2611_v49, %v6317_v23  ;;  %v6610_v27 = vsel %vm6323_vm12, %v5046_v36, 0.0  ;;  %v5048_v63 = vpop.eup %5047  ;;  %v3158_v42 = vunpack.c.l.b16 %v3039_v8  ;;  %v3253_v61 = vpack.c.b16 %v3252_v54, %v3252_v54 }
 0x3f1   : > { %v2405_v40 = vsel %vm2168_vm1, %v6610_v27, 0.0  ;;  %v6616_v38 = vsel %vm6285_vm4, %v5048_v63, 0.0  ;;  %vm2508_vm4 = vcmp.gt.f32.partialorder %v6489_v4, 0.0 }
 0x3f2   : > { %v3036_v47 = vpack.c.bf16 %v2612_v2, %v2612_v2  ;;  %2406 = vadd.xlane.f32.xlu2 %v2405_v40  ;;  %v2408_v29 = vsel %vm2168_vm1, %v6616_v38, 0.0  ;;  %v3160_v0 = vpack.c.b16 %v3159_v21, %v3158_v42  ;;  %v2540_v12 = vsel %vm2508_vm4, %v6489_v4, 1.0 }
 0x3f3   : > { %v2849_v21 = vand.u32 2147483648, %v2540_v12  ;;  %vm2843_vm7 = vweird.f32 %v2540_v12 }
 0x3f4   : > { %v3099_v34 = vunpack.c.l.b16 %v3036_v47  ;;  %v7732_v47 = vld [vmem:[#allocation18_spill] sm:$0xff] }
 0x3f5   : > { %v3282_v63 = vunpack.c.l.b16 %v7732_v47 }
 0x3f6   : > { %v3100_v53 = vpack.c.b16 %v3099_v34, %v3098_v18 }
 0x3f7   : > { %v3165_v23 = vpop.permute.xlu0 %3164  ;;  %v3283_v42 = vpack.c.b16 %v3282_v63, %v3282_v63 }
 0x3f8   : > { %v3170_v9 = vsel %vm7727_vm8, %v3165_v23, 0  ;;  %4626 = vmatmul.msk.bf16.vlgmr.msra.gmra.mxu3 %vm2168_vm1, %v3100_v53  ;;  %v2847_v53 = vand.u32 2147483647, %v2540_v12 }
 0x3f9   : > { %3179 = vmatpush.bf16.msrb.mxu2 %v3170_v9 }
 0x3fa   : > { %2409 = vadd.xlane.f32.xlu2 %v2408_v29  ;;  %vm2848_vm0 = vcmp.eq.f32.partialorder %v2847_v53, 8.507059e+37 }
 0x3fc   : > { %v2440_v32 = vpop.xlane.xlu1 %2439  ;;  %4628 = vmatmul.msk.bf16.vlgmr.msrb.gmra.mxu2 %vm2168_vm1, %v3160_v0 }
 0x3fd   : > { %vm2504_vm9 = vcmp.gt.f32.partialorder %v2440_v32, 0.0 }
 0x3fe   : > { %v6648_v31 = vsel %vm2504_vm9, %v2440_v32, 1.0 }
 0x3ff   : > { %v2204_v30 = vpop.xlane.xlu2 %2203 }
 0x400   : > { %v2276_v41 = vsub.f32 %v6371_v56, %v2204_v30  ;;  %v4799_v30 = vunpack.c.l.bf16 %v6505_v25 }
 0x402   : > { %v2319_v33 = vmul.f32 1.442695, %v2276_v41  ;;  %v2850_v41 = vor.u32 1.1754944e-38, %v2849_v21  ;;  %vm6658_vm4 = vcmp.gt.f32.partialorder %v4799_v30, 0.0 }
 0x404   : > { %5049 = vpow2.f32 %v2319_v33  ;;  %v2219_v7 = vpop.xlane.xlu1 %2218 }
 0x405   : > { %v2281_v55 = vsub.f32 %v6389_v26, %v2219_v7  ;;  %v7728_v26 = vld [vmem:[#allocation51_spill] sm:$0xff] }
 0x406   : > { %vm7729_vm12 = vnez %v7728_v26  ;;  %v7735_v26 = vld [vmem:[#allocation48_spill] sm:$0xff] }
 0x407   : > { %v2329_v45 = vmul.f32 1.442695, %v2281_v55  ;;  %v2258_v16 = vpop.xlane.xlu2 %2257 }
 0x408   : > { %v2294_v52 = vsub.f32 %v6397_v51, %v2258_v16 }
 0x409   : > { %5051 = vpow2.f32 %v2329_v45 }
 0x40a   : > { %v5050_v35 = vpop.eup %5049  ;;  %v2355_v17 = vmul.f32 1.442695, %v2294_v52 }
 0x40b   : > { %v6628_v15 = vsel %vm6357_vm14, %v5050_v35, 0.0  ;;  %vm7731_vm14 = vnez %v7730_v28  ;;  %v7736_v28 = vld [vmem:[#allocation49_spill] sm:$0xff] }
 0x40c   : > { %5053 = vpow2.f32 %v2355_v17  ;;  %v2426_v56 = vsel %vm2168_vm1, %v6628_v15, 0.0 }
 0x40d   : > { %2427 = vadd.xlane.f32.xlu1 %v2426_v56  ;;  %5055 = vrcp.f32 %v2540_v12 }
 0x40f   : > { %v5052_v62 = vpop.eup %5051 }
 0x410   : > { %v6636_v51 = vsel %vm7729_vm12, %v5052_v62, 0.0 }
 0x411   : > { %v2441_v59 = vsel %vm2168_vm1, %v6636_v51, 0.0 }
 0x412   : > { %v5054_v6 = vpop.eup %5053  ;;  %2442 = vadd.xlane.f32.xlu0 %v2441_v59  ;;  %3254 = vrot.lane.b32.xlu2 %v3253_v61, %s7607_s12 }
 0x413   : > { %v6644_v3 = vsel %vm7731_vm14, %v5054_v6, 0.0  ;;  %v5056_v49 = vpop.eup %5055 }
 0x414   : > { %v2480_v36 = vsel %vm2168_vm1, %v6644_v3, 0.0  ;;  %v2839_v1 = vmul.f32 %v5056_v49, %v2540_v12  ;;  %vm2844_vm10 = vweird.f32 %v5056_v49 }
 0x415   : > { %2481 = vadd.xlane.f32.xlu1 %v2480_v36  ;;  %vm2845_vm5 = vmor %vm2843_vm7, %vm2844_vm10  ;;  %v6666_v36 = vsel %vm6658_vm4, %v7736_v28, -1e+30 }
 0x416   : > { %v2840_v57 = vsub.f32 1.0, %v2839_v1 }
 0x418   : > { %v2841_v4 = vmul.f32 %v5056_v49, %v2840_v57 }
 0x41a   : > { %v2842_v8 = vadd.f32 %v5056_v49, %v2841_v4 }
 0x41c   : > { %v2846_v29 = vsel %vm2845_vm5, %v5056_v49, %v2842_v8 }
 0x41d   : > { %v2851_v45 = vsel %vm2848_vm0, %v2850_v41, %v2846_v29 }
 0x41e   : > { %v2852_v61 = vmul.f32 %v2851_v45, %v7735_v26 }
 0x420   : > { %v3052_v57 = vpack.c.bf16 %v2852_v61, %v2852_v61 }
 0x422   : > { %v2449_v2 = vpop.xlane.xlu0 %2448 }
 0x423   : > { %vm2507_vm6 = vcmp.gt.f32.partialorder %v2449_v2, 0.0 }
 0x424   : > { %v2539_v40 = vsel %vm2507_vm6, %v2449_v2, 1.0 }
 0x425   : > { %5057 = vrcp.f32 %v2539_v40  ;;  %v2834_v33 = vand.u32 2147483648, %v2539_v40  ;;  %v2832_v55 = vand.u32 2147483647, %v2539_v40  ;;  %vm2828_vm8 = vweird.f32 %v2539_v40 }
 0x426   : > { %5059 = vrcp.f32 %v6648_v31 }
 0x427   : > { %v2835_v56 = vor.u32 1.1754944e-38, %v2834_v33  ;;  %vm2833_vm9 = vcmp.eq.f32.partialorder %v2832_v55, 8.507059e+37  ;;  %v2789_v55 = vand.u32 2147483648, %v6648_v31 }
 0x42a   : > { %v2419_v18 = vpop.xlane.xlu0 %2418 }
 0x42b   : > { %v5058_v34 = vpop.eup %5057  ;;  %vm2497_vm13 = vcmp.gt.f32.partialorder %v2419_v18, 0.0 }
 0x42c   : > { %v2824_v23 = vmul.f32 %v5058_v34, %v2539_v40  ;;  %v2529_v9 = vsel %vm2497_vm13, %v2419_v18, 1.0  ;;  %v6653_v32 = vpop.eup %5059  ;;  %vm2829_vm3 = vweird.f32 %v5058_v34  ;;  %v2235_v18 = vsel %vm2168_vm1, %v6666_v36, -inf }
 0x42d   : > { %5061 = vrcp.f32 %v2529_v9  ;;  %v2779_v16 = vmul.f32 %v6653_v32, %v6648_v31  ;;  %vm2830_vm12 = vmor %vm2828_vm8, %vm2829_vm3  ;;  %v2684_v40 = vand.u32 2147483648, %v2529_v9  ;;  %v2682_v63 = vand.u32 2147483647, %v2529_v9 }
 0x42e   : > { %v2825_v0 = vsub.f32 1.0, %v2824_v23  ;;  %3284 = vrot.lane.b32.xlu1 %v3283_v42, %s7607_s12  ;;  %vm2678_vm10 = vweird.f32 %v2529_v9  ;;  %v6674_v42 = vunpack.c.l.b16 %v3052_v57  ;;  %vm2784_vm0 = vweird.f32 %v6653_v32 }
 0x42f   : > { %v2780_v12 = vsub.f32 1.0, %v2779_v16  ;;  %vm2683_vm5 = vcmp.eq.f32.partialorder %v2682_v63, 8.507059e+37  ;;  %vm2783_vm8 = vweird.f32 %v6648_v31  ;;  %v7739_v63 = vld [vmem:[#allocation50_spill] sm:$0xff] }
 0x430   : > { %v2826_v7 = vmul.f32 %v5058_v34, %v2825_v0  ;;  %v2685_v0 = vor.u32 1.1754944e-38, %v2684_v40 }
 0x431   : > { %v2781_v47 = vmul.f32 %v6653_v32, %v2780_v12  ;;  %v2790_v12 = vor.u32 1.1754944e-38, %v2789_v55  ;;  %v2050_v55 = vpop.f32.mrf.mxu0 }
 0x432   : > { %v2827_v52 = vadd.f32 %v5058_v34, %v2826_v7  ;;  %v2422_v35 = vpop.xlane.xlu0 %2421 }
 0x433   : > { %vm2498_vm14 = vcmp.gt.f32.partialorder %v2422_v35, 0.0  ;;  %v5062_v25 = vpop.eup %5061  ;;  %v2782_v33 = vadd.f32 %v6653_v32, %v2781_v47 }
 0x434   : > { %v2831_v54 = vsel %vm2830_vm12, %v5058_v34, %v2827_v52  ;;  %v2530_v62 = vsel %vm2498_vm14, %v2422_v35, 1.0  ;;  %v2674_v6 = vmul.f32 %v5062_v25, %v2529_v9  ;;  %vm2679_vm6 = vweird.f32 %v5062_v25  ;;  %vm6683_vm12 = vmor %vm2783_vm8, %vm2784_vm0 }
 0x435   : > { %v2836_v59 = vsel %vm2833_vm9, %v2835_v56, %v2831_v54  ;;  %5063 = vrcp.f32 %v2530_v62  ;;  %vm2680_vm7 = vmor %vm2678_vm10, %vm2679_vm6  ;;  %v2699_v7 = vand.u32 2147483648, %v2530_v62  ;;  %v2697_v16 = vand.u32 2147483647, %v2530_v62 }
 0x436   : > { %v2675_v49 = vsub.f32 1.0, %v2674_v6  ;;  %v2837_v1 = vmul.f32 %v2836_v59, %v6438_v60  ;;  %v2787_v52 = vand.u32 2147483647, %v6648_v31  ;;  %vm2693_vm14 = vweird.f32 %v2530_v62  ;;  %v6692_v31 = vpop.xlane.xlu1 %2454 }
 0x437   : > { %v2786_v61 = vsel %vm6683_vm12, %v6653_v32, %v2782_v33  ;;  %v2700_v59 = vor.u32 1.1754944e-38, %v2699_v7  ;;  %vm2698_vm6 = vcmp.eq.f32.partialorder %v2697_v16, 8.507059e+37  ;;  %vm2509_vm8 = vcmp.gt.f32.partialorder %v6692_v31, 0.0 }
 0x438   : > { %v2676_v2 = vmul.f32 %v5062_v25, %v2675_v49  ;;  %v3051_v4 = vpack.c.bf16 %v2837_v1, %v2837_v1  ;;  %vm2788_vm10 = vcmp.eq.f32.partialorder %v2787_v52, 8.507059e+37  ;;  %v7740_v52 = vld [vmem:[#allocation26_spill] sm:$0xff] }
 0x439   : > { %v2791_v1 = vsel %vm2788_vm10, %v2790_v12, %v2786_v61  ;;  %v3492_v35 = vunpack.c.l.b16 %v7740_v52 }
 0x43a   : > { %v2437_v8 = vpop.xlane.xlu0 %2436  ;;  %v2677_v21 = vadd.f32 %v5062_v25, %v2676_v2  ;;  %v6672_v53 = vunpack.c.l.b16 %v3051_v4 }
 0x43b   : > { %v5064_v34 = vpop.eup %5063  ;;  %vm2503_vm13 = vcmp.gt.f32.partialorder %v2437_v8, 0.0  ;;  %2236 = vmax.xlane.f32.xlu2 %v2235_v18  ;;  %v6697_v18 = vld [vmem:[%s5897_s30 + $0x60] sm:$0xff]   ;;  %s4389_s30 = sshll.u32 %s7164_s29, 5 }
 0x43c   : > { %v2689_v60 = vmul.f32 %v5064_v34, %v2530_v62  ;;  %v2535_v23 = vsel %vm2503_vm13, %v2437_v8, 1.0  ;;  %v2681_v29 = vsel %vm2680_vm7, %v5062_v25, %v2677_v21  ;;  %v3340_v41 = vpack.c.b16 %v6674_v42, %v6672_v53  ;;  %s7196_s16 = scalar_lea.vmem [#allocation2], %s4389_s30 }
 0x43d   : > { %5065 = vrcp.f32 %v2535_v23  ;;  %v2686_v9 = vsel %vm2683_vm5, %v2685_v0, %v2681_v29  ;;  %vm2694_vm3 = vweird.f32 %v5064_v34  ;;  %v2774_v32 = vand.u32 2147483648, %v2535_v23 }
 0x43e   : > { %v2690_v30 = vsub.f32 1.0, %v2689_v60  ;;  %v2687_v56 = vmul.f32 %v2686_v9, %v6446_v39  ;;  %vm2695_vm9 = vmor %vm2693_vm14, %vm2694_vm3  ;;  %v2792_v8 = vmul.f32 %v2791_v1, %v7739_v63  ;;  %vm2768_vm7 = vweird.f32 %v2535_v23  ;;  %v7743_v1 = vld [vmem:[#allocation23_spill] sm:$0xff] }
 0x43f   : > { %v2775_v0 = vor.u32 1.1754944e-38, %v2774_v32  ;;  %v4803_v7 = vunpack.c.l.bf16 %v6697_v18  ;;  %v6747_v63 = vsel %vm2509_vm8, %v6692_v31, 1.0  ;;  %vm7752_vm8 = vcmask 1043456   ;;  %v3091_v31 = vpop.f32.mrf.mxu2 }
 0x440   : > { %v2691_v45 = vmul.f32 %v5064_v34, %v2690_v30  ;;  %v3041_v57 = vpack.c.bf16 %v2687_v56, %v2687_v56  ;;  %v3048_v56 = vpack.c.bf16 %v2792_v8, %v2792_v8 }
 0x441   : > { %vm6710_vm3 = vcmp.gt.f32.partialorder %v4803_v7, 0.0 }
 0x442   : > { %v2692_v25 = vadd.f32 %v5064_v34, %v2691_v45  ;;  %v2222_v54 = vpop.xlane.xlu0 %2221 }
 0x443   : > { %v5066_v26 = vpop.eup %5065  ;;  %v2282_v6 = vsub.f32 %v6476_v13, %v2222_v54  ;;  %v2772_v13 = vand.u32 2147483647, %v2535_v23 }
 0x444   : > { %v2696_v28 = vsel %vm2695_vm9, %v5064_v34, %v2692_v25  ;;  %v2764_v49 = vmul.f32 %v5066_v26, %v2535_v23  ;;  %vm2769_vm13 = vweird.f32 %v5066_v26  ;;  %v3188_v34 = vunpack.c.l.b16 %v3041_v57  ;;  %v2458_v25 = vpop.xlane.xlu1 %2457 }
 0x445   : > { %v2701_v39 = vsel %vm2698_vm6, %v2700_v59, %v2696_v28  ;;  %v2331_v62 = vmul.f32 1.442695, %v2282_v6  ;;  %vm2770_vm5 = vmor %vm2768_vm7, %vm2769_vm13  ;;  %vm2773_vm0 = vcmp.eq.f32.partialorder %v2772_v13, 8.507059e+37  ;;  %v3493_v59 = vpack.c.b16 %v3492_v35, %v3492_v35 }
 0x446   : > { %v2702_v2 = vmul.f32 %v2701_v39, %v6454_v50  ;;  %v2765_v40 = vsub.f32 1.0, %v2764_v49  ;;  %v6714_v6 = vunpack.c.l.b16 %v3048_v56  ;;  %v6722_v28 = vsel %vm6710_vm3, %v2050_v55, -1e+30 }
 0x447   : > { %5067 = vpow2.f32 %v2331_v62  ;;  %v3462_v57 = vunpack.c.l.b16 %v7743_v1  ;;  %v2241_v32 = vsel %vm2168_vm1, %v6722_v28, -inf }
 0x448   : > { %v3042_v4 = vpack.c.bf16 %v2702_v2, %v2702_v2  ;;  %v2766_v47 = vmul.f32 %v5066_v26, %v2765_v40  ;;  %v6731_v40 = vpop.f32.mrf.mxu0 }
 0x44a   : > { %v3189_v21 = vunpack.c.l.b16 %v3042_v4  ;;  %v2767_v60 = vadd.f32 %v5066_v26, %v2766_v47  ;;  %v2255_v29 = vpop.xlane.xlu0 %2254  ;;  %v3463_v47 = vpack.c.b16 %v3462_v57, %v3462_v57 }
 0x44b   : > { %v2293_v50 = vsub.f32 %v6499_v48, %v2255_v29 }
 0x44c   : > { %v3190_v30 = vpack.c.b16 %v3189_v21, %v3188_v34  ;;  %v2771_v33 = vsel %vm2770_vm5, %v5066_v26, %v2767_v60  ;;  %v6737_v4 = vpop.xlane.xlu1 %2472  ;;  %v4815_v34 = vunpack.c.l.bf16 %v6741_v46  ;;  %v7744_v21 = vld [vmem:[#allocation20_spill] sm:$0xff] }
 0x44d   : > { %v5068_v9 = vpop.eup %5067  ;;  %v2776_v45 = vsel %vm2773_vm0, %v2775_v0, %v2771_v33  ;;  %v2353_v16 = vmul.f32 1.442695, %v2293_v50  ;;  %v3312_v60 = vunpack.c.l.b16 %v7744_v21  ;;  %vm2858_vm0 = vweird.f32 %v6747_v63 }
 0x44e   : > { %v2777_v23 = vmul.f32 %v2776_v45, %v6464_v20  ;;  %4629 = vmatmul.msk.bf16.vlgmr.msrb.gmra.mxu3 %vm2168_vm1, %v3190_v30  ;;  %v6706_v48 = vsel %vm6468_vm2, %v5068_v9, 0.0  ;;  %vm2510_vm2 = vcmp.gt.f32.partialorder %v2458_v25, 0.0 }
 0x44f   : > { %5069 = vpow2.f32 %v2353_v16  ;;  %v2444_v54 = vsel %vm2168_vm1, %v6706_v48, 0.0  ;;  %v6743_v13 = vsel %vm2510_vm2, %v2458_v25, 1.0  ;;  %v3313_v33 = vpack.c.b16 %v3312_v60, %v3312_v60  ;;  %v7747_v16 = vld [vmem:[#allocation8_spill] sm:$0xff] }
 0x450   : > { %v3047_v26 = vpack.c.bf16 %v2777_v23, %v2777_v23  ;;  %2445 = vadd.xlane.f32.xlu0 %v2444_v54  ;;  %v2131_v30 = vpop.f32.mrf.mxu0  ;;  %v3342_v52 = vunpack.c.l.b16 %v7747_v16  ;;  %vm2873_vm13 = vweird.f32 %v6743_v13  ;;  %v2877_v60 = vand.u32 2147483647, %v6743_v13 }
 0x452   : > { %v6716_v20 = vunpack.c.l.b16 %v3047_v26  ;;  %v2240_v12 = vpop.xlane.xlu0 %2239  ;;  %v3343_v26 = vpack.c.b16 %v3342_v52, %v3342_v52 }
 0x453   : > { %v2288_v11 = vsub.f32 %v6533_v24, %v2240_v12  ;;  %3494 = vrot.lane.b32.xlu2 %v3493_v59, %s7607_s12 }
 0x454   : > { %v3280_v49 = vpack.c.b16 %v6714_v6, %v6716_v20  ;;  %v3375_v50 = vpop.permute.xlu1 %3374 }
 0x455   : > { %v5070_v39 = vpop.eup %5069  ;;  %v2343_v62 = vmul.f32 1.442695, %v2288_v11 }
 0x456   : > { %v6729_v2 = vsel %vm6491_vm15, %v5070_v39, 0.0  ;;  %vm6759_vm15 = vcmp.gt.f32.partialorder %v4815_v34, 0.0 }
 0x457   : > { %5071 = vpow2.f32 %v2343_v62  ;;  %v2477_v24 = vsel %vm2168_vm1, %v6729_v2, 0.0  ;;  %v6768_v37 = vsel %vm6759_vm15, %v2131_v30, -1e+30  ;;  %v2864_v30 = vand.u32 2147483648, %v6747_v63 }
 0x458   : > { %2478 = vadd.xlane.f32.xlu0 %v2477_v24  ;;  %2242 = vmax.xlane.f32.xlu1 %v2241_v32  ;;  %5073 = vrcp.f32 %v6743_v13  ;;  %v2259_v56 = vsel %vm2168_vm1, %v6768_v37, -inf }
 0x459   : > { %5075 = vrcp.f32 %v6747_v63 }
 0x45b   : > { %3464 = vrot.lane.b32.xlu2 %v3463_v47, %s7607_s12 }
 0x45d   : > { %v5072_v8 = vpop.eup %5071 }
 0x45e   : > { %v6754_v29 = vsel %vm6522_vm11, %v5072_v8, 0.0  ;;  %v6763_v9 = vpop.eup %5073  ;;  %v2879_v8 = vand.u32 2147483648, %v6743_v13 }
 0x45f   : > { %v2462_v0 = vsel %vm2168_vm1, %v6754_v29, 0.0  ;;  %v6770_v7 = vpop.eup %5075  ;;  %v2869_v45 = vmul.f32 %v6763_v9, %v6743_v13  ;;  %v2425_v23 = vpop.xlane.xlu1 %2424  ;;  %vm2874_vm9 = vweird.f32 %v6763_v9 }
 0x460   : > { %2463 = vadd.xlane.f32.xlu1 %v2462_v0  ;;  %v2854_v25 = vmul.f32 %v6770_v7, %v6747_v63  ;;  %vm2499_vm12 = vcmp.gt.f32.partialorder %v2425_v23, 0.0  ;;  %vm2859_vm6 = vweird.f32 %v6770_v7  ;;  %vm6793_vm7 = vmor %vm2873_vm13, %vm2874_vm9 }
 0x461   : > { %v2870_v54 = vsub.f32 1.0, %v2869_v45  ;;  %v6781_v62 = vsel %vm2499_vm12, %v2425_v23, 1.0  ;;  %vm7755_vm12 = vmmov %vm7752_vm8 }
 0x462   : > { %v2855_v59 = vsub.f32 1.0, %v2854_v25 }
 0x463   : > { %3314 = vrot.lane.b32.xlu2 %v3313_v33, %s7607_s12  ;;  %v2871_v39 = vmul.f32 %v6763_v9, %v2870_v54 }
 0x464   : > { %v2856_v24 = vmul.f32 %v6770_v7, %v2855_v59 }
 0x465   : > { %v2407_v55 = vpop.xlane.xlu2 %2406  ;;  %v2872_v47 = vadd.f32 %v6763_v9, %v2871_v39 }
 0x466   : > { %vm2493_vm11 = vcmp.gt.f32.partialorder %v2407_v55, 0.0  ;;  %v2857_v21 = vadd.f32 %v6770_v7, %v2856_v24 }
 0x467   : > { %v2525_v35 = vsel %vm2493_vm11, %v2407_v55, 1.0  ;;  %v2876_v13 = vsel %vm6793_vm7, %v6763_v9, %v2872_v47  ;;  %vm6812_vm11 = vmor %vm2858_vm0, %vm2859_vm6 }
 0x468   : > { %5077 = vrcp.f32 %v2525_v35  ;;  %2260 = vmax.xlane.f32.xlu1 %v2259_v56  ;;  %v2624_v0 = vand.u32 2147483648, %v2525_v35  ;;  %vm2618_vm5 = vweird.f32 %v2525_v35  ;;  %v2622_v45 = vand.u32 2147483647, %v2525_v35 }
 0x469   : > { %v2862_v56 = vand.u32 2147483647, %v6747_v63  ;;  %v2880_v63 = vor.u32 1.1754944e-38, %v2879_v8 }
 0x46a   : > { %v2625_v39 = vor.u32 1.1754944e-38, %v2624_v0  ;;  %vm2623_vm9 = vcmp.eq.f32.partialorder %v2622_v45, 8.507059e+37 }
 0x46b   : > { %vm2863_vm6 = vcmp.eq.f32.partialorder %v2862_v56, 8.507059e+37 }
 0x46c   : > { %3344 = vrot.lane.b32.xlu0 %v3343_v26, %s7607_s12  ;;  %v3380_v26 = vsel %vm7755_vm12, %v3375_v50, 0 }
 0x46d   : > { %v2410_v12 = vpop.xlane.xlu2 %2409 }
 0x46e   : > { %v5078_v11 = vpop.eup %5077  ;;  %vm2494_vm14 = vcmp.gt.f32.partialorder %v2410_v12, 0.0 }
 0x46f   : > { %v2614_v1 = vmul.f32 %v5078_v11, %v2525_v35  ;;  %v2526_v57 = vsel %vm2494_vm14, %v2410_v12, 1.0  ;;  %vm2619_vm10 = vweird.f32 %v5078_v11  ;;  %v2861_v12 = vsel %vm6812_vm11, %v6770_v7, %v2857_v21 }
 0x470   : > { %5079 = vrcp.f32 %v2526_v57  ;;  %vm6803_vm2 = vmor %vm2618_vm5, %vm2619_vm10  ;;  %vm2878_vm14 = vcmp.eq.f32.partialorder %v2877_v60, 8.507059e+37  ;;  %v2639_v8 = vand.u32 2147483648, %v2526_v57  ;;  %vm2633_vm13 = vweird.f32 %v2526_v57 }
 0x471   : > { %5081 = vrcp.f32 %v6781_v62  ;;  %v2615_v32 = vsub.f32 1.0, %v2614_v1  ;;  %v2865_v1 = vor.u32 1.1754944e-38, %v2864_v30  ;;  %v2881_v24 = vsel %vm2878_vm14, %v2880_v63, %v2876_v13 }
 0x472   : > { %v2882_v21 = vmul.f32 %v2881_v24, %v6418_v44  ;;  %v2714_v63 = vand.u32 2147483648, %v6781_v62  ;;  %v4804_v24 = vunpack.c.h.bf16 %v6697_v18 }
 0x473   : > { %v2616_v34 = vmul.f32 %v5078_v11, %v2615_v32 }
 0x474   : > { %v3054_v22 = vpack.c.bf16 %v2882_v21, %v2882_v21 }
 0x475   : > { %v2617_v55 = vadd.f32 %v5078_v11, %v2616_v34  ;;  %v3255_v16 = vpop.permute.xlu2 %3254  ;;  %v2637_v34 = vand.u32 2147483647, %v2526_v57 }
 0x476   : > { %v5080_v52 = vpop.eup %5079  ;;  %v3260_v23 = vsel %vm7752_vm8, %v3255_v16, 0  ;;  %vm2708_vm8 = vweird.f32 %v6781_v62 }
 0x477   : > { %v6808_v54 = vpop.eup %5081  ;;  %v2621_v9 = vsel %vm6803_vm2, %v5078_v11, %v2617_v55  ;;  %v2629_v59 = vmul.f32 %v5080_v52, %v2526_v57  ;;  %3269 = vmatpush.bf16.msra.mxu2 %v3260_v23  ;;  %v2866_v11 = vsel %vm2863_vm6, %v2865_v1, %v2861_v12  ;;  %vm2634_vm10 = vweird.f32 %v5080_v52 }
 0x478   : > { %v2704_v50 = vmul.f32 %v6808_v54, %v6781_v62  ;;  %v2626_v47 = vsel %vm2623_vm9, %v2625_v39, %v2621_v9  ;;  %v2867_v30 = vmul.f32 %v2866_v11, %v6409_v5  ;;  %vm2635_vm7 = vmor %vm2633_vm13, %vm2634_vm10  ;;  %v2640_v55 = vor.u32 1.1754944e-38, %v2639_v8 }
 0x479   : > { %v2630_v32 = vsub.f32 1.0, %v2629_v59  ;;  %v2627_v60 = vmul.f32 %v2626_v47, %v6610_v27  ;;  %vm2638_vm5 = vcmp.eq.f32.partialorder %v2637_v34, 8.507059e+37  ;;  %v3369_v57 = vunpack.c.l.b16 %v3054_v22  ;;  %v7788_v22 = vld [vmem:[#allocation16_spill] sm:$0xff] }
 0x47a   : > { %4631 = vmatmul.msk.bf16.vlgmr.msra.gmra.mxu2 %vm2168_vm1, %v3250_v19  ;;  %v2705_v33 = vsub.f32 1.0, %v2704_v50  ;;  %v3053_v13 = vpack.c.bf16 %v2867_v30, %v2867_v30  ;;  %vm2709_vm2 = vweird.f32 %v6808_v54  ;;  %v2715_v1 = vor.u32 1.1754944e-38, %v2714_v63 }
 0x47b   : > { %3389 = vmatpush.bf16.msrb.mxu2 %v3380_v26  ;;  %v2631_v7 = vmul.f32 %v5080_v52, %v2630_v32  ;;  %v3037_v16 = vpack.c.bf16 %v2627_v60, %v2627_v60  ;;  %vm2710_vm11 = vmor %vm2708_vm8, %vm2709_vm2  ;;  %vm6842_vm9 = vcmp.gt.f32.partialorder %v4804_v24, 0.0 }
 0x47c   : > { %v2706_v44 = vmul.f32 %v6808_v54, %v2705_v33  ;;  %v3368_v35 = vunpack.c.l.b16 %v3053_v13  ;;  %v6850_v18 = vsel %vm6842_vm9, %v6731_v40, -1e+30  ;;  %v2476_v13 = vpop.xlane.xlu0 %2475 }
 0x47d   : > { %v2632_v0 = vadd.f32 %v5080_v52, %v2631_v7  ;;  %v3128_v5 = vunpack.c.l.b16 %v3037_v16 }
 0x47e   : > { %v3370_v9 = vpack.c.b16 %v3369_v57, %v3368_v35 }
 0x47f   : > { %v2636_v45 = vsel %vm2635_vm7, %v5080_v52, %v2632_v0  ;;  %v2707_v52 = vadd.f32 %v6808_v54, %v2706_v44  ;;  %v4816_v0 = vunpack.c.h.bf16 %v6741_v46 }
 0x480   : > { %v2641_v10 = vsel %vm2638_vm5, %v2640_v55, %v2636_v45  ;;  %v2428_v19 = vpop.xlane.xlu1 %2427  ;;  %v2133_v45 = vpop.f32.mrf.mxu0  ;;  %vm7760_vm5 = vcmask 1043456  }
 0x481   : > { %v2642_v56 = vmul.f32 %v2641_v10, %v6616_v38  ;;  %vm2500_vm0 = vcmp.gt.f32.partialorder %v2428_v19, 0.0  ;;  %v2712_v38 = vand.u32 2147483647, %v6781_v62  ;;  %v2711_v12 = vsel %vm2710_vm11, %v6808_v54, %v2707_v52  ;;  %vm7761_vm8 = vmmov %vm7760_vm5 }
 0x482   : > { %v2532_v27 = vsel %vm2500_vm0, %v2428_v19, 1.0  ;;  %vm6856_vm7 = vcmp.gt.f32.partialorder %v4816_v0, 0.0  ;;  %vm2515_vm11 = vcmp.gt.f32.partialorder %v6737_v4, 0.0 }
 0x483   : > { %v3038_v25 = vpack.c.bf16 %v2642_v56, %v2642_v56  ;;  %5083 = vrcp.f32 %v2532_v27  ;;  %vm2713_vm12 = vcmp.eq.f32.partialorder %v2712_v38, 8.507059e+37  ;;  %v2729_v47 = vand.u32 2147483648, %v2532_v27 }
 0x484   : > { %v2716_v50 = vsel %vm2713_vm12, %v2715_v1, %v2711_v12  ;;  %v2727_v62 = vand.u32 2147483647, %v2532_v27  ;;  %vm2723_vm6 = vweird.f32 %v2532_v27  ;;  %v6862_v46 = vsel %vm6856_vm7, %v2133_v45, -1e+30 }
 0x485   : > { %v3129_v23 = vunpack.c.l.b16 %v3038_v25  ;;  %v2717_v7 = vmul.f32 %v2716_v50, %v6599_v43  ;;  %v2730_v34 = vor.u32 1.1754944e-38, %v2729_v47  ;;  %v2244_v43 = vsel %vm2168_vm1, %v6850_v18, -inf }
 0x486   : > { %vm2728_vm13 = vcmp.eq.f32.partialorder %v2727_v62, 8.507059e+37  ;;  %vm2516_vm12 = vcmp.gt.f32.partialorder %v2476_v13, 0.0 }
 0x487   : > { %v3130_v26 = vpack.c.b16 %v3129_v23, %v3128_v5  ;;  %v3043_v30 = vpack.c.bf16 %v2717_v7, %v2717_v7  ;;  %v6892_v17 = vsel %vm2516_vm12, %v2476_v13, 1.0 }
 0x488   : > { %v2482_v40 = vpop.xlane.xlu1 %2481 }
 0x489   : > { %v5084_v59 = vpop.eup %5083  ;;  %4627 = vmatmul.msk.bf16.vlgmr.msra.gmra.mxu0 %vm2168_vm1, %v3130_v26  ;;  %v3218_v10 = vunpack.c.l.b16 %v3043_v30  ;;  %vm2518_vm2 = vcmp.gt.f32.partialorder %v2482_v40, 0.0 }
 0x48a   : > { %v2719_v39 = vmul.f32 %v5084_v59, %v2532_v27  ;;  %4635 = vmatmul.msk.bf16.vlgmr.msrb.gmra.mxu2 %vm2168_vm1, %v3370_v9  ;;  %vm2724_vm14 = vweird.f32 %v5084_v59  ;;  %v2443_v27 = vpop.xlane.xlu0 %2442  ;;  %v6874_v26 = vsel %vm2518_vm2, %v2482_v40, 1.0  ;;  %v6887_v9 = vsel %vm2515_vm11, %v6737_v4, 1.0 }
 0x48b   : > { %vm2725_vm10 = vmor %vm2723_vm6, %vm2724_vm14  ;;  %vm2505_vm0 = vcmp.gt.f32.partialorder %v2443_v27, 0.0  ;;  %vm2993_vm11 = vweird.f32 %v6874_v26 }
 0x48c   : > { %v2720_v32 = vsub.f32 1.0, %v2719_v39  ;;  %v2537_v57 = vsel %vm2505_vm0, %v2443_v27, 1.0  ;;  %vm7762_vm14 = vmmov %vm7760_vm5 }
 0x48d   : > { %5085 = vrcp.f32 %v2537_v57  ;;  %v2804_v7 = vand.u32 2147483648, %v2537_v57 }
 0x48e   : > { %v2721_v8 = vmul.f32 %v5084_v59, %v2720_v32 }
 0x48f   : > { %v2805_v45 = vor.u32 1.1754944e-38, %v2804_v7 }
 0x490   : > { %v2722_v54 = vadd.f32 %v5084_v59, %v2721_v8 }
 0x492   : > { %v2726_v21 = vsel %vm2725_vm10, %v5084_v59, %v2722_v54  ;;  %vm2798_vm10 = vweird.f32 %v2537_v57  ;;  %v2802_v54 = vand.u32 2147483647, %v2537_v57 }
 0x493   : > { %v2731_v60 = vsel %vm2728_vm13, %v2730_v34, %v2726_v21  ;;  %v5086_v63 = vpop.eup %5085 }
 0x494   : > { %v2732_v33 = vmul.f32 %v2731_v60, %v6628_v15  ;;  %v2262_v15 = vsel %vm2168_vm1, %v6862_v46, -inf  ;;  %vm2799_vm6 = vweird.f32 %v5086_v63  ;;  %vm2803_vm0 = vcmp.eq.f32.partialorder %v2802_v54, 8.507059e+37 }
 0x495   : > { %vm2800_vm13 = vmor %vm2798_vm10, %vm2799_vm6  ;;  %vm2948_vm10 = vweird.f32 %v6887_v9 }
 0x496   : > { %v3044_v55 = vpack.c.bf16 %v2732_v33, %v2732_v33  ;;  %2245 = vmax.xlane.f32.xlu0 %v2244_v43 }
 0x498   : > { %v3219_v19 = vunpack.c.l.b16 %v3044_v55 }
 0x49a   : > { %v3220_v16 = vpack.c.b16 %v3219_v19, %v3218_v10 }
 0x49c   : > { %4630 = vmatmul.msk.bf16.vlgmr.msrb.gmra.mxu0 %vm2168_vm1, %v3220_v16 }
 0x49e   : > { %2263 = vmax.xlane.f32.xlu0 %v2262_v15 }
 0x4a0   : > { %v3285_v56 = vpop.permute.xlu1 %3284 }
 0x4a1   : > { %v3290_v44 = vsel %vm7760_vm5, %v3285_v56, 0 }
 0x4a2   : > { %3299 = vmatpush.bf16.msra.mxu3 %v3290_v44 }
 0x4a5   : > { %4632 = vmatmul.msk.bf16.vlgmr.msra.gmra.mxu3 %vm2168_vm1, %v3280_v49  ;;  %v2794_v49 = vmul.f32 %v5086_v63, %v2537_v57 }
 0x4a7   : > { %v2795_v59 = vsub.f32 1.0, %v2794_v49 }
 0x4a9   : > { %v2796_v1 = vmul.f32 %v5086_v63, %v2795_v59 }
 0x4ab   : > { %v2797_v8 = vadd.f32 %v5086_v63, %v2796_v1 }
 0x4ad   : > { %v2801_v33 = vsel %vm2800_vm13, %v5086_v63, %v2797_v8 }
 0x4ae   : > { %v2237_v25 = vpop.xlane.xlu2 %2236  ;;  %v2806_v16 = vsel %vm2803_vm0, %v2805_v45, %v2801_v33 }
 0x4af   : > { %v2287_v5 = vsub.f32 %v6666_v36, %v2237_v25 }
 0x4b1   : > { %v2341_v23 = vmul.f32 1.442695, %v2287_v5  ;;  %v2807_v5 = vmul.f32 %v2806_v16, %v6636_v51 }
 0x4b3   : > { %5087 = vpow2.f32 %v2341_v23  ;;  %v2999_v23 = vand.u32 2147483648, %v6874_v26 }
 0x4b4   : > { %5089 = vrcp.f32 %v6874_v26 }
 0x4b5   : > { %5091 = vrcp.f32 %v6887_v9 }
 0x4b6   : > { %v3495_v35 = vpop.permute.xlu2 %3494  ;;  %5093 = vrcp.f32 %v6892_v17 }
 0x4b7   : > { %v3500_v52 = vsel %vm7761_vm8, %v3495_v35, 0 }
 0x4b8   : > { %3509 = vmatpush.bf16.msra.mxu2 %v3500_v52  ;;  %v2997_v52 = vand.u32 2147483647, %v6874_v26 }
 0x4b9   : > { %v5088_v6 = vpop.eup %5087 }
 0x4ba   : > { %v6878_v20 = vsel %vm6658_vm4, %v5088_v6, 0.0  ;;  %v6889_v12 = vpop.eup %5089 }
 0x4bb   : > { %v2459_v36 = vsel %vm2168_vm1, %v6878_v20, 0.0  ;;  %v2989_v24 = vmul.f32 %v6889_v12, %v6874_v26  ;;  %v6898_v47 = vpop.eup %5091  ;;  %vm2994_vm2 = vweird.f32 %v6889_v12 }
 0x4bc   : > { %2460 = vadd.xlane.f32.xlu2 %v2459_v36  ;;  %v6900_v34 = vpop.eup %5093  ;;  %v2944_v21 = vmul.f32 %v6898_v47, %v6887_v9  ;;  %vm6916_vm12 = vmor %vm2993_vm11, %vm2994_vm2  ;;  %v4746_v36 = vld [vmem:[%s7586_s8 + $0x8] sm:$0xff]  ;;  %vm2949_vm13 = vweird.f32 %v6898_v47 }
 0x4bd   : > { %v2990_v62 = vsub.f32 1.0, %v2989_v24  ;;  %v2959_v40 = vmul.f32 %v6900_v34, %v6892_v17  ;;  %3937 = vmatpush.bf16.msrb.mxu2 %v4746_v36  ;;  %v4745_v24 = vld [vmem:[%s7586_s8] sm:$0xff]  ;;  %vm2964_vm2 = vweird.f32 %v6900_v34 }
 0x4be   : > { %v6884_v38 = vpop.permute.xlu2 %3464  ;;  %v2945_v13 = vsub.f32 1.0, %v2944_v21 }
 0x4bf   : > { %v2991_v43 = vmul.f32 %v6889_v12, %v2990_v62  ;;  %v2960_v57 = vsub.f32 1.0, %v2959_v40 }
 0x4c0   : > { %v2946_v51 = vmul.f32 %v6898_v47, %v2945_v13 }
 0x4c1   : > { %v2992_v44 = vadd.f32 %v6889_v12, %v2991_v43  ;;  %3938 = vmatpush.bf16.msrb.mxu2 %v4745_v24 }
 0x4c3   : > { %v2446_v39 = vpop.xlane.xlu0 %2445 }
 0x4c4   : > { %vm2506_vm4 = vcmp.gt.f32.partialorder %v2446_v39, 0.0 }
 0x4c5   : > { %v2538_v32 = vsel %vm2506_vm4, %v2446_v39, 1.0  ;;  %v2996_v39 = vsel %vm6916_vm12, %v6889_v12, %v2992_v44  ;;  %v2967_v44 = vand.u32 2147483647, %v6892_v17 }
 0x4c6   : > { %5095 = vrcp.f32 %v2538_v32  ;;  %v3315_v4 = vpop.permute.xlu2 %3314  ;;  %v2819_v27 = vand.u32 2147483648, %v2538_v32  ;;  %v2817_v25 = vand.u32 2147483647, %v2538_v32  ;;  %vm2813_vm4 = vweird.f32 %v2538_v32 }
 0x4c7   : > { %v3320_v50 = vsel %vm7762_vm14, %v3315_v4, 0  ;;  %v3049_v4 = vpack.c.bf16 %v2807_v5, %v2807_v5 }
 0x4c8   : > { %3329 = vmatpush.bf16.msra.mxu0 %v3320_v50  ;;  %v2820_v59 = vor.u32 1.1754944e-38, %v2819_v27  ;;  %vm2818_vm6 = vcmp.eq.f32.partialorder %v2817_v25, 8.507059e+37  ;;  %v3000_v50 = vor.u32 1.1754944e-38, %v2999_v23  ;;  %v2954_v25 = vand.u32 2147483648, %v6887_v9 }
 0x4c9   : > { %v3308_v45 = vunpack.c.l.b16 %v3049_v4 }
 0x4cb   : > { %v2479_v60 = vpop.xlane.xlu0 %2478  ;;  %v2243_v0 = vpop.xlane.xlu1 %2242 }
 0x4cc   : > { %v5096_v30 = vpop.eup %5095  ;;  %vm2517_vm5 = vcmp.gt.f32.partialorder %v2479_v60, 0.0  ;;  %v2289_v55 = vsub.f32 %v6722_v28, %v2243_v0 }
 0x4cd   : > { %v2809_v10 = vmul.f32 %v5096_v30, %v2538_v32  ;;  %v6906_v19 = vsel %vm2517_vm5, %v2479_v60, 1.0  ;;  %vm2814_vm8 = vweird.f32 %v5096_v30  ;;  %v2961_v32 = vmul.f32 %v6900_v34, %v2960_v57 }
 0x4ce   : > { %5097 = vrcp.f32 %v6906_v19  ;;  %v2345_v56 = vmul.f32 1.442695, %v2289_v55  ;;  %vm2815_vm14 = vmor %vm2813_vm4, %vm2814_vm8  ;;  %vm2998_vm5 = vcmp.eq.f32.partialorder %v2997_v52, 8.507059e+37  ;;  %v2982_v21 = vand.u32 2147483647, %v6906_v19 }
 0x4cf   : > { %v2810_v15 = vsub.f32 1.0, %v2809_v10  ;;  %v3001_v54 = vsel %vm2998_vm5, %v3000_v50, %v2996_v39  ;;  %v2984_v60 = vand.u32 2147483648, %v6906_v19  ;;  %v2947_v55 = vadd.f32 %v6898_v47, %v2946_v51 }
 0x4d0   : > { %5099 = vpow2.f32 %v2345_v56  ;;  %v3002_v10 = vmul.f32 %v3001_v54, %v6644_v3  ;;  %vm2963_vm8 = vweird.f32 %v6892_v17  ;;  %vm2983_vm12 = vcmp.eq.f32.partialorder %v2982_v21, 8.507059e+37  ;;  %v7772_v54 = vld [vmem:[#allocation9_spill] sm:$0xff]  ;;  %v7773_v21 = vld [vmem:[#allocation32_spill] sm:$0xff] }
 0x4d1   : > { %v2811_v28 = vmul.f32 %v5096_v30, %v2810_v15  ;;  %v2969_v15 = vand.u32 2147483648, %v6892_v17  ;;  %v2985_v56 = vor.u32 1.1754944e-38, %v2984_v60  ;;  %v2952_v3 = vand.u32 2147483647, %v6887_v9  ;;  %vm6961_vm4 = vmor %vm2963_vm8, %vm2964_vm2 }
 0x4d2   : > { %v3062_v17 = vpack.c.bf16 %v3002_v10, %v3002_v10  ;;  %v2955_v51 = vor.u32 1.1754944e-38, %v2954_v25  ;;  %v1445_v60 = vadd.f32 %v7773_v21, %v7772_v54  ;;  %v3093_v10 = vpop.f32.mrf.mxu2  ;;  %v5134_v54 = vld [vmem:[%s5381_s25 + $0x20] sm:$0xff] }
 0x4d3   : > { %v2812_v63 = vadd.f32 %v5096_v30, %v2811_v28  ;;  %v6921_v6 = vpop.xlane.xlu1 %2463  ;;  %v2970_v36 = vor.u32 1.1754944e-38, %v2969_v15  ;;  %v7778_v15 = vld [vmem:[#allocation15_spill] sm:$0xff] }
 0x4d4   : > { %v5098_v49 = vpop.eup %5097  ;;  %v3489_v39 = vunpack.c.l.b16 %v3062_v17 }
 0x4d5   : > { %v2816_v1 = vsel %vm2815_vm14, %v5096_v30, %v2812_v63  ;;  %v2974_v26 = vmul.f32 %v5098_v49, %v6906_v19  ;;  %vm2979_vm0 = vweird.f32 %v5098_v49  ;;  %vm7767_vm14 = vcmask 1043456  }
 0x4d6   : > { %v2821_v8 = vsel %vm2818_vm6, %v2820_v59, %v2816_v1  ;;  %v5100_v62 = vpop.eup %5099  ;;  %vm6975_vm6 = vmor %vm2948_vm10, %vm2949_vm13  ;;  %vm2953_vm10 = vcmp.eq.f32.partialorder %v2952_v3, 8.507059e+37 }
 0x4d7   : > { %v2822_v12 = vmul.f32 %v2821_v8, %v6706_v48  ;;  %v2975_v7 = vsub.f32 1.0, %v2974_v26  ;;  %v6943_v0 = vsel %vm6710_vm3, %v5100_v62, 0.0  ;;  %v2962_v48 = vadd.f32 %v6900_v34, %v2961_v32  ;;  %vm7770_vm5 = vmmov %vm7767_vm14  ;;  %v4747_v26 = vld [vmem:[%s7586_s8 + $0x10] sm:$0xff] }
 0x4d8   : > { %v2465_v43 = vsel %vm2168_vm1, %v6943_v0, 0.0  ;;  %vm2978_vm3 = vweird.f32 %v6906_v19  ;;  %v7781_v19 = vld [vmem:[#allocation22_spill] sm:$0xff] }
 0x4d9   : > { %v3050_v30 = vpack.c.bf16 %v2822_v12, %v2822_v12  ;;  %v2976_v33 = vmul.f32 %v5098_v49, %v2975_v7  ;;  %2466 = vadd.xlane.f32.xlu1 %v2465_v43  ;;  %vm2980_vm11 = vmor %vm2978_vm3, %vm2979_vm0  ;;  %vm2968_vm0 = vcmp.eq.f32.partialorder %v2967_v44, 8.507059e+37  ;;  %v5131_v44 = vld [vmem:[%s5381_s25 + $0x8] sm:$0xff] }
 0x4db   : > { %v3309_v61 = vunpack.c.l.b16 %v3050_v30  ;;  %v2977_v40 = vadd.f32 %v5098_v49, %v2976_v33  ;;  %v2261_v16 = vpop.xlane.xlu1 %2260  ;;  %v7011_v30 = vld [vmem:[%s7585_s7] ss:$0 sm:$0xff] }
 0x4dc   : > { %v2295_v13 = vsub.f32 %v6768_v37, %v2261_v16  ;;  %v2966_v37 = vsel %vm6961_vm4, %v6900_v34, %v2962_v48  ;;  %v2951_v34 = vsel %vm6975_vm6, %v6898_v47, %v2947_v55  ;;  %v5130_v33 = vld [vmem:[%s5381_s25] sm:$0xff]  ;;  %v1482_v43 = vadd.f32 %v7011_v30, %v1445_v60  ;;  %v7776_v48 = vld [vmem:[#allocation39_spill] sm:$0xff]  ;;  %v3121_v16 = vpop.f32.mrf.mxu3  ;;  %v7795_v60 = vld [vmem:[#allocation17_spill] sm:$0xff] }
 0x4dd   : > { %v3310_v27 = vpack.c.b16 %v3309_v61, %v3308_v45  ;;  %v2981_v28 = vsel %vm2980_vm11, %v5098_v49, %v2977_v40  ;;  %v3470_v49 = vsel %vm7770_vm5, %v6884_v38, 0  ;;  %v2971_v59 = vsel %vm2968_vm0, %v2970_v36, %v2966_v37  ;;  %v7775_v55 = vld [vmem:[#allocation12_spill] sm:$0xff] }
 0x4de   : > { %v2986_v57 = vsel %vm2983_vm12, %v2985_v56, %v2981_v28  ;;  %v2357_v5 = vmul.f32 1.442695, %v2295_v13  ;;  %v3345_v23 = vpop.permute.xlu0 %3344  ;;  %v2956_v38 = vsel %vm2953_vm10, %v2955_v51, %v2951_v34  ;;  %v2972_v47 = vmul.f32 %v2971_v59, %v6551_v14  ;;  %v7771_v14 = vld [vmem:[#allocation24_spill] sm:$0xff]  ;;  %v7779_v56 = vld [vmem:[#allocation41_spill] sm:$0xff]  ;;  %v5132_v34 = vld [vmem:[%s5381_s25 + $0x10] sm:$0xff] }
 0x4df   : > { %v2987_v35 = vmul.f32 %v2986_v57, %v6729_v2  ;;  %4633 = vmatmul.msk.bf16.vlgmr.msra.gmra.mxu0 %vm2168_vm1, %v3310_v27  ;;  %v3350_v52 = vsel %vm7767_vm14, %v3345_v23, 0  ;;  %v4748_v2 = vld [vmem:[%s7586_s8 + $0x18] sm:$0xff]  ;;  %v2957_v4 = vmul.f32 %v2956_v38, %v6429_v58  ;;  %v3402_v62 = vunpack.c.l.b16 %v7771_v14  ;;  %v7782_v57 = vld [vmem:[#allocation45_spill] sm:$0xff] }
 0x4e0   : > { %5101 = vpow2.f32 %v2357_v5  ;;  %3359 = vmatpush.bf16.msrb.mxu1 %v3350_v52  ;;  %v3060_v42 = vpack.c.bf16 %v2972_v47, %v2972_v47  ;;  %v1452_v45 = vadd.f32 %v7776_v48, %v7775_v55  ;;  %v3754_v40 = vpack.c.bf16 %v3093_v10, %v3091_v31  ;;  %v7798_v10 = vld [vmem:[#allocation40_spill] sm:$0xff] }
 0x4e1   : > { %v3061_v9 = vpack.c.bf16 %v2987_v35, %v2987_v35  ;;  %v3403_v7 = vpack.c.b16 %v3402_v62, %v3402_v62  ;;  %v1457_v13 = vadd.f32 %v7779_v56, %v7778_v15  ;;  %v1467_v5 = vadd.f32 %v7782_v57, %v7781_v19  ;;  %v7799_v56 = vld [vmem:[#allocation25_spill] sm:$0xff]  ;;  %v7802_v19 = vld [vmem:[#allocation19_spill] sm:$0xff] }
 0x4e2   : > { %v3459_v8 = vunpack.c.l.b16 %v3060_v42  ;;  %v1485_v61 = vadd.f32 %v7011_v30, %v1452_v45  ;;  %vm2512_vm14 = vcmp.gt.f32.partialorder %v6921_v6, 0.0  ;;  %v7797_v45 = vld [vmem:[#allocation14_spill] sm:$0xff]  ;;  %v7803_v57 = vld [vmem:[#allocation43_spill] sm:$0xff] }
 0x4e3   : > { %v3488_v1 = vunpack.c.l.b16 %v3061_v9  ;;  %4634 = vmatmul.msk.bf16.vlgmr.msrb.gmra.mxu1 %vm2168_vm1, %v3340_v41  ;;  %v3059_v41 = vpack.c.bf16 %v2957_v4, %v2957_v4  ;;  %v1487_v27 = vadd.f32 %v7011_v30, %v1457_v13  ;;  %v1491_v37 = vadd.f32 %v7011_v30, %v1467_v5  ;;  %v7789_v4 = vld [vmem:[#allocation10_spill] sm:$0xff] }
 0x4e4   : > { %3479 = vmatpush.bf16.msra.mxu1 %v3470_v49  ;;  %v3123_v23 = vpop.f32.mrf.mxu3  ;;  %v2544_v48 = vsel %vm2512_vm14, %v6921_v6, 1.0  ;;  %v7800_v13 = vld [vmem:[#allocation46_spill] sm:$0xff]  ;;  %v1462_v5 = vadd.f32 %v7803_v57, %v7802_v19 }
 0x4e5   : > { %v3490_v24 = vpack.c.b16 %v3489_v39, %v3488_v1  ;;  %v3458_v12 = vunpack.c.l.b16 %v3059_v41  ;;  %v3755_v17 = vpack.c.bf16 %v3123_v23, %v3121_v16  ;;  %v3181_v39 = vpop.f32.mrf.mxu2  ;;  %v7786_v1 = vld [vmem:[#allocation13_spill] sm:$0xff] }
 0x4e6   : > { %v5102_v32 = vpop.eup %5101  ;;  %v3432_v38 = vunpack.c.l.b16 %v7786_v1 }
 0x4e7   : > { %4639 = vmatmul.msk.bf16.vlgmr.msra.gmra.mxu2 %vm2168_vm1, %v3490_v24  ;;  %v6999_v50 = vsel %vm6759_vm15, %v5102_v32, 0.0  ;;  %v3460_v58 = vpack.c.b16 %v3459_v8, %v3458_v12  ;;  %vm7774_vm15 = vcmask 261120   ;;  %v3522_v24 = vunpack.c.l.b16 %v7788_v22 }
 0x4e8   : > { %3836 = vmatpush.bf16.msrb.mxu1 %v4748_v2  ;;  %v2483_v53 = vsel %vm2168_vm1, %v6999_v50, 0.0  ;;  %vm7777_vm13 = vmmov %vm7774_vm15  ;;  %v3433_v47 = vpack.c.b16 %v3432_v38, %v3432_v38 }
 0x4e9   : > { %2484 = vadd.xlane.f32.xlu2 %v2483_v53  ;;  %vm7780_vm2 = vmmov %vm7777_vm13  ;;  %v7790_v53 = vld [vmem:[#allocation34_spill] sm:$0xff]  ;;  %v3523_v8 = vpack.c.b16 %v3522_v24, %v3522_v24  ;;  %v7808_v24 = vld [vmem:[#allocation27_spill] sm:$0xff] }
 0x4ea   : > { %vm7783_vm3 = vmmov %vm7780_vm2  ;;  %v1447_v42 = vadd.f32 %v7790_v53, %v7789_v4  ;;  %v2909_v53 = vand.u32 2147483648, %v2544_v48 }
 0x4eb   : > { %vm7784_vm8 = vmmov %vm7780_vm2 }
 0x4ec   : > { %3837 = vmatpush.bf16.msrb.mxu1 %v4747_v26  ;;  %v5133_v26 = vld [vmem:[%s5381_s25 + $0x18] sm:$0xff]  ;;  %vm7787_vm11 = vmmov %vm7780_vm2  ;;  %v3211_v14 = vpop.f32.mrf.mxu3  ;;  %v1483_v12 = vadd.f32 %v7011_v30, %v1447_v42  ;;  %v2907_v42 = vand.u32 2147483647, %v2544_v48 }
 0x4ed   : > { %v3183_v32 = vpop.f32.mrf.mxu2  ;;  %vm7794_vm4 = vmmov %vm7780_vm2 }
 0x4ee   : > { %v3757_v41 = vpack.c.bf16 %v3183_v32, %v3181_v39  ;;  %vm7801_vm6 = vmmov %vm7780_vm2  ;;  %v7809_v32 = vld [vmem:[#allocation47_spill] sm:$0xff] }
 0x4ef   : > { %vm7804_vm5 = vmmov %vm7780_vm2  ;;  %v1472_v4 = vadd.f32 %v7809_v32, %v7808_v24 }
 0x4f0   : > { %vm7807_vm10 = vmmov %vm7780_vm2 }
 0x4f1   : > { %vm7813_vm14 = vmmov %vm7804_vm5 }
 0x4f2   : > { %3404 = vrot.lane.b32.xlu1 %v3403_v7, %s7607_s12  ;;  %v7792_v7 = vld [vmem:[#allocation11_spill] sm:$0xff] }
 0x4f3   : > { %4638 = vmatmul.msk.bf16.vlgmr.msra.gmra.mxu1 %vm2168_vm1, %v3460_v58  ;;  %v7793_v58 = vld [vmem:[#allocation37_spill] sm:$0xff] }
 0x4f4   : > { %v1450_v31 = vadd.f32 %v7793_v58, %v7792_v7  ;;  %v3213_v16 = vpop.f32.mrf.mxu3  ;;  %v1493_v7 = vadd.f32 %v7011_v30, %v1472_v4  ;;  %v2910_v58 = vor.u32 1.1754944e-38, %v2909_v53 }
 0x4f6   : > { %v1484_v21 = vadd.f32 %v7011_v30, %v1450_v31 }
 0x4f7   : > { %4689 = vmatmul.msk.bf16.vlgmr.msrb.gmra.mxu2 %vm7774_vm15, %v5130_v33  ;;  %v7796_v33 = vld [vmem:[#allocation42_spill] sm:$0xff] }
 0x4fa   : > { %1498 = vrot.lane.b32.xlu1 %v1482_v43, %s5251_s24  ;;  %v1460_v43 = vadd.f32 %v7796_v33, %v7795_v60 }
 0x4fd   : > { %v3271_v6 = vpop.f32.mrf.mxu2 }
 0x502   : > { %1504 = vrot.lane.b32.xlu1 %v1485_v61, %s5251_s24  ;;  %v1455_v61 = vadd.f32 %v7798_v10, %v7797_v45 }
 0x503   : > { %4665 = vmatmul.msk.bf16.vlgmr.msrb.gmra.mxu1 %vm7777_vm13, %v3754_v40  ;;  %v1488_v40 = vadd.f32 %v7011_v30, %v1460_v43 }
 0x504   : > { %v1486_v15 = vadd.f32 %v7011_v30, %v1455_v61 }
 0x506   : > { %v3151_v63 = vpop.f32.mrf.mxu0 }
 0x507   : > { %4690 = vmatmul.msk.bf16.gmra.mxu2 %vm7780_vm2, %v5131_v44  ;;  %v1470_v44 = vadd.f32 %v7800_v13, %v7799_v56 }
 0x509   : > { %v2246_v28 = vpop.xlane.xlu0 %2245  ;;  %v1492_v23 = vadd.f32 %v7011_v30, %v1470_v44 }
 0x50a   : > { %v2290_v3 = vsub.f32 %v6850_v18, %v2246_v28  ;;  %1516 = vrot.lane.b32.xlu1 %v1487_v27, %s5252_s4  ;;  %v3758_v27 = vpack.c.bf16 %v3213_v16, %v3211_v14  ;;  %v5136_v14 = vld [vmem:[%s5381_s25 + $0x30] sm:$0xff] }
 0x50c   : > { %v2347_v25 = vmul.f32 1.442695, %v2290_v3 }
 0x50e   : > { %5103 = vpow2.f32 %v2347_v25  ;;  %v3153_v51 = vpop.f32.mrf.mxu0 }
 0x50f   : > { %v3756_v59 = vpack.c.bf16 %v3153_v51, %v3151_v63 }
 0x511   : > { %v2264_v35 = vpop.xlane.xlu0 %2263 }
 0x512   : > { %v2296_v52 = vsub.f32 %v6862_v46, %v2264_v35  ;;  %1532 = vrot.lane.b32.xlu1 %v1491_v37, %s7607_s12 }
 0x513   : > { %4666 = vmatmul.msk.bf16.gmra.mxu1 %vm7783_vm3, %v3755_v17  ;;  %v5135_v17 = vld [vmem:[%s5381_s25 + $0x28] sm:$0xff]  ;;  %vm2903_vm3 = vweird.f32 %v2544_v48 }
 0x514   : > { %v5104_v18 = vpop.eup %5103  ;;  %v2359_v36 = vmul.f32 1.442695, %v2296_v52  ;;  %v1489_v52 = vadd.f32 %v7011_v30, %v1462_v5  ;;  %v5138_v5 = vld [vmem:[%s5381_s25 + $0x40] sm:$0xff] }
 0x515   : > { %v7037_v49 = vsel %vm6842_vm9, %v5104_v18, 0.0  ;;  %vm7785_vm9 = vmmov %vm7780_vm2 }
 0x516   : > { %5105 = vpow2.f32 %v2359_v36  ;;  %v2468_v2 = vsel %vm2168_vm1, %v7037_v49, 0.0  ;;  %v7805_v36 = vld [vmem:[#allocation21_spill] sm:$0xff] }
 0x517   : > { %2469 = vadd.xlane.f32.xlu0 %v2468_v2  ;;  %4691 = vmatmul.msk.bf16.gmra.mxu2 %vm7784_vm8, %v5132_v34  ;;  %v7806_v2 = vld [vmem:[#allocation44_spill] sm:$0xff] }
 0x518   : > { %v1465_v34 = vadd.f32 %v7806_v2, %v7805_v36 }
 0x519   : > { %v3241_v3 = vpop.f32.mrf.mxu0 }
 0x51a   : > { %v1490_v39 = vadd.f32 %v7011_v30, %v1465_v34 }
 0x51c   : > { %v5106_v46 = vpop.eup %5105 }
 0x51d   : > { %v7045_v9 = vsel %vm6856_vm7, %v5106_v46, 0.0  ;;  %vm7791_vm7 = vmmov %vm7780_vm2  ;;  %v3273_v46 = vpop.f32.mrf.mxu2 }
 0x51e   : > { %v2486_v11 = vsel %vm2168_vm1, %v7045_v9, 0.0 }
 0x51f   : > { %2487 = vadd.xlane.f32.xlu2 %v2486_v11 }
 0x521   : > { %v3243_v51 = vpop.f32.mrf.mxu0 }
 0x522   : > { %v3759_v1 = vpack.c.bf16 %v3243_v51, %v3241_v3 }
 0x523   : > { %4667 = vmatmul.msk.bf16.gmra.mxu1 %vm7785_vm9, %v3756_v59  ;;  %vm7810_vm9 = vmmov %vm7794_vm4 }
 0x527   : > { %4692 = vmatmul.msk.bf16.gmra.mxu2 %vm7787_vm11, %v5133_v26 }
 0x528   : > { %v3301_v61 = vpop.f32.mrf.mxu3 }
 0x52b   : > { %3434 = vrot.lane.b32.xlu0 %v3433_v47, %s7607_s12 }
 0x52f   : > { %v2461_v62 = vpop.xlane.xlu2 %2460 }
 0x530   : > { %vm2511_vm12 = vcmp.gt.f32.partialorder %v2461_v62, 0.0 }
 0x531   : > { %v2543_v55 = vsel %vm2511_vm12, %v2461_v62, 1.0  ;;  %vm7811_vm12 = vmmov %vm7794_vm4 }
 0x532   : > { %5107 = vrcp.f32 %v2543_v55  ;;  %v2894_v26 = vand.u32 2147483648, %v2543_v55  ;;  %vm2888_vm13 = vweird.f32 %v2543_v55  ;;  %v2892_v22 = vand.u32 2147483647, %v2543_v55 }
 0x533   : > { %4668 = vmatmul.msk.bf16.gmra.mxu1 %vm7791_vm7, %v3757_v41  ;;  %3524 = vrot.lane.b32.xlu0 %v3523_v8, %s7607_s12  ;;  %5109 = vrcp.f32 %v2544_v48  ;;  %vm2908_vm7 = vcmp.eq.f32.partialorder %v2907_v42, 8.507059e+37 }
 0x534   : > { %v2895_v8 = vor.u32 1.1754944e-38, %v2894_v26  ;;  %vm2893_vm11 = vcmp.eq.f32.partialorder %v2892_v22, 8.507059e+37 }
 0x537   : > { %1500 = vrot.lane.b32.xlu2 %v1483_v12, %s5251_s24  ;;  %4693 = vmatmul.msk.bf16.gmra.mxu2 %vm7794_vm4, %v5134_v54  ;;  %v7097_v12 = vpop.f32.mrf.mxu2  ;;  %vm7812_vm4 = vcmask 1043456  }
 0x538   : > { %v5108_v28 = vpop.eup %5107 }
 0x539   : > { %v5110_v25 = vpop.eup %5109  ;;  %v2884_v37 = vmul.f32 %v5108_v28, %v2543_v55  ;;  %vm2889_vm0 = vweird.f32 %v5108_v28 }
 0x53a   : > { %v2899_v35 = vmul.f32 %v5110_v25, %v2544_v48  ;;  %vm2904_vm15 = vweird.f32 %v5110_v25  ;;  %vm2890_vm2 = vmor %vm2888_vm13, %vm2889_vm0  ;;  %v3760_v48 = vpack.c.bf16 %v3273_v46, %v3271_v6 }
 0x53b   : > { %1502 = vrot.lane.b32.xlu0 %v1484_v21, %s5251_s24  ;;  %v2885_v18 = vsub.f32 1.0, %v2884_v37  ;;  %vm2905_vm8 = vmor %vm2903_vm3, %vm2904_vm15 }
 0x53c   : > { %v2900_v63 = vsub.f32 1.0, %v2899_v35 }
 0x53d   : > { %v2886_v11 = vmul.f32 %v5108_v28, %v2885_v18 }
 0x53e   : > { %v2901_v59 = vmul.f32 %v5110_v25, %v2900_v63 }
 0x53f   : > { %1518 = vrot.lane.b32.xlu2 %v1488_v40, %s5252_s4  ;;  %v2887_v38 = vadd.f32 %v5108_v28, %v2886_v11  ;;  %v7105_v10 = vpop.f32.mrf.mxu2 }
 0x540   : > { %v2902_v47 = vadd.f32 %v5110_v25, %v2901_v59 }
 0x541   : > { %v2891_v41 = vsel %vm2890_vm2, %v5108_v28, %v2887_v38 }
 0x542   : > { %v2906_v62 = vsel %vm2905_vm8, %v5110_v25, %v2902_v47  ;;  %v2896_v31 = vsel %vm2893_vm11, %v2895_v8, %v2891_v41 }
 0x543   : > { %4669 = vmatmul.msk.bf16.gmra.mxu1 %vm7801_vm6, %v3758_v27  ;;  %1514 = vrot.lane.b32.xlu0 %v1486_v15, %s5252_s4  ;;  %v2911_v54 = vsel %vm2908_vm7, %v2910_v58, %v2906_v62  ;;  %v2897_v21 = vmul.f32 %v2896_v31, %v6878_v20  ;;  %v5137_v20 = vld [vmem:[%s5381_s25 + $0x38] sm:$0xff]  ;;  %v3303_v27 = vpop.f32.mrf.mxu3  ;;  %vm7814_vm6 = vmmov %vm7804_vm5 }
 0x544   : > { %v2912_v33 = vmul.f32 %v2911_v54, %v6754_v29  ;;  %v3761_v6 = vpack.c.bf16 %v3303_v27, %v3301_v61  ;;  %vm7815_vm0 = vmmov %vm7814_vm6 }
 0x545   : > { %v3055_v43 = vpack.c.bf16 %v2897_v21, %v2897_v21  ;;  %vm7816_vm15 = vmmov %vm7815_vm0 }
 0x546   : > { %v3056_v45 = vpack.c.bf16 %v2912_v33, %v2912_v33  ;;  %vm7817_vm13 = vmmov %vm7815_vm0 }
 0x547   : > { %1534 = vrot.lane.b32.xlu2 %v1492_v23, %s7607_s12  ;;  %4694 = vmatmul.msk.bf16.gmra.mxu2 %vm7804_vm5, %v5135_v17  ;;  %v3398_v40 = vunpack.c.l.b16 %v3055_v43  ;;  %vm7820_vm7 = vmmov %vm7815_vm0  ;;  %v7821_v43 = vld [vmem:[#allocation35_spill] sm:$0xff] }
 0x548   : > { %v3399_v15 = vunpack.c.l.b16 %v3056_v45 }
 0x54a   : > { %v3400_v29 = vpack.c.b16 %v3399_v15, %v3398_v40 }
 0x54b   : > { %1520 = vrot.lane.b32.xlu0 %v1489_v52, %s5252_s4 }
 0x54c   : > { %v2467_v60 = vpop.xlane.xlu1 %2466 }
 0x54d   : > { %vm2513_vm5 = vcmp.gt.f32.partialorder %v2467_v60, 0.0 }
 0x54e   : > { %v2545_v57 = vsel %vm2513_vm5, %v2467_v60, 1.0 }
 0x54f   : > { %5111 = vrcp.f32 %v2545_v57  ;;  %v2924_v42 = vand.u32 2147483648, %v2545_v57  ;;  %vm2918_vm8 = vweird.f32 %v2545_v57  ;;  %v2922_v8 = vand.u32 2147483647, %v2545_v57 }
 0x551   : > { %v2925_v45 = vor.u32 1.1754944e-38, %v2924_v42 }
 0x553   : > { %4670 = vmatmul.msk.bf16.gmra.mxu1 %vm7807_vm10, %v3759_v1  ;;  %1530 = vrot.lane.b32.xlu0 %v1490_v39, %s7607_s12  ;;  %v5139_v39 = vld [vmem:[%s5381_s25 + $0x48] sm:$0xff] }
 0x555   : > { %v5112_v63 = vpop.eup %5111 }
 0x556   : > { %v2914_v51 = vmul.f32 %v5112_v63, %v2545_v57  ;;  %vm2919_vm3 = vweird.f32 %v5112_v63 }
 0x557   : > { %4695 = vmatmul.msk.bf16.gmra.mxu2 %vm7810_vm9, %v5136_v14  ;;  %vm7148_vm9 = vmor %vm2918_vm8, %vm2919_vm3 }
 0x558   : > { %v2915_v11 = vsub.f32 1.0, %v2914_v51  ;;  %vm7826_vm3 = vmmov %vm7820_vm7 }
 0x55a   : > { %v2916_v22 = vmul.f32 %v5112_v63, %v2915_v11 }
 0x55b   : > { %1536 = vrot.lane.b32.xlu0 %v1493_v7, %s7607_s12 }
 0x55c   : > { %v3331_v19 = vpop.f32.mrf.mxu0  ;;  %v2485_v37 = vpop.xlane.xlu2 %2484  ;;  %v2917_v4 = vadd.f32 %v5112_v63, %v2916_v22  ;;  %v4750_v22 = vld [vmem:[%s7586_s8 + $0x28] sm:$0xff] }
 0x55d   : > { %vm2519_vm10 = vcmp.gt.f32.partialorder %v2485_v37, 0.0 }
 0x55e   : > { %v7127_v18 = vsel %vm2519_vm10, %v2485_v37, 1.0  ;;  %v2921_v60 = vsel %vm7148_vm9, %v5112_v63, %v2917_v4 }
 0x55f   : > { %5113 = vrcp.f32 %v7127_v18  ;;  %vm3008_vm5 = vweird.f32 %v7127_v18 }
 0x560   : > { %v7103_v55 = vpop.f32.mrf.mxu1 }
 0x563   : > { %4671 = vmatmul.msk.bf16.gmra.mxu1 %vm7811_vm12, %v3760_v48  ;;  %vm2923_vm12 = vcmp.eq.f32.partialorder %v2922_v8, 8.507059e+37 }
 0x564   : > { %v3405_v16 = vpop.permute.xlu1 %3404  ;;  %v3333_v52 = vpop.f32.mrf.mxu0 }
 0x565   : > { %v3410_v56 = vsel %vm7812_vm4, %v3405_v16, 0  ;;  %v3762_v2 = vpack.c.bf16 %v3333_v52, %v3331_v19  ;;  %v7139_v1 = vpop.eup %5113  ;;  %v2926_v16 = vsel %vm2923_vm12, %v2925_v45, %v2921_v60 }
 0x566   : > { %3419 = vmatpush.bf16.msrb.mxu3 %v3410_v56  ;;  %v3004_v24 = vmul.f32 %v7139_v1, %v7127_v18  ;;  %vm3009_vm4 = vweird.f32 %v7139_v1  ;;  %v2927_v57 = vmul.f32 %v2926_v16, %v6943_v0 }
 0x567   : > { %4696 = vmatmul.msk.bf16.gmra.mxu2 %vm7813_vm14, %v5137_v20  ;;  %vm7823_vm14 = vmmov %vm7815_vm0 }
 0x568   : > { %v3363_v13 = vpop.f32.mrf.mxu1  ;;  %v3005_v53 = vsub.f32 1.0, %v3004_v24  ;;  %vm7177_vm10 = vmor %vm3008_vm5, %vm3009_vm4  ;;  %v3057_v24 = vpack.c.bf16 %v2927_v57, %v2927_v57  ;;  %v7832_v57 = vld [vmem:[#allocation30_spill] sm:$0xff] }
 0x569   : > { %4636 = vmatmul.msk.bf16.vlgmr.msrb.gmra.mxu3 %vm2168_vm1, %v3400_v29  ;;  %v3763_v14 = vpack.c.bf16 %v3363_v13, %v7103_v55  ;;  %v7822_v55 = vld [vmem:[#allocation29_spill] sm:$0xff]  ;;  %v5140_v29 = vld [vmem:[%s5381_s25 + $0x50] sm:$0xff] }
 0x56a   : > { %v7112_v44 = vpop.f32.mrf.mxu2  ;;  %v3006_v33 = vmul.f32 %v7139_v1, %v3005_v53  ;;  %v1437_v48 = vadd.f32 %v7822_v55, %v7821_v43  ;;  %v3428_v43 = vunpack.c.l.b16 %v3057_v24 }
 0x56c   : > { %v7125_v35 = vpop.permute.xlu1 %1498  ;;  %v3007_v56 = vadd.f32 %v7139_v1, %v3006_v33  ;;  %v1479_v13 = vadd.f32 %v7011_v30, %v1437_v48  ;;  %v3764_v33 = vpack.c.bf16 %v7105_v10, %v7097_v12 }
 0x56e   : > { %v3011_v0 = vsel %vm7177_vm10, %v7139_v1, %v3007_v56  ;;  %vm7830_vm10 = vmmov %vm7826_vm3 }
 0x570   : > { %v7114_v28 = vpop.f32.mrf.mxu1 }
 0x572   : > { %v7116_v3 = vpop.f32.mrf.mxu2 }
 0x573   : > { %v3768_v25 = vpack.c.bf16 %v7116_v3, %v7112_v44  ;;  %4672 = vmatmul.msk.bf16.gmra.mxu1 %vm7814_vm6, %v3761_v6 }
 0x574   : > { %v7135_v59 = vpop.permute.xlu1 %1504 }
 0x577   : > { %4697 = vmatmul.msk.bf16.gmra.mxu2 %vm7815_vm0, %v5138_v5  ;;  %v3014_v5 = vand.u32 2147483648, %v7127_v18  ;;  %vm1546_vm0 = vcmask 523264  }
 0x578   : > { %v7123_v23 = vpop.f32.mrf.mxu1 }
 0x57a   : > { %v3940_v17 = vpop.f32.mrf.mxu2 }
 0x57c   : > { %v1517_v62 = vpop.permute.xlu1 %1516 }
 0x580   : > { %v3839_v36 = vpop.f32.mrf.mxu1 }
 0x581   : > { %v7129_v34 = vadd.f32 %v3940_v17, %v3839_v36  ;;  %v3012_v17 = vand.u32 2147483647, %v7127_v18 }
 0x582   : > { %v7132_v46 = vpop.f32.mrf.mxu2 }
 0x583   : > { %4673 = vmatmul.msk.bf16.gmra.mxu1 %vm7816_vm15, %v3762_v2  ;;  %vm3013_vm9 = vcmp.eq.f32.partialorder %v3012_v17, 8.507059e+37 }
 0x587   : > { %4698 = vmatmul.msk.bf16.gmra.mxu2 %vm7817_vm13, %v5139_v39  ;;  %vm1551_vm13 = vcmask 785408   ;;  %v1533_v39 = vpop.permute.xlu1 %1532 }
 0x588   : > { %v7141_v38 = vpop.f32.mrf.mxu1 }
 0x58a   : > { %v2470_v26 = vpop.xlane.xlu0 %2469  ;;  %v3945_v47 = vpop.f32.mrf.mxu2 }
 0x58b   : > { %vm2514_vm2 = vcmp.gt.f32.partialorder %v2470_v26, 0.0 }
 0x58c   : > { %v2546_v32 = vsel %vm2514_vm2, %v2470_v26, 1.0 }
 0x58d   : > { %5115 = vrcp.f32 %v2546_v32  ;;  %v2939_v20 = vand.u32 2147483648, %v2546_v32  ;;  %v2937_v6 = vand.u32 2147483647, %v2546_v32  ;;  %vm2933_vm15 = vweird.f32 %v2546_v32 }
 0x58f   : > { %v2940_v51 = vor.u32 1.1754944e-38, %v2939_v20  ;;  %vm2938_vm8 = vcmp.eq.f32.partialorder %v2937_v6, 8.507059e+37  ;;  %v7831_v6 = vld [vmem:[#allocation36_spill] sm:$0xff] }
 0x590   : > { %v3844_v41 = vpop.f32.mrf.mxu1 }
 0x591   : > { %v7146_v7 = vadd.f32 %v3945_v47, %v3844_v41 }
 0x592   : > { %v2488_v31 = vpop.xlane.xlu2 %2487  ;;  %v7152_v54 = vpop.f32.mrf.mxu2 }
 0x593   : > { %v5116_v21 = vpop.eup %5115  ;;  %vm2520_vm11 = vcmp.gt.f32.partialorder %v2488_v31, 0.0  ;;  %4674 = vmatmul.msk.bf16.gmra.mxu1 %vm7820_vm7, %v3763_v14 }
 0x594   : > { %v2929_v61 = vmul.f32 %v5116_v21, %v2546_v32  ;;  %v7160_v40 = vsel %vm2520_vm11, %v2488_v31, 1.0  ;;  %vm2934_vm6 = vweird.f32 %v5116_v21  ;;  %v3015_v32 = vor.u32 1.1754944e-38, %v3014_v5 }
 0x595   : > { %5117 = vrcp.f32 %v7160_v40  ;;  %vm2935_vm2 = vmor %vm2933_vm15, %vm2934_vm6  ;;  %vm7827_vm11 = vcmask 1043456   ;;  %vm3023_vm12 = vweird.f32 %v7160_v40  ;;  %v1440_v5 = vadd.f32 %v7832_v57, %v7831_v6  ;;  %v5150_v6 = vld [vmem:[%s5386_s13 + $0x20] sm:$0xff]  ;;  %v5151_v57 = vld [vmem:[%s5386_s13 + $0x28] sm:$0xff] }
 0x596   : > { %v2930_v15 = vsub.f32 1.0, %v2929_v61  ;;  %v3016_v14 = vsel %vm3013_vm9, %v3015_v32, %v3011_v0  ;;  %vm7829_vm5 = vmmov %vm7827_vm11  ;;  %v5142_v32 = vld [vmem:[%s5386_s13] sm:$0xff] }
 0x597   : > { %4699 = vmatmul.msk.bf16.gmra.mxu2 %vm7823_vm14, %v5140_v29  ;;  %v3017_v48 = vmul.f32 %v3016_v14, %v6999_v50  ;;  %vm7828_vm14 = vmmov %vm7826_vm3 }
 0x598   : > { %v2931_v27 = vmul.f32 %v5116_v21, %v2930_v15  ;;  %v7171_v19 = vpop.f32.mrf.mxu1  ;;  %vm7833_vm15 = vmmov %vm7826_vm3 }
 0x59a   : > { %v2932_v52 = vadd.f32 %v5116_v21, %v2931_v27  ;;  %v1501_v63 = vpop.permute.xlu2 %1500  ;;  %v3950_v36 = vpop.f32.mrf.mxu2 }
 0x59b   : > { %v5118_v2 = vpop.eup %5117  ;;  %v1543_v11 = vsel %vm7826_vm3, %v1479_v13, %v1501_v63  ;;  %v3063_v13 = vpack.c.bf16 %v3017_v48, %v3017_v48 }
 0x59c   : > { %v2936_v26 = vsel %vm2935_vm2, %v5116_v21, %v2932_v52  ;;  %v3019_v18 = vmul.f32 %v5118_v2, %v7160_v40  ;;  %v1548_v47 = vsel %vm1546_vm0, %v1543_v11, %v1517_v62  ;;  %v3029_v62 = vand.u32 2147483648, %v7160_v40  ;;  %vm7834_vm2 = vmmov %vm7826_vm3 }
 0x59d   : > { %v2941_v1 = vsel %vm2938_vm8, %v2940_v51, %v2936_v26  ;;  %v1553_v4 = vsel %vm1551_vm13, %v1548_v47, %v1533_v39  ;;  %v3435_v53 = vpop.permute.xlu0 %3434  ;;  %vm3024_vm7 = vweird.f32 %v5118_v2  ;;  %v3027_v21 = vand.u32 2147483647, %v7160_v40  ;;  %v5141_v40 = vld [vmem:[%s5381_s25 + $0x58] sm:$0xff]  ;;  %vm7835_vm3 = vmmov %vm7834_vm2 }
 0x59e   : > { %v2942_v42 = vmul.f32 %v2941_v1, %v7037_v49  ;;  %v3020_v41 = vsub.f32 1.0, %v3019_v18  ;;  %1557 = vst [vmem:[%s7196_s16 + $0x8] sm:$0xff] %v1553_v4  ;;  %v3440_v8 = vsel %vm7827_vm11, %v3435_v53, 0  ;;  %v4749_v49 = vld [vmem:[%s7586_s8 + $0x20] sm:$0xff]  ;;  %vm3025_vm4 = vmor %vm3023_vm12, %vm3024_vm7  ;;  %v3030_v15 = vor.u32 1.1754944e-38, %v3029_v62 }
 0x59f   : > { %3449 = vmatpush.bf16.msrb.mxu0 %v3440_v8  ;;  %vm3028_vm6 = vcmp.eq.f32.partialorder %v3027_v21, 8.507059e+37  ;;  %v3518_v52 = vunpack.c.l.b16 %v3063_v13  ;;  %v5143_v1 = vld [vmem:[%s5381_s25 + $0x60] sm:$0xff]  ;;  %v5147_v13 = vld [vmem:[%s5381_s25 + $0x70] sm:$0xff] }
 0x5a0   : > { %v3058_v58 = vpack.c.bf16 %v2942_v42, %v2942_v42  ;;  %v3021_v31 = vmul.f32 %v5118_v2, %v3020_v41  ;;  %v3849_v60 = vpop.f32.mrf.mxu1  ;;  %v7836_v42 = vld [vmem:[#allocation33_spill] sm:$0xff]  ;;  %v7837_v41 = vld [vmem:[#allocation28_spill] sm:$0xff] }
 0x5a1   : > { %v7207_v55 = vadd.f32 %v3950_v36, %v3849_v60  ;;  %v1435_v8 = vadd.f32 %v7837_v41, %v7836_v42 }
 0x5a2   : > { %v3429_v45 = vunpack.c.l.b16 %v3058_v58  ;;  %v3022_v61 = vadd.f32 %v5118_v2, %v3021_v31  ;;  %v7211_v16 = vpop.f32.mrf.mxu2  ;;  %v1519_v10 = vpop.permute.xlu2 %1518 }
 0x5a3   : > { %3576 = vmatpush.bf16.msra.mxu0 %v4750_v22  ;;  %4675 = vmatmul.msk.bf16.gmra.mxu1 %vm7828_vm14, %v3764_v33  ;;  %v1478_v31 = vadd.f32 %v7011_v30, %v1435_v8  ;;  %v7839_v33 = vld [vmem:[#allocation38_spill] sm:$0xff] }
 0x5a4   : > { %v3430_v56 = vpack.c.b16 %v3429_v45, %v3428_v43  ;;  %v3026_v20 = vsel %vm3025_vm4, %v5118_v2, %v3022_v61  ;;  %v7840_v43 = vld [vmem:[#allocation31_spill] sm:$0xff]  ;;  %v5144_v61 = vld [vmem:[%s5386_s13 + $0x8] sm:$0xff] }
 0x5a5   : > { %v3031_v12 = vsel %vm3028_vm6, %v3030_v15, %v3026_v20  ;;  %v3525_v29 = vpop.permute.xlu0 %3524  ;;  %v1442_v48 = vadd.f32 %v7840_v43, %v7839_v33  ;;  %v5145_v15 = vld [vmem:[%s5381_s25 + $0x68] sm:$0xff] }
 0x5a6   : > { %v3032_v50 = vmul.f32 %v3031_v12, %v7045_v9  ;;  %v3530_v27 = vsel %vm7829_vm5, %v3525_v29, 0  ;;  %4637 = vmatmul.msk.bf16.vlgmr.msrb.gmra.mxu0 %vm2168_vm1, %v3430_v56  ;;  %v1480_v9 = vadd.f32 %v7011_v30, %v1440_v5  ;;  %v5146_v29 = vld [vmem:[%s5386_s13 + $0x10] sm:$0xff] }
 0x5a7   : > { %3577 = vmatpush.bf16.msra.mxu0 %v4749_v49  ;;  %3539 = vmatpush.bf16.msra.mxu3 %v3530_v27 }
 0x5a8   : > { %4700 = vmatmul.msk.bf16.gmra.mxu2 %vm7830_vm10, %v5141_v40  ;;  %v3064_v37 = vpack.c.bf16 %v3032_v50, %v3032_v50  ;;  %v7221_v17 = vpop.f32.mrf.mxu1  ;;  %v5148_v50 = vld [vmem:[%s5386_s13 + $0x18] sm:$0xff] }
 0x5aa   : > { %v3519_v63 = vunpack.c.l.b16 %v3064_v37  ;;  %v3955_v36 = vpop.f32.mrf.mxu2  ;;  %v1535_v11 = vpop.permute.xlu2 %1534 }
 0x5ac   : > { %v3520_v2 = vpack.c.b16 %v3519_v63, %v3518_v52 }
 0x5ad   : > { %v1503_v0 = vpop.permute.xlu0 %1502 }
 0x5ae   : > { %v1544_v51 = vsel %vm7833_vm15, %v1480_v9, %v1503_v0  ;;  %4640 = vmatmul.msk.bf16.vlgmr.msra.gmra.mxu3 %vm2168_vm1, %v3520_v2  ;;  %vm7838_vm1 = vmmov %vm7834_vm2 }
 0x5af   : > { %v1549_v39 = vsel %vm1546_vm0, %v1544_v51, %v1519_v10  ;;  %v1542_v21 = vsel %vm7838_vm1, %v1478_v31, %v7125_v35  ;;  %vm7841_vm8 = vmmov %vm7838_vm1  ;;  %v1481_v35 = vadd.f32 %v7011_v30, %v1442_v48  ;;  %v5149_v30 = vld [vmem:[%s5381_s25 + $0x78] sm:$0xff]  ;;  %v5254_v51 = vmov 8.0  }
 0x5b0   : > { %v1554_v26 = vsel %vm1551_vm13, %v1549_v39, %v1535_v11  ;;  %v3854_v18 = vpop.f32.mrf.mxu1  ;;  %vm7842_vm9 = vmmov %vm7838_vm1  ;;  %5119 = vrcp.f32 %v5254_v51  ;;  %v5153_v11 = vld [vmem:[%s5386_s13 + $0x38] sm:$0xff]  ;;  %v3767_v48 = vpack.c.bf16 %v7123_v23, %v7114_v28 }
 0x5b1   : > { %1558 = vst [vmem:[%s7196_s16 + $0x10] sm:$0xff] %v1554_v26  ;;  %v7229_v47 = vadd.f32 %v3955_v36, %v3854_v18  ;;  %vm7843_vm11 = vmmov %vm7838_vm1  ;;  %v5152_v36 = vld [vmem:[%s5386_s13 + $0x30] sm:$0xff] }
 0x5b2   : > { %v7231_v22 = vpop.f32.mrf.mxu2  ;;  %v1545_v56 = vsel %vm7843_vm11, %v1481_v35, %v7135_v59  ;;  %vm7844_vm7 = vmmov %vm7838_vm1 }
 0x5b3   : > { %vm7845_vm12 = vmmov %vm7838_vm1 }
 0x5b4   : > { %vm7846_vm4 = vmmov %vm7838_vm1 }
 0x5b5   : > { %v1515_v24 = vpop.permute.xlu0 %1514  ;;  %vm7847_vm14 = vmmov %vm7838_vm1 }
 0x5b6   : > { %4649 = vmatmul.msk.bf16.vlgmr.msra.gmra.mxu0 %vm7834_vm2, %v5142_v32  ;;  %v1547_v60 = vsel %vm1546_vm0, %v1542_v21, %v1515_v24  ;;  %vm7848_vm6 = vmmov %vm7838_vm1  ;;  %v5120_v18 = vpop.eup %5119 }
 0x5b7   : > { %vm7849_vm5 = vmmov %vm7838_vm1 }
 0x5b8   : > { %4701 = vmatmul.msk.bf16.gmra.mxu2 %vm7835_vm3, %v5143_v1  ;;  %v7237_v4 = vpop.f32.mrf.mxu1  ;;  %vm7850_vm10 = vmmov %vm7838_vm1  ;;  %v3732_v1 = vmul.f32 8.0, %v5120_v18 }
 0x5b9   : > { %vm7851_vm15 = vmmov %vm7838_vm1 }
 0x5ba   : > { %v3960_v14 = vpop.f32.mrf.mxu2  ;;  %vm7852_vm2 = vmmov %vm7838_vm1 }
 0x5bb   : > { %vm7853_vm3 = vmmov %vm7838_vm1 }
 0x5bc   : > { %vm7855_vm11 = vmmov %vm7838_vm1 }
 0x5bd   : > { %v1521_v53 = vpop.permute.xlu0 %1520 }
 0x5be   : > { %v1550_v20 = vsel %vm1546_vm0, %v1545_v56, %v1521_v53  ;;  %v3733_v53 = vsub.f32 1.0, %v3732_v1 }
 0x5c0   : > { %v3859_v62 = vpop.f32.mrf.mxu1  ;;  %v3734_v31 = vmul.f32 %v5120_v18, %v3733_v53 }
 0x5c1   : > { %v7241_v58 = vadd.f32 %v3960_v14, %v3859_v62 }
 0x5c2   : > { %v7274_v5 = vpop.f32.mrf.mxu2 }
 0x5c5   : > { %v1531_v49 = vpop.permute.xlu0 %1530 }
 0x5c6   : > { %v1552_v45 = vsel %vm1551_vm13, %v1547_v60, %v1531_v49  ;;  %4650 = vmatmul.msk.bf16.gmra.mxu0 %vm7841_vm8, %v5144_v61  ;;  %v3735_v49 = vadd.f32 %v5120_v18, %v3734_v31  ;;  %vm3736_vm8 = vweird.f32 %v5120_v18 }
 0x5c7   : > { %1556 = vst [vmem:[%s7196_s16] sm:$0xff] %v1552_v45 }
 0x5c8   : > { %4702 = vmatmul.msk.bf16.gmra.mxu2 %vm7842_vm9, %v5145_v15  ;;  %v7276_v37 = vpop.f32.mrf.mxu1  ;;  %vm7854_vm9 = vmmov %vm7838_vm1 }
 0x5ca   : > { %v7278_v52 = vpop.f32.mrf.mxu2 }
 0x5cd   : > { %v1537_v12 = vpop.permute.xlu0 %1536 }
 0x5ce   : > { %v1555_v10 = vsel %vm1551_vm13, %v1550_v20, %v1537_v12  ;;  %v7307_v20 = vsel %vm3736_vm8, %v5120_v18, %v3735_v49  ;;  %vm7866_vm8 = vmmov %vm7838_vm1 }
 0x5cf   : > { %1559 = vst [vmem:[%s7196_s16 + $0x18] sm:$0xff] %v1555_v10 }
 0x5d0   : > { %v7280_v63 = vpop.f32.mrf.mxu1 }
 0x5d2   : > { %v7284_v9 = vpop.f32.mrf.mxu2 }
 0x5d6   : > { %4651 = vmatmul.msk.bf16.gmra.mxu0 %vm7844_vm7, %v5146_v29  ;;  %v3943_v29 = vadd.f32 %v7132_v46, %v7141_v38  ;;  %vm7856_vm7 = vmmov %vm7838_vm1  ;;  %v3948_v46 = vadd.f32 %v7152_v54, %v7171_v19 }
 0x5d8   : > { %4703 = vmatmul.msk.bf16.gmra.mxu2 %vm7845_vm12, %v5147_v13  ;;  %v7286_v2 = vpop.f32.mrf.mxu1  ;;  %vm7857_vm12 = vmmov %vm7838_vm1 }
 0x5da   : > { %v7290_v39 = vpop.f32.mrf.mxu2 }
 0x5e0   : > { %v7292_v26 = vpop.f32.mrf.mxu1 }
 0x5e2   : > { %v7295_v42 = vpop.f32.mrf.mxu2 }
 0x5e6   : > { %4652 = vmatmul.msk.bf16.gmra.mxu0 %vm7846_vm4, %v5148_v50  ;;  %vm7858_vm4 = vmmov %vm7838_vm1 }
 0x5e8   : > { %4704 = vmatmul.msk.bf16.gmra.mxu2 %vm7847_vm14, %v5149_v30  ;;  %v7297_v8 = vpop.f32.mrf.mxu1  ;;  %vm7859_vm14 = vmmov %vm7838_vm1 }
 0x5ea   : > { %v7303_v61 = vpop.f32.mrf.mxu2 }
 0x5ec   : > { %v3421_v59 = vpop.f32.mrf.mxu3 }
 0x5f0   : > { %v7305_v56 = vpop.f32.mrf.mxu1 }
 0x5f4   : > { %v3423_v27 = vpop.f32.mrf.mxu3 }
 0x5f5   : > { %v3765_v40 = vpack.c.bf16 %v3423_v27, %v3421_v59 }
 0x5f6   : > { %4653 = vmatmul.msk.bf16.gmra.mxu0 %vm7848_vm6, %v5150_v6  ;;  %vm7860_vm6 = vmmov %vm7838_vm1 }
 0x5f7   : > { %4676 = vmatmul.msk.bf16.gmra.mxu1 %vm7849_vm5, %v3765_v40  ;;  %vm7861_vm5 = vmmov %vm7838_vm1 }
 0x5f8   : > { %v7321_v51 = vpop.f32.mrf.mxu1 }
 0x606   : > { %4654 = vmatmul.msk.bf16.gmra.mxu0 %vm7850_vm10, %v5151_v57  ;;  %v7319_v57 = vpop.f32.mrf.mxu2  ;;  %vm7862_vm10 = vmmov %vm7838_vm1 }
 0x60e   : > { %v7338_v31 = vpop.f32.mrf.mxu2 }
 0x616   : > { %4655 = vmatmul.msk.bf16.gmra.mxu0 %vm7851_vm15, %v5152_v36  ;;  %vm7863_vm15 = vmmov %vm7838_vm1 }
 0x623   : > { %v3451_v0 = vpop.f32.mrf.mxu0 }
 0x626   : > { %4656 = vmatmul.msk.bf16.gmra.mxu0 %vm7852_vm2, %v5153_v11  ;;  %vm7864_vm2 = vmmov %vm7838_vm1 }
 0x62b   : > { %v3453_v24 = vpop.f32.mrf.mxu0 }
 0x62c   : > { %v3766_v32 = vpack.c.bf16 %v3453_v24, %v3451_v0 }
 0x62e   : > { %4677 = vmatmul.msk.bf16.gmra.mxu1 %vm7853_vm3, %v3766_v32  ;;  %vm7865_vm3 = vmmov %vm7838_vm1 }
 0x631   : > { %v3541_v54 = vpop.f32.mrf.mxu3 }
 0x633   : > { %v3579_v41 = vpop.f32.mrf.mxu0 }
 0x634   : > { %v3619_v14 = vsel %vm7838_vm1, %v3579_v41, 0.0 }
 0x635   : > { %v3620_v62 = vrot.slane %v3619_v14, 4 }
 0x637   : > { %v3621_v21 = vadd.f32 %v3620_v62, %v3619_v14  ;;  %v3953_v62 = vadd.f32 %v7211_v16, %v7221_v17  ;;  %v3958_v17 = vadd.f32 %v7231_v22, %v7237_v4 }
 0x639   : > { %v3622_v60 = vrot.slane %v3621_v21, 2 }
 0x63b   : > { %v3623_v33 = vadd.f32 %v3622_v60, %v3621_v21  ;;  %v3581_v43 = vpop.f32.mrf.mxu0  ;;  %v7341_v60 = vpop.f32.mrf.mxu1 }
 0x63c   : > { %v3626_v45 = vsel %vm7854_vm9, %v3581_v43, 0.0  ;;  %vm7867_vm9 = vmmov %vm7838_vm1 }
 0x63d   : > { %v3624_v15 = vrot.slane %v3623_v33, 1  ;;  %v3627_v35 = vrot.slane %v3626_v45, 4 }
 0x63e   : > { %4678 = vmatmul.msk.bf16.gmra.mxu1 %vm7855_vm11, %v3767_v48  ;;  %vm7868_vm11 = vmmov %vm7838_vm1 }
 0x63f   : > { %v3625_v12 = vadd.f32 %v3624_v15, %v3623_v33  ;;  %v3628_v10 = vadd.f32 %v3627_v35, %v3626_v45  ;;  %v3543_v15 = vpop.f32.mrf.mxu3 }
 0x641   : > { %v3738_v13 = vmul.f32 %v7307_v20, %v3625_v12  ;;  %v3629_v28 = vrot.slane %v3628_v10, 2 }
 0x643   : > { %v3630_v23 = vadd.f32 %v3629_v28, %v3628_v10  ;;  %v3584_v50 = vpop.f32.mrf.mxu0  ;;  %v7313_v30 = vadd.f32 %v3943_v29, %v3738_v13  ;;  %v7316_v59 = vadd.f32 %v7129_v34, %v3738_v13  ;;  %v7352_v10 = vpop.f32.mrf.mxu2 }
 0x644   : > { %v3633_v27 = vsel %vm7856_vm7, %v3584_v50, 0.0  ;;  %v3769_v50 = vpack.c.bf16 %v3543_v15, %v3541_v54  ;;  %vm7869_vm7 = vmmov %vm7838_vm1 }
 0x645   : > { %v3631_v40 = vrot.slane %v3630_v23, 1  ;;  %v3634_v6 = vrot.slane %v3633_v27, 4 }
 0x647   : > { %v3632_v36 = vadd.f32 %v3631_v40, %v3630_v23  ;;  %v3635_v0 = vadd.f32 %v3634_v6, %v3633_v27  ;;  %v7359_v23 = vpop.f32.mrf.mxu1 }
 0x649   : > { %v3739_v38 = vmul.f32 %v7307_v20, %v3632_v36  ;;  %v3636_v11 = vrot.slane %v3635_v0, 2  ;;  %v3963_v36 = vadd.f32 %v7274_v5, %v7276_v37 }
 0x64b   : > { %v3637_v18 = vadd.f32 %v3636_v11, %v3635_v0  ;;  %v3586_v24 = vpop.f32.mrf.mxu0  ;;  %v7326_v34 = vadd.f32 %v3948_v46, %v3739_v38  ;;  %v7329_v32 = vadd.f32 %v7146_v7, %v3739_v38 }
 0x64c   : > { %v3640_v1 = vsel %vm7857_vm12, %v3586_v24, 0.0  ;;  %vm7870_vm12 = vmmov %vm7838_vm1 }
 0x64d   : > { %v3638_v53 = vrot.slane %v3637_v18, 1  ;;  %v3641_v41 = vrot.slane %v3640_v1, 4 }
 0x64e   : > { %4679 = vmatmul.msk.bf16.gmra.mxu1 %vm7858_vm4, %v3768_v25  ;;  %vm7871_vm4 = vmmov %vm7838_vm1 }
 0x64f   : > { %v3639_v19 = vadd.f32 %v3638_v53, %v3637_v18  ;;  %v3642_v14 = vadd.f32 %v3641_v41, %v3640_v1  ;;  %v7369_v18 = vld [vmem:[%s7587_s9] ss:$0 sm:$0xff]  ;;  %v7373_v53 = vpop.f32.mrf.mxu2 }
 0x651   : > { %v3740_v7 = vmul.f32 %v7307_v20, %v3639_v19  ;;  %v3643_v21 = vrot.slane %v3642_v14, 2  ;;  %v7377_v19 = vpop.f32.mrf.mxu1 }
 0x653   : > { %v3644_v49 = vadd.f32 %v3643_v21, %v3642_v14  ;;  %v3589_v33 = vpop.f32.mrf.mxu0  ;;  %v7344_v43 = vadd.f32 %v7207_v55, %v3740_v7  ;;  %v7346_v44 = vadd.f32 %v3953_v62, %v3740_v7  ;;  %v3968_v7 = vadd.f32 %v7284_v9, %v7286_v2 }
 0x654   : > { %v3647_v3 = vsel %vm7859_vm14, %v3589_v33, 0.0  ;;  %v3971_v2 = vadd.f32 %v7290_v39, %v7292_v26  ;;  %v3976_v26 = vadd.f32 %v7303_v61, %v7305_v56 }
 0x655   : > { %v3645_v25 = vrot.slane %v3644_v49, 1  ;;  %v3648_v48 = vrot.slane %v3647_v3, 4 }
 0x657   : > { %v3646_v45 = vadd.f32 %v3645_v25, %v3644_v49  ;;  %v3649_v16 = vadd.f32 %v3648_v48, %v3647_v3 }
 0x659   : > { %v3741_v35 = vmul.f32 %v7307_v20, %v3646_v45  ;;  %v3650_v12 = vrot.slane %v3649_v16, 2  ;;  %v3886_v9 = vpop.f32.mrf.mxu1 }
 0x65b   : > { %v3651_v29 = vadd.f32 %v3650_v12, %v3649_v16  ;;  %v3591_v55 = vpop.f32.mrf.mxu0  ;;  %v7354_v13 = vadd.f32 %v3958_v17, %v3741_v35  ;;  %v7357_v28 = vadd.f32 %v7229_v47, %v3741_v35  ;;  %v3987_v12 = vpop.f32.mrf.mxu2 }
 0x65c   : > { %v3654_v27 = vsel %vm7860_vm6, %v3591_v55, 0.0 }
 0x65d   : > { %v3652_v40 = vrot.slane %v3651_v29, 1  ;;  %v3655_v22 = vrot.slane %v3654_v27, 4 }
 0x65e   : > { %4680 = vmatmul.msk.bf16.gmra.mxu1 %vm7861_vm5, %v3769_v50 }
 0x65f   : > { %v3653_v4 = vadd.f32 %v3652_v40, %v3651_v29  ;;  %v3656_v6 = vadd.f32 %v3655_v22, %v3654_v27  ;;  %v3973_v29 = vadd.f32 %v7295_v42, %v7297_v8  ;;  %v3978_v42 = vadd.f32 %v7319_v57, %v7321_v51 }
 0x660   : > { %v3981_v57 = vadd.f32 %v7338_v31, %v7341_v60  ;;  %v3983_v51 = vadd.f32 %v7352_v10, %v7359_v23  ;;  %v3986_v10 = vadd.f32 %v7373_v53, %v7377_v19  ;;  %v3988_v23 = vadd.f32 %v3987_v12, %v3886_v9 }
 0x661   : > { %v3742_v0 = vmul.f32 %v7307_v20, %v3653_v4  ;;  %v3657_v46 = vrot.slane %v3656_v6, 2 }
 0x663   : > { %v3658_v38 = vadd.f32 %v3657_v46, %v3656_v6  ;;  %v3594_v47 = vpop.f32.mrf.mxu0  ;;  %v4029_v11 = vadd.f32 %v3963_v36, %v3742_v0  ;;  %v4028_v24 = vadd.f32 %v7241_v58, %v3742_v0  ;;  %v3966_v58 = vadd.f32 %v7278_v52, %v7280_v63  ;;  %v3990_v8 = vpop.f32.mrf.mxu2 }
 0x664   : > { %v3661_v1 = vsel %vm7862_vm10, %v3594_v47, 0.0 }
 0x665   : > { %v3659_v41 = vrot.slane %v3658_v38, 1  ;;  %v3662_v54 = vrot.slane %v3661_v1, 4  ;;  %v4065_v5 = vadd.f32 %v7369_v18, %v4029_v11  ;;  %v4064_v37 = vadd.f32 %v7369_v18, %v4028_v24 }
 0x667   : > { %v3660_v14 = vadd.f32 %v3659_v41, %v3658_v38  ;;  %v3663_v62 = vadd.f32 %v3662_v54, %v3661_v1  ;;  %4098 = vrot.lane.b32.xlu1 %v4065_v5, %s5251_s24  ;;  %4096 = vrot.lane.b32.xlu0 %v4064_v37, %s5251_s24  ;;  %v3889_v1 = vpop.f32.mrf.mxu1 }
 0x668   : > { %v3991_v19 = vadd.f32 %v3990_v8, %v3889_v1 }
 0x669   : > { %v3743_v21 = vmul.f32 %v7307_v20, %v3660_v14  ;;  %v3664_v49 = vrot.slane %v3663_v62, 2 }
 0x66b   : > { %v3665_v33 = vadd.f32 %v3664_v49, %v3663_v62  ;;  %v3596_v3 = vpop.f32.mrf.mxu0  ;;  %v4031_v25 = vadd.f32 %v3968_v7, %v3743_v21  ;;  %v4030_v48 = vadd.f32 %v3966_v58, %v3743_v21 }
 0x66c   : > { %v3668_v45 = vsel %vm7863_vm15, %v3596_v3, 0.0  ;;  %v3992_v3 = vpop.f32.mrf.mxu2 }
 0x66d   : > { %v3666_v16 = vrot.slane %v3665_v33, 1  ;;  %v3669_v17 = vrot.slane %v3668_v45, 4  ;;  %v4067_v15 = vadd.f32 %v7369_v18, %v4031_v25  ;;  %v4066_v35 = vadd.f32 %v7369_v18, %v4030_v48 }
 0x66f   : > { %v3667_v52 = vadd.f32 %v3666_v16, %v3665_v33  ;;  %v3670_v63 = vadd.f32 %v3669_v17, %v3668_v45  ;;  %4102 = vrot.lane.b32.xlu1 %v4067_v15, %s5251_s24  ;;  %4100 = vrot.lane.b32.xlu0 %v4066_v35, %s5251_s24  ;;  %v3891_v17 = vpop.f32.mrf.mxu1 }
 0x670   : > { %v3993_v12 = vadd.f32 %v3992_v3, %v3891_v17 }
 0x671   : > { %v3744_v55 = vmul.f32 %v7307_v20, %v3667_v52  ;;  %v3671_v50 = vrot.slane %v3670_v63, 2 }
 0x673   : > { %v3672_v27 = vadd.f32 %v3671_v50, %v3670_v63  ;;  %v3599_v40 = vpop.f32.mrf.mxu0  ;;  %v4033_v22 = vadd.f32 %v3973_v29, %v3744_v55  ;;  %v4032_v4 = vadd.f32 %v3971_v2, %v3744_v55 }
 0x674   : > { %v3675_v6 = vsel %vm7864_vm2, %v3599_v40, 0.0  ;;  %v3995_v50 = vpop.f32.mrf.mxu2 }
 0x675   : > { %v3673_v36 = vrot.slane %v3672_v27, 1  ;;  %v3676_v0 = vrot.slane %v3675_v6, 4  ;;  %v4069_v46 = vadd.f32 %v7369_v18, %v4033_v22  ;;  %v4068_v38 = vadd.f32 %v7369_v18, %v4032_v4 }
 0x677   : > { %v3674_v47 = vadd.f32 %v3673_v36, %v3672_v27  ;;  %v3677_v39 = vadd.f32 %v3676_v0, %v3675_v6  ;;  %4106 = vrot.lane.b32.xlu0 %v4069_v46, %s5251_s24  ;;  %4104 = vrot.lane.b32.xlu2 %v4068_v38, %s5251_s24  ;;  %v3894_v6 = vpop.f32.mrf.mxu1 }
 0x678   : > { %v3996_v1 = vadd.f32 %v3995_v50, %v3894_v6 }
 0x679   : > { %v3745_v11 = vmul.f32 %v7307_v20, %v3674_v47  ;;  %v3678_v24 = vrot.slane %v3677_v39, 2 }
 0x67b   : > { %v3679_v41 = vadd.f32 %v3678_v24, %v3677_v39  ;;  %v3601_v54 = vpop.f32.mrf.mxu0  ;;  %v4035_v5 = vadd.f32 %v3978_v42, %v3745_v11  ;;  %v4034_v37 = vadd.f32 %v3976_v26, %v3745_v11 }
 0x67c   : > { %v3682_v14 = vsel %vm7865_vm3, %v3601_v54, 0.0 }
 0x67d   : > { %v3680_v62 = vrot.slane %v3679_v41, 1  ;;  %v3683_v58 = vrot.slane %v3682_v14, 4  ;;  %v4071_v7 = vadd.f32 %v7369_v18, %v4035_v5  ;;  %v4070_v61 = vadd.f32 %v7369_v18, %v4034_v37  ;;  %v3997_v5 = vpop.f32.mrf.mxu2 }
 0x67f   : > { %v3681_v56 = vadd.f32 %v3680_v62, %v3679_v41  ;;  %v3684_v21 = vadd.f32 %v3683_v58, %v3682_v14  ;;  %4110 = vrot.lane.b32.xlu2 %v4071_v7, %s5251_s24  ;;  %4108 = vrot.lane.b32.xlu1 %v4070_v61, %s5251_s24  ;;  %v3896_v7 = vpop.f32.mrf.mxu1  ;;  %s4234_s24 = sshll.u32 %s7196_s16, 4  ;;  %s4217_s16 = scalar_lea.sflag [#allocation3], %s7164_s29  ;;  %s7463_s24 = int_to_ptr.vmem [resolvable:$true] %s4234_s24 }
 0x681   : > { %v3746_v49 = vmul.f32 %v7307_v20, %v3681_v56  ;;  %v3685_v33 = vrot.slane %v3684_v21, 2  ;;  %v3998_v56 = vadd.f32 %v3997_v5, %v3896_v7 }
 0x683   : > { %v3686_v25 = vadd.f32 %v3685_v33, %v3684_v21  ;;  %v3604_v48 = vpop.f32.mrf.mxu0  ;;  %v4037_v45 = vadd.f32 %v3983_v51, %v3746_v49  ;;  %v4036_v16 = vadd.f32 %v3981_v57, %v3746_v49 }
 0x684   : > { %v3689_v15 = vsel %vm7838_vm1, %v3604_v48, 0.0 }
 0x685   : > { %v3687_v35 = vrot.slane %v3686_v25, 1  ;;  %v3690_v52 = vrot.slane %v3689_v15, 4  ;;  %v4073_v63 = vadd.f32 %v7369_v18, %v4037_v45  ;;  %v4072_v31 = vadd.f32 %v7369_v18, %v4036_v16  ;;  %v4000_v48 = vpop.f32.mrf.mxu2 }
 0x687   : > { %v3688_v60 = vadd.f32 %v3687_v35, %v3686_v25  ;;  %v3691_v2 = vadd.f32 %v3690_v52, %v3689_v15  ;;  %4130 = vrot.lane.b32.xlu2 %v4073_v63, %s5252_s4  ;;  %4128 = vrot.lane.b32.xlu1 %v4072_v31, %s5252_s4 }
 0x689   : > { %v3747_v29 = vmul.f32 %v7307_v20, %v3688_v60  ;;  %v3692_v55 = vrot.slane %v3691_v2, 2 }
 0x68b   : > { %v3693_v27 = vadd.f32 %v3692_v55, %v3691_v2  ;;  %v3606_v40 = vpop.f32.mrf.mxu0  ;;  %v4039_v22 = vadd.f32 %v3988_v23, %v3747_v29  ;;  %v4038_v4 = vadd.f32 %v3986_v10, %v3747_v29 }
 0x68c   : > { %v3696_v36 = vsel %vm7866_vm8, %v3606_v40, 0.0 }
 0x68d   : > { %v3694_v0 = vrot.slane %v3693_v27, 1  ;;  %v3697_v46 = vrot.slane %v3696_v36, 4  ;;  %v4075_v38 = vadd.f32 %v7369_v18, %v4039_v22  ;;  %v4074_v47 = vadd.f32 %v7369_v18, %v4038_v4  ;;  %v4002_v63 = vpop.f32.mrf.mxu2 }
 0x68f   : > { %v3695_v39 = vadd.f32 %v3694_v0, %v3693_v27  ;;  %v3698_v53 = vadd.f32 %v3697_v46, %v3696_v36  ;;  %4134 = vrot.lane.b32.xlu1 %v4075_v38, %s5252_s4  ;;  %4132 = vrot.lane.b32.xlu0 %v4074_v47, %s5252_s4 }
 0x691   : > { %v3748_v9 = vmul.f32 %v7307_v20, %v3695_v39  ;;  %v3699_v26 = vrot.slane %v3698_v53, 2 }
 0x693   : > { %v3700_v42 = vadd.f32 %v3699_v26, %v3698_v53  ;;  %v4041_v11 = vadd.f32 %v3993_v12, %v3748_v9  ;;  %v4040_v24 = vadd.f32 %v3991_v19, %v3748_v9  ;;  %v3609_v41 = vpop.f32.mrf.mxu0 }
 0x694   : > { %v3703_v54 = vsel %vm7867_vm9, %v3609_v41, 0.0 }
 0x695   : > { %v3701_v37 = vrot.slane %v3700_v42, 1  ;;  %v4077_v14 = vadd.f32 %v7369_v18, %v4041_v11  ;;  %v4076_v62 = vadd.f32 %v7369_v18, %v4040_v24  ;;  %v3704_v58 = vrot.slane %v3703_v54, 4  ;;  %v4005_v40 = vpop.f32.mrf.mxu2 }
 0x697   : > { %v3702_v61 = vadd.f32 %v3701_v37, %v3700_v42  ;;  %4138 = vrot.lane.b32.xlu0 %v4077_v14, %s5252_s4  ;;  %4136 = vrot.lane.b32.xlu2 %v4076_v62, %s5252_s4  ;;  %v3705_v8 = vadd.f32 %v3704_v58, %v3703_v54 }
 0x699   : > { %v3749_v21 = vmul.f32 %v7307_v20, %v3702_v61  ;;  %v3706_v57 = vrot.slane %v3705_v8, 2 }
 0x69b   : > { %v4043_v51 = vadd.f32 %v3998_v56, %v3749_v21  ;;  %v4042_v49 = vadd.f32 %v3996_v1, %v3749_v21  ;;  %v3611_v33 = vpop.f32.mrf.mxu0  ;;  %v3707_v45 = vadd.f32 %v3706_v57, %v3705_v8 }
 0x69c   : > { %v3710_v16 = vsel %vm7868_vm11, %v3611_v33, 0.0 }
 0x69d   : > { %v4079_v3 = vadd.f32 %v7369_v18, %v4043_v51  ;;  %v4078_v25 = vadd.f32 %v7369_v18, %v4042_v49  ;;  %v3708_v17 = vrot.slane %v3707_v45, 1  ;;  %v3711_v15 = vrot.slane %v3710_v16, 4  ;;  %v4007_v12 = vpop.f32.mrf.mxu2 }
 0x69f   : > { %4142 = vrot.lane.b32.xlu2 %v4079_v3, %s5252_s4  ;;  %4140 = vrot.lane.b32.xlu1 %v4078_v25, %s5252_s4  ;;  %v3709_v35 = vadd.f32 %v3708_v17, %v3707_v45  ;;  %v3712_v52 = vadd.f32 %v3711_v15, %v3710_v16  ;;  %s4751_s4 = sshll.u32 %s5338_s21, 5 }
 0x6a0   : > { %s4233_s22 = scalar_lea.hbm %s7588_s10, %s4751_s4 }
 0x6a1   : > { %v3750_v31 = vmul.f32 %v7307_v20, %v3709_v35  ;;  %v3713_v60 = vrot.slane %v3712_v52, 2  ;;  %s4236_s15 = sshll.u32 %s4233_s22, 4  ;;  %s4237_s15 = int_to_ptr.hbm [resolvable:$true] %s4236_s15 }
 0x6a2   : > { %s5168_s25 = sshra.s32 %s4237_s15, 4  ;;  %s5169_s25 = int_to_ptr.hbm [resolvable:$true] %s5168_s25 }
 0x6a3   : > { %v3714_v29 = vadd.f32 %v3713_v60, %v3712_v52  ;;  %v3614_v55 = vpop.f32.mrf.mxu0  ;;  %v4063_v52 = vadd.f32 %v7369_v18, %v7354_v13  ;;  %s5170_s13 = scalar_lea.hbm %s5169_s25, 32  ;;  %p5175_p0 = scmp.lt.s32.totalorder %s5169_s25, %s7588_s10 }
 0x6a4   : > { %v3717_v50 = vsel %vm7869_vm7, %v3614_v55, 0.0  ;;  %p5171_p11 = scmp.ne.s32.totalorder %s5169_s25, %s5170_s13  ;;  %p5176_p1 = scmp.lt.s32.totalorder %s5174_s14, %s5170_s13 }
 0x6a5   : > { %v3715_v22 = vrot.slane %v3714_v29, 1  ;;  %v3718_v4 = vrot.slane %v3717_v50, 4  ;;  %v4010_v62 = vpop.f32.mrf.mxu2 }
 0x6a6   : > { %p5172_p12 = pnand %p5171_p11, %p5355_p5  ;;  %p5177_p2 = por %p5176_p1, %p5175_p0 }
 0x6a7   : > { %v3716_v0 = vadd.f32 %v3715_v22, %v3714_v29  ;;  %v3719_v38 = vadd.f32 %v3718_v4, %v3717_v50 }
 0x6a8   : > { %p5173_p13 = pneg %p5172_p12 }
 0x6a9   : > { %v3751_v39 = vmul.f32 %v7307_v20, %v3716_v0  ;;  %v3720_v53 = vrot.slane %v3719_v38, 2 }
 0x6aa   : > { %p5178_p3 = pnand %p5177_p2, %p5173_p13 }
 0x6ab   : > { %v3899_v2 = vpop.f32.mrf.mxu1  ;;  %v3721_v42 = vadd.f32 %v3720_v53, %v3719_v38  ;;  %v3616_v11 = vpop.f32.mrf.mxu0 }
 0x6ac   : > { %v4001_v10 = vadd.f32 %v4000_v48, %v3899_v2  ;;  %v3724_v41 = vsel %vm7870_vm12, %v3616_v11, 0.0 }
 0x6ad   : > { %v3722_v54 = vrot.slane %v3721_v42, 1  ;;  %v3725_v14 = vrot.slane %v3724_v41, 4  ;;  %v4012_v49 = vpop.f32.mrf.mxu2 }
 0x6ae   : > { %v4044_v23 = vadd.f32 %v4001_v10, %v3750_v31 }
 0x6af   : > { %v3723_v58 = vadd.f32 %v3722_v54, %v3721_v42  ;;  %v3726_v8 = vadd.f32 %v3725_v14, %v3724_v41 }
 0x6b0   : > { %v4080_v27 = vadd.f32 %v7369_v18, %v4044_v23 }
 0x6b1   : > { %v3752_v1 = vmul.f32 %v7307_v20, %v3723_v58  ;;  %v3727_v57 = vrot.slane %v3726_v8, 2 }
 0x6b2   : > { %4160 = vrot.lane.b32.xlu1 %v4080_v27, %s7607_s12 }
 0x6b3   : > { %v3901_v6 = vpop.f32.mrf.mxu1  ;;  %v3728_v33 = vadd.f32 %v3727_v57, %v3726_v8 }
 0x6b4   : > { %v4003_v36 = vadd.f32 %v4002_v63, %v3901_v6 }
 0x6b5   : > { %v3729_v45 = vrot.slane %v3728_v33, 1 }
 0x6b6   : > { %v4045_v46 = vadd.f32 %v4003_v36, %v3750_v31  ;;  %v4015_v31 = vpop.f32.mrf.mxu2 }
 0x6b7   : > { %v3730_v15 = vadd.f32 %v3729_v45, %v3728_v33 }
 0x6b8   : > { %v4081_v47 = vadd.f32 %v7369_v18, %v4045_v46 }
 0x6ba   : > { %4162 = vrot.lane.b32.xlu2 %v4081_v47, %s7607_s12 }
 0x6bb   : > { %v3904_v19 = vpop.f32.mrf.mxu1 }
 0x6bc   : > { %v4006_v9 = vadd.f32 %v4005_v40, %v3904_v19 }
 0x6be   : > { %v4046_v26 = vadd.f32 %v4006_v9, %v3751_v39 }
 0x6c0   : > { %v4082_v24 = vadd.f32 %v7369_v18, %v4046_v26 }
 0x6c2   : > { %4164 = vrot.lane.b32.xlu0 %v4082_v24, %s7607_s12 }
 0x6c3   : > { %v3906_v5 = vpop.f32.mrf.mxu1 }
 0x6c4   : > { %v4008_v37 = vadd.f32 %v4007_v12, %v3906_v5 }
 0x6c6   : > { %v4047_v7 = vadd.f32 %v4008_v37, %v3751_v39 }
 0x6c8   : > { %v4083_v61 = vadd.f32 %v7369_v18, %v4047_v7 }
 0x6ca   : > { %4166 = vrot.lane.b32.xlu1 %v4083_v61, %s7607_s12 }
 0x6cb   : > { %v3909_v56 = vpop.f32.mrf.mxu1 }
 0x6cc   : > { %v4011_v21 = vadd.f32 %v4010_v62, %v3909_v56 }
 0x6ce   : > { %v4048_v51 = vadd.f32 %v4011_v21, %v3752_v1 }
 0x6d0   : > { %v4084_v3 = vadd.f32 %v7369_v18, %v4048_v51 }
 0x6d1   : > { %v7455_v25 = vpop.permute.xlu2 %4104 }
 0x6d2   : > { %4168 = vrot.lane.b32.xlu2 %v4084_v3, %s7607_s12 }
 0x6d3   : > { %v3911_v48 = vpop.f32.mrf.mxu1 }
 0x6d4   : > { %v4013_v16 = vadd.f32 %v4012_v49, %v3911_v48 }
 0x6d6   : > { %v4049_v17 = vadd.f32 %v4013_v16, %v3752_v1 }
 0x6d8   : > { %v4085_v35 = vadd.f32 %v7369_v18, %v4049_v17 }
 0x6d9   : > { %v4111_v63 = vpop.permute.xlu2 %4110 }
 0x6da   : > { %v7469_v60 = vsel %vm7871_vm4, %v4063_v52, %v4111_v63  ;;  %4170 = vrot.lane.b32.xlu0 %v4085_v35, %s7607_s12 }
 0x6db   : > { %v3914_v2 = vpop.f32.mrf.mxu1 }
 0x6dc   : > { %5181 = shalt.err (!%p5178_p3)
}
 0x6dd   : > { %s5255_s12 = smov 128   ;;  %s5256_s1 = smov 8   ;;  %v3753_v13 = vmul.f32 %v7307_v20, %v3730_v15  ;;  %v4016_v10 = vadd.f32 %v4015_v31, %v3914_v2  ;;  %v4099_v29 = vpop.permute.xlu1 %4098  ;;  %v4017_v27 = vpop.f32.mrf.mxu2  ;;  %v4062_v20 = vadd.f32 %v7369_v18, %v7357_v28  ;;  %vm7873_vm14 = vmmov %vm7838_vm1  ;;  %v4057_v12 = vadd.f32 %v7369_v18, %v7313_v30 }
 0x6de   : > { %4838 = dma.vmem_to_hbm [thread:$0]  (%p5355_p5), %s7463_s24, 512, %s4237_s15, %s4217_s16, %s5255_s12, %s5255_s12, %s5256_s1   ;;  %v4097_v47 = vpop.permute.xlu0 %4096  ;;  %vm7874_vm6 = vmmov %vm7838_vm1  ;;  %v4056_v54 = vadd.f32 %v7369_v18, %v7316_v59  ;;  %v4060_v58 = vadd.f32 %v7369_v18, %v7344_v43  ;;  %v4058_v56 = vadd.f32 %v7369_v18, %v7329_v32  ;;  %v4059_v49 = vadd.f32 %v7369_v18, %v7326_v34 }
 0x6df   : > { %v4050_v23 = vadd.f32 %v4016_v10, %v3753_v13  ;;  %s7872_s0 = smov 96   ;;  %s4390_s24 = sshll.u32 %s7164_s29, 6  ;;  %v4185_v9 = vsel %vm7874_vm6, %v4057_v12, %v4099_v29  ;;  %vm7875_vm5 = vmmov %vm7838_vm1  ;;  %v4061_v34 = vadd.f32 %v7369_v18, %v7346_v44 }
 0x6e0   : > { %s7501_s15 = scalar_lea.vmem [#allocation4], %s4390_s24  ;;  %v4184_v5 = vsel %vm7875_vm5, %v4056_v54, %v4097_v47  ;;  %vm7876_vm10 = vmmov %vm7838_vm1  ;;  %s4752_s16 = sshll.u32 %s5338_s21, 6 }
 0x6e1   : > { %v4086_v55 = vadd.f32 %v7369_v18, %v4050_v23  ;;  %v4131_v46 = vpop.permute.xlu2 %4130  ;;  %v4188_v7 = vsel %vm7876_vm10, %v4060_v58, %v7455_v25  ;;  %vm7877_vm15 = vmmov %vm7838_vm1  ;;  %s4250_s4 = scalar_lea.hbm %s7589_s11, %s4752_s16  ;;  %s4251_s30 = sshll.u32 %s7501_s15, 4  ;;  %s4252_s30 = int_to_ptr.vmem [resolvable:$true] %s4251_s30 }
 0x6e2   : > { %v4193_v26 = vsel %vm1546_vm0, %v4185_v9, %v4131_v46  ;;  %vm7878_vm2 = vmmov %vm7838_vm1  ;;  %s4253_s14 = sshll.u32 %s4250_s4, 4  ;;  %s4222_s21 = scalar_lea.sflag [#allocation5], %s7164_s29  ;;  %s4254_s14 = int_to_ptr.hbm [resolvable:$true] %s4253_s14 }
 0x6e3   : > { %4172 = vrot.lane.b32.xlu1 %v4086_v55, %s7872_s0  ;;  %v3916_v50 = vpop.f32.mrf.mxu1  ;;  %vm7879_vm3 = vmmov %vm7838_vm1  ;;  %s5196_s22 = sshra.s32 %s4254_s14, 4  ;;  %s5202_s25 = scalar_lea.hbm %s7589_s11, 128  ;;  %s5197_s22 = int_to_ptr.hbm [resolvable:$true] %s5196_s22 }
 0x6e4   : > { %v4018_v40 = vadd.f32 %v4017_v27, %v3916_v50  ;;  %p5203_p9 = scmp.lt.s32.totalorder %s5197_s22, %s7589_s11 }
 0x6e5   : > { %v4103_v6 = vpop.permute.xlu1 %4102 }
 0x6e6   : > { %v4051_v22 = vadd.f32 %v4018_v40, %v3753_v13  ;;  %v4101_v19 = vpop.permute.xlu0 %4100  ;;  %v4187_v33 = vsel %vm7878_vm2, %v4059_v49, %v4103_v6 }
 0x6e7   : > { %v4186_v21 = vsel %vm7877_vm15, %v4058_v56, %v4101_v19 }
 0x6e8   : > { %v4087_v4 = vadd.f32 %v7369_v18, %v4051_v22 }
 0x6ea   : > { %4174 = vrot.lane.b32.xlu2 %v4087_v4, %s7872_s0  ;;  %s5198_s0 = scalar_lea.hbm %s5197_s22, 64 }
 0x6eb   : > { %p5199_p4 = scmp.ne.s32.totalorder %s5197_s22, %s5198_s0  ;;  %p5204_p10 = scmp.lt.s32.totalorder %s5202_s25, %s5198_s0 }
 0x6ed   : > { %p5200_p7 = pnand %p5199_p4, %p5355_p5  ;;  %p5205_p11 = por %p5204_p10, %p5203_p9 }
 0x6ee   : > { %v4107_v24 = vpop.permute.xlu0 %4106 }
 0x6ef   : > { %v4189_v17 = vsel %vm7879_vm3, %v4061_v34, %v4107_v24  ;;  %p5201_p8 = pneg %p5200_p7 }
 0x6f1   : > { %v4109_v36 = vpop.permute.xlu1 %4108  ;;  %v4137_v38 = vpop.permute.xlu2 %4136  ;;  %p5206_p12 = pnand %p5205_p11, %p5201_p8 }
 0x6f2   : > { %v4190_v0 = vsel %vm7873_vm14, %v4062_v20, %v4109_v36  ;;  %v4196_v61 = vsel %vm1546_vm0, %v4188_v7, %v4137_v38 }
 0x6f9   : > { %v4129_v39 = vpop.permute.xlu1 %4128  ;;  %v4143_v53 = vpop.permute.xlu2 %4142 }
 0x6fa   : > { %v4192_v37 = vsel %vm1546_vm0, %v4184_v5, %v4129_v39  ;;  %v4199_v48 = vsel %vm1546_vm0, %v7469_v60, %v4143_v53 }
 0x701   : > { %v4135_v42 = vpop.permute.xlu1 %4134  ;;  %v4133_v30 = vpop.permute.xlu0 %4132 }
 0x702   : > { %v4194_v57 = vsel %vm1546_vm0, %v4186_v21, %v4133_v30  ;;  %v4195_v3 = vsel %vm1546_vm0, %v4187_v33, %v4135_v42 }
 0x709   : > { %v4139_v59 = vpop.permute.xlu0 %4138 }
 0x70a   : > { %v4197_v15 = vsel %vm1546_vm0, %v4189_v17, %v4139_v59 }
 0x711   : > { %v4141_v41 = vpop.permute.xlu1 %4140 }
 0x712   : > { %v4198_v63 = vsel %vm1546_vm0, %v4190_v0, %v4141_v41 }
 0x714   : > { %v4163_v11 = vpop.permute.xlu2 %4162 }
 0x715   : > { %v4201_v28 = vsel %vm1551_vm13, %v4193_v26, %v4163_v11 }
 0x716   : > { %4209 = vst [vmem:[%s7501_s15 + $0x8] sm:$0xff] %v4201_v28 }
 0x724   : > { %v4161_v14 = vpop.permute.xlu1 %4160 }
 0x725   : > { %v4200_v62 = vsel %vm1551_vm13, %v4192_v37, %v4161_v14 }
 0x726   : > { %4208 = vst [vmem:[%s7501_s15] sm:$0xff] %v4200_v62 }
 0x72c   : > { %v4169_v8 = vpop.permute.xlu2 %4168 }
 0x72d   : > { %v4204_v1 = vsel %vm1551_vm13, %v4196_v61, %v4169_v8 }
 0x72e   : > { %4212 = vst [vmem:[%s7501_s15 + $0x20] sm:$0xff] %v4204_v1 }
 0x734   : > { %v4165_v43 = vpop.permute.xlu0 %4164 }
 0x735   : > { %v4202_v51 = vsel %vm1551_vm13, %v4194_v57, %v4165_v43 }
 0x736   : > { %4210 = vst [vmem:[%s7501_s15 + $0x10] sm:$0xff] %v4202_v51 }
 0x73c   : > { %v4167_v25 = vpop.permute.xlu1 %4166 }
 0x73d   : > { %v4203_v32 = vsel %vm1551_vm13, %v4195_v3, %v4167_v25 }
 0x73e   : > { %4211 = vst [vmem:[%s7501_s15 + $0x18] sm:$0xff] %v4203_v32 }
 0x744   : > { %v4175_v45 = vpop.permute.xlu2 %4174 }
 0x745   : > { %v4207_v16 = vsel %vm1551_vm13, %v4199_v48, %v4175_v45 }
 0x746   : > { %4215 = vst [vmem:[%s7501_s15 + $0x38] sm:$0xff] %v4207_v16 }
 0x74c   : > { %v4171_v35 = vpop.permute.xlu0 %4170 }
 0x74d   : > { %v4205_v52 = vsel %vm1551_vm13, %v4197_v15, %v4171_v35 }
 0x74e   : > { %4213 = vst [vmem:[%s7501_s15 + $0x28] sm:$0xff] %v4205_v52 }
 0x755   : > { %v4173_v44 = vpop.permute.xlu1 %4172 }
 0x756   : > { %v4206_v18 = vsel %vm1551_vm13, %v4198_v63, %v4173_v44 }
 0x757   : > { %4214 = vst [vmem:[%s7501_s15 + $0x30] sm:$0xff] %v4206_v18 }
 0x758   : > { %5209 = shalt.err (!%p5206_p12)
}
 0x759   : > { %4839 = dma.vmem_to_hbm [thread:$0]  (%p5355_p5), %s4252_s30, 1024, %s4254_s14, %s4222_s21, %s5255_s12, %s5255_s12, %s5256_s1  }
 0x75a PF: > { %p4849_p13 = scmp.ge.s32.totalorder %s5248_s20, 2  ;;  %s4268_s29 = sand.u32 1, %s5236_s17  }
 0x75b   : > { %s4269_s15 = scalar_lea.sflag [#allocation3], %s4268_s29 }
 0x75c   : > { %p4843_p0 = pnand %p4849_p13, %p5359_p6 }
 0x75e   : > { %p4844_p1 = pneg %p4843_p0 }
 0x760   : > { %5227 = dma.done.wait (%p4844_p1), %s4269_s15, 512  }
 0x761   : > { %5229 = vsyncadd (%p4844_p1), %s4269_s15, 4294966784  ;;  %s4279_s22 = scalar_lea.sflag [#allocation5], %s4268_s29 }
 0x762   : > { %5231 = dma.done.wait (%p4844_p1), %s4279_s22, 1024  }
 0x763   : > { %5233 = vsyncadd (%p4844_p1), %s4279_s22, 4294966272  ;;  %p25_p5 = scmp.ge.s32.totalorder %s5342_s23, 4   ;;  %s7880_s17 = smov %s5240_s18 }
 0x764   : > { %s7881_s18 = smov %s5244_s19  ;;  %s7882_s19 = smov %s5353_s26 }
 0x765   : > { %s7883_s20 = smov %s5342_s23  ;;  %27 = sbr.rel (!%p25_p5) target bundleno = 9 (0x9), region = 121 }
 0x76a   :  { %4285 = vsyncpa [#allocation3], 1 }
 0x76b   :  { %4287 = vsyncpa [#allocation3 + $0x1], 1 }
 0x76c   :  { %4288 = vsyncpa [#allocation5], 1 }
 0x76d   :  { %4290 = vsyncpa [#allocation5 + $0x1], 1 }

</bundles_post_ra>
